<compile_context>
chip_gen: v7x
topology: tpu7x:2x2x1
jax: 0.10.0
libtpu: 0.0.40
codegen_flags: <defaults>
</compile_context>

<pallas_src>
import functools

import jax
import jax.numpy as jnp
from jax.experimental import pallas as pl
from jax.experimental.pallas import tpu as pltpu


def _fused_gat_kernel(x_ref, edge_ref,
                      w1_ref, b1_ref, a1_ref, c1_ref,
                      w2_ref, b2_ref, a2_ref, c2_ref,
                      w3_ref, b3_ref, a3_ref, c3_ref,
                      out_ref, *, hidden, negative_slope):
    n = x_ref.shape[0]
    e = edge_ref.shape[1]

    # ---- Densify the edge list with iota compares (no XLA scatter). ----------
    src = edge_ref[0:1, :]                                   # [1, E] int32 sources
    dst = edge_ref[1:2, :]                                   # [1, E] int32 targets
    node_ids = jax.lax.broadcasted_iota(jnp.int32, (n, e), 0)
    dst_onehot = (node_ids == dst).astype(jnp.float32)       # [N, E]
    src_onehot = (node_ids == src).astype(jnp.float32)       # [N, E]
    # adj_cnt[i, j] = number of edges j -> i  (only compared > 0 below).
    adj_cnt = jax.lax.dot_general(
        dst_onehot, src_onehot, (((1,), (1,)), ((), ())),
        preferred_element_type=jnp.float32)                  # [N, N]
    eye = (jax.lax.broadcasted_iota(jnp.int32, (n, n), 0) ==
           jax.lax.broadcasted_iota(jnp.int32, (n, n), 1))   # self-loops (PyG default)
    # Additive softmax bias, hoisted once for all three layers.
    neg_bias = jnp.where(jnp.logical_or(adj_cnt > 0.0, eye), 0.0, -1e30)

    def gatv2(h, w_ref, b_ref, a_ref, c_ref, apply_relu):
        # Fused left|right linear transform: [N, Fin] @ [Fin, 2H] + [1, 2H].
        xlr = jnp.dot(h, w_ref[...], preferred_element_type=jnp.float32) + b_ref[...]
        xl = xlr[:, :hidden]                                 # [N, H] source-side feats
        xr = xlr[:, hidden:]                                 # [N, H] target-side feats

        # Pairwise GATv2 scores, fully vectorized:
        #   e_all[i, j, :] = leaky_relu(xl[j] + xr[i]);  s[i, j] = att . e_all[i, j]
        e_all = xr[:, None, :] + xl[None, :, :]              # [N, N, H]
        e_all = jnp.where(e_all > 0, e_all, negative_slope * e_all)
        att = a_ref[...].reshape(1, 1, hidden)               # [1, 1, H]
        s = jnp.sum(e_all * att, axis=-1)                    # [N, N]

        # Masked softmax over source nodes (lane axis); self-loops guarantee a
        # valid entry per row.  Divide goes to the EUP via approx reciprocal.
        s = s + neg_bias
        s = s - jnp.max(s, axis=1, keepdims=True)
        p = jnp.exp(s)                                       # masked entries -> 0
        alpha = p * pl.reciprocal(jnp.sum(p, axis=1, keepdims=True), approx=True)

        # Aggregation for all targets at once: [N,N] x [N,H] MXU matmul.
        out = jnp.dot(alpha, xl, preferred_element_type=jnp.float32) + c_ref[...]
        if apply_relu:
            out = jnp.maximum(out, 0.0)
        return out

    h = x_ref[...]
    h = gatv2(h, w1_ref, b1_ref, a1_ref, c1_ref, apply_relu=True)    # conv1 + relu
    h = gatv2(h, w2_ref, b2_ref, a2_ref, c2_ref, apply_relu=True)    # conv2_var2 + relu
    h = gatv2(h, w3_ref, b3_ref, a3_ref, c3_ref, apply_relu=False)   # conv3

    # Per-node hidden-dim sum, then per-edge target gather via the dst one-hot:
    #   ratings[e] = sums[dst[e]] = sum_i dst_onehot[i, e] * sums[i]   -> [1, E]
    sums = jnp.sum(h, axis=1, keepdims=True)                 # [N, 1]
    out_ref[...] = jnp.sum(dst_onehot * sums, axis=0, keepdims=True)
    # TODO(synk): for large N, add a target-row grid axis (parallel) and an int8
    # adjacency mask so the O(N^2) buffers stay within v7x's 64 MiB VMEM.


def gat_forward_ratings(x_flat, edge_index, params):
    """Fused conv1+relu -> conv2_var2+relu -> conv3 -> per-edge target hidden sums."""
    n_edges = edge_index.shape[1]
    h2 = params["conv1"]["w"].shape[1]           # 2 * hidden_channels (Wl|Wr fused)
    hidden = h2 // 2
    kernel = functools.partial(_fused_gat_kernel, hidden=hidden, negative_slope=0.2)
    vmem = pl.BlockSpec(memory_space=pltpu.MemorySpace.VMEM)

    args = [x_flat, edge_index]
    for name in ("conv1", "conv2_var2", "conv3"):
        p = params[name]
        args += [p["w"], p["b"], p["att"], p["bias"]]

    out = pl.pallas_call(
        kernel,
        out_shape=jax.ShapeDtypeStruct((1, n_edges), jnp.float32),
        in_specs=[vmem] * len(args),
        out_specs=vmem,
    )(*args)
    return out[0]


# ----------------------------- glue (plain JAX) -----------------------------

def glorot(key, shape):
    fan_in, fan_out = shape[0], shape[1]
    limit = (6.0 / (fan_in + fan_out)) ** 0.5
    return jax.random.uniform(key, shape, jnp.float32, -limit, limit)


def init_gatv2_params(key, in_dim, out_dim, pad_in_to=None):
    k1, k2, k3 = jax.random.split(key, 3)
    wl = glorot(k1, (in_dim, out_dim))
    wr = glorot(k2, (in_dim, out_dim))
    w = jnp.concatenate([wl, wr], axis=1)                     # fused [Fin, 2H]
    if pad_in_to is not None and pad_in_to > in_dim:
        w = jnp.pad(w, ((0, pad_in_to - in_dim), (0, 0)))     # lane/sublane align K
    return dict(
        w=w,
        b=jnp.zeros((1, 2 * out_dim), jnp.float32),           # fused [bl | br]
        att=glorot(k3, (1, out_dim)),
        bias=jnp.zeros((1, out_dim), jnp.float32),
    )


def gat_model_forward(x, edge_index, params):
    """x: [B, M, F] float32; edge_index: [2, E] int32 (row0=source, row1=target)."""
    b, m, f = x.shape
    xf = x.reshape(b * m, f)                                  # x.view(-1, x.size(2))
    f_pad = params["conv1"]["w"].shape[0]                     # conv1 K padded to 128
    if f_pad > f:
        xf = jnp.pad(xf, ((0, 0), (0, f_pad - f)))
    return gat_forward_ratings(xf, edge_index.astype(jnp.int32), params)


if __name__ == "__main__":
    key = jax.random.PRNGKey(0)
    kx, ke, kp = jax.random.split(key, 3)

    B, M, F, H, E = 2, 8, 100, 32, 24     # num_features = 100, hidden_channels = 32
    N = B * M
    F_PAD = ((F + 127) // 128) * 128      # 128

    x = jax.random.normal(kx, (B, M, F), jnp.float32)
    # Deterministic distinct (source, target) pairs.
    pair_ids = jax.random.choice(ke, N * N, shape=(E,), replace=False)
    src = (pair_ids // N).astype(jnp.int32)
    dst = (pair_ids % N).astype(jnp.int32)
    edge_index = jnp.stack([src, dst])

    kp1, kp2, kp3 = jax.random.split(kp, 3)
    params = {
        "conv1": init_gatv2_params(kp1, F, H, pad_in_to=F_PAD),
        "conv2_var2": init_gatv2_params(kp2, H, H),
        "conv3": init_gatv2_params(kp3, H, H),
    }

    fwd = jax.jit(gat_model_forward)
    ratings = fwd(x, edge_index, params)
    jax.block_until_ready(ratings)
    assert ratings.shape == (E,)
    print("KERNEL_OK")
</pallas_src>

<mosaic_0001>
module attributes {stable_mosaic.version = 11 : i64} {
  func.func @_fused_gat_kernel(%arg0: memref<16x128xf32, #tpu.memory_space<vmem>>, %arg1: memref<2x24xi32, #tpu.memory_space<vmem>>, %arg2: memref<128x64xf32, #tpu.memory_space<vmem>>, %arg3: memref<1x64xf32, #tpu.memory_space<vmem>>, %arg4: memref<1x32xf32, #tpu.memory_space<vmem>>, %arg5: memref<1x32xf32, #tpu.memory_space<vmem>>, %arg6: memref<32x64xf32, #tpu.memory_space<vmem>>, %arg7: memref<1x64xf32, #tpu.memory_space<vmem>>, %arg8: memref<1x32xf32, #tpu.memory_space<vmem>>, %arg9: memref<1x32xf32, #tpu.memory_space<vmem>>, %arg10: memref<32x64xf32, #tpu.memory_space<vmem>>, %arg11: memref<1x64xf32, #tpu.memory_space<vmem>>, %arg12: memref<1x32xf32, #tpu.memory_space<vmem>>, %arg13: memref<1x32xf32, #tpu.memory_space<vmem>>, %arg14: memref<1x24xf32, #tpu.memory_space<vmem>>) attributes {dimension_semantics = [], scalar_prefetch = 0 : i64, scratch_operands = 0 : i64, tpu.core_type = #tpu.core_type<tc>} {
    %c0 = arith.constant 0 : index
    %c0_0 = arith.constant 0 : index
    %0 = vector.load %arg1[%c0, %c0_0] : memref<2x24xi32, #tpu.memory_space<vmem>>, vector<1x24xi32>
    %c1 = arith.constant 1 : index
    %c0_1 = arith.constant 0 : index
    %1 = vector.load %arg1[%c1, %c0_1] : memref<2x24xi32, #tpu.memory_space<vmem>>, vector<1x24xi32>
    %2 = tpu.iota {dimensions = array<i32: 0>} : vector<16x24xi32>
    %3 = vector.broadcast %1 : vector<1x24xi32> to vector<16x24xi32>
    %4 = arith.cmpi eq, %2, %3 : vector<16x24xi32>
    %5 = arith.extui %4 : vector<16x24xi1> to vector<16x24xi32>
    %6 = arith.sitofp %5 : vector<16x24xi32> to vector<16x24xf32>
    %7 = vector.broadcast %0 : vector<1x24xi32> to vector<16x24xi32>
    %8 = arith.cmpi eq, %2, %7 : vector<16x24xi32>
    %9 = arith.extui %8 : vector<16x24xi1> to vector<16x24xi32>
    %10 = arith.sitofp %9 : vector<16x24xi32> to vector<16x24xf32>
    %cst = arith.constant dense<0.000000e+00> : vector<16x16xf32>
    %11 = tpu.matmul %6, %10, %cst {dimension_numbers = #tpu.dot_dimension_numbers<[1], [1], [0], [0], [0, 0, 1, 0], [], []>} : vector<16x24xf32>, vector<16x24xf32>, vector<16x16xf32> -> vector<16x16xf32>
    %12 = tpu.iota {dimensions = array<i32: 0>} : vector<16x16xi32>
    %13 = tpu.iota {dimensions = array<i32: 1>} : vector<16x16xi32>
    %14 = arith.cmpi eq, %12, %13 : vector<16x16xi32>
    %cst_2 = arith.constant 0.000000e+00 : f32
    %15 = vector.broadcast %cst_2 : f32 to vector<16x16xf32>
    %16 = arith.cmpf ogt, %11, %15 : vector<16x16xf32>
    %17 = arith.ori %16, %14 : vector<16x16xi1>
    %cst_3 = arith.constant 0.000000e+00 : f32
    %cst_4 = arith.constant -1.000000e+30 : f32
    %18 = vector.broadcast %cst_3 : f32 to vector<16x16xf32>
    %19 = vector.broadcast %cst_4 : f32 to vector<16x16xf32>
    %20 = arith.select %17, %18, %19 : vector<16x16xi1>, vector<16x16xf32>
    %c0_5 = arith.constant 0 : index
    %c0_6 = arith.constant 0 : index
    %21 = vector.load %arg0[%c0_5, %c0_6] : memref<16x128xf32, #tpu.memory_space<vmem>>, vector<16x128xf32>
    %c0_7 = arith.constant 0 : index
    %c0_8 = arith.constant 0 : index
    %22 = vector.load %arg2[%c0_7, %c0_8] : memref<128x64xf32, #tpu.memory_space<vmem>>, vector<128x64xf32>
    %cst_9 = arith.constant dense<0.000000e+00> : vector<16x64xf32>
    %23 = tpu.matmul %21, %22, %cst_9 {dimension_numbers = #tpu.dot_dimension_numbers<[1], [0], [0], [1], [0, 0, 1, 1], [], []>} : vector<16x128xf32>, vector<128x64xf32>, vector<16x64xf32> -> vector<16x64xf32>
    %c0_10 = arith.constant 0 : index
    %c0_11 = arith.constant 0 : index
    %24 = vector.load %arg3[%c0_10, %c0_11] : memref<1x64xf32, #tpu.memory_space<vmem>>, vector<1x64xf32>
    %25 = vector.broadcast %24 : vector<1x64xf32> to vector<16x64xf32>
    %26 = arith.addf %23, %25 : vector<16x64xf32>
    %27 = vector.extract_strided_slice %26 {offsets = [0, 0], sizes = [16, 32], strides = [1, 1]} : vector<16x64xf32> to vector<16x32xf32>
    %28 = vector.extract_strided_slice %26 {offsets = [0, 32], sizes = [16, 32], strides = [1, 1]} : vector<16x64xf32> to vector<16x32xf32>
    %29 = vector.shape_cast %28 : vector<16x32xf32> to vector<16x1x32xf32>
    %30 = vector.shape_cast %27 : vector<16x32xf32> to vector<1x16x32xf32>
    %31 = vector.broadcast %29 : vector<16x1x32xf32> to vector<16x16x32xf32>
    %32 = vector.broadcast %30 : vector<1x16x32xf32> to vector<16x16x32xf32>
    %33 = arith.addf %31, %32 : vector<16x16x32xf32>
    %cst_12 = arith.constant 0.000000e+00 : f32
    %34 = vector.broadcast %cst_12 : f32 to vector<16x16x32xf32>
    %35 = arith.cmpf ogt, %33, %34 : vector<16x16x32xf32>
    %cst_13 = arith.constant 2.000000e-01 : f32
    %36 = vector.broadcast %cst_13 : f32 to vector<16x16x32xf32>
    %37 = arith.mulf %36, %33 : vector<16x16x32xf32>
    %38 = arith.select %35, %33, %37 : vector<16x16x32xi1>, vector<16x16x32xf32>
    %c0_14 = arith.constant 0 : index
    %c0_15 = arith.constant 0 : index
    %39 = vector.load %arg4[%c0_14, %c0_15] : memref<1x32xf32, #tpu.memory_space<vmem>>, vector<1x32xf32>
    %40 = vector.shape_cast %39 : vector<1x32xf32> to vector<1x1x32xf32>
    %41 = vector.broadcast %40 : vector<1x1x32xf32> to vector<16x16x32xf32>
    %42 = arith.mulf %38, %41 : vector<16x16x32xf32>
    %cst_16 = arith.constant dense<0.000000e+00> : vector<16x16xf32>
    %43 = vector.multi_reduction <add>, %42, %cst_16 [2] : vector<16x16x32xf32> to vector<16x16xf32>
    %44 = arith.addf %43, %20 : vector<16x16xf32>
    %cst_17 = arith.constant dense<0xFF800000> : vector<16xf32>
    %45 = vector.multi_reduction <maximumf>, %44, %cst_17 [1] : vector<16x16xf32> to vector<16xf32>
    %46 = vector.shape_cast %45 : vector<16xf32> to vector<16x1xf32>
    %47 = vector.broadcast %46 : vector<16x1xf32> to vector<16x16xf32>
    %48 = arith.subf %44, %47 : vector<16x16xf32>
    %49 = math.exp %48 : vector<16x16xf32>
    %cst_18 = arith.constant dense<0.000000e+00> : vector<16xf32>
    %50 = vector.multi_reduction <add>, %49, %cst_18 [1] : vector<16x16xf32> to vector<16xf32>
    %51 = vector.shape_cast %50 : vector<16xf32> to vector<16x1xf32>
    %52 = tpu.reciprocal %51 {approx = true} : vector<16x1xf32> -> vector<16x1xf32>
    %53 = vector.broadcast %52 : vector<16x1xf32> to vector<16x16xf32>
    %54 = arith.mulf %49, %53 : vector<16x16xf32>
    %cst_19 = arith.constant dense<0.000000e+00> : vector<16x32xf32>
    %55 = tpu.matmul %54, %27, %cst_19 {dimension_numbers = #tpu.dot_dimension_numbers<[1], [0], [0], [1], [0, 0, 1, 1], [], []>} : vector<16x16xf32>, vector<16x32xf32>, vector<16x32xf32> -> vector<16x32xf32>
    %c0_20 = arith.constant 0 : index
    %c0_21 = arith.constant 0 : index
    %56 = vector.load %arg5[%c0_20, %c0_21] : memref<1x32xf32, #tpu.memory_space<vmem>>, vector<1x32xf32>
    %57 = vector.broadcast %56 : vector<1x32xf32> to vector<16x32xf32>
    %58 = arith.addf %55, %57 : vector<16x32xf32>
    %cst_22 = arith.constant 0.000000e+00 : f32
    %59 = vector.broadcast %cst_22 : f32 to vector<16x32xf32>
    %60 = arith.maximumf %58, %59 : vector<16x32xf32>
    %c0_23 = arith.constant 0 : index
    %c0_24 = arith.constant 0 : index
    %61 = vector.load %arg6[%c0_23, %c0_24] : memref<32x64xf32, #tpu.memory_space<vmem>>, vector<32x64xf32>
    %cst_25 = arith.constant dense<0.000000e+00> : vector<16x64xf32>
    %62 = tpu.matmul %60, %61, %cst_25 {dimension_numbers = #tpu.dot_dimension_numbers<[1], [0], [0], [1], [0, 0, 1, 1], [], []>} : vector<16x32xf32>, vector<32x64xf32>, vector<16x64xf32> -> vector<16x64xf32>
    %c0_26 = arith.constant 0 : index
    %c0_27 = arith.constant 0 : index
    %63 = vector.load %arg7[%c0_26, %c0_27] : memref<1x64xf32, #tpu.memory_space<vmem>>, vector<1x64xf32>
    %64 = vector.broadcast %63 : vector<1x64xf32> to vector<16x64xf32>
    %65 = arith.addf %62, %64 : vector<16x64xf32>
    %66 = vector.extract_strided_slice %65 {offsets = [0, 0], sizes = [16, 32], strides = [1, 1]} : vector<16x64xf32> to vector<16x32xf32>
    %67 = vector.extract_strided_slice %65 {offsets = [0, 32], sizes = [16, 32], strides = [1, 1]} : vector<16x64xf32> to vector<16x32xf32>
    %68 = vector.shape_cast %67 : vector<16x32xf32> to vector<16x1x32xf32>
    %69 = vector.shape_cast %66 : vector<16x32xf32> to vector<1x16x32xf32>
    %70 = vector.broadcast %68 : vector<16x1x32xf32> to vector<16x16x32xf32>
    %71 = vector.broadcast %69 : vector<1x16x32xf32> to vector<16x16x32xf32>
    %72 = arith.addf %70, %71 : vector<16x16x32xf32>
    %cst_28 = arith.constant 0.000000e+00 : f32
    %73 = vector.broadcast %cst_28 : f32 to vector<16x16x32xf32>
    %74 = arith.cmpf ogt, %72, %73 : vector<16x16x32xf32>
    %cst_29 = arith.constant 2.000000e-01 : f32
    %75 = vector.broadcast %cst_29 : f32 to vector<16x16x32xf32>
    %76 = arith.mulf %75, %72 : vector<16x16x32xf32>
    %77 = arith.select %74, %72, %76 : vector<16x16x32xi1>, vector<16x16x32xf32>
    %c0_30 = arith.constant 0 : index
    %c0_31 = arith.constant 0 : index
    %78 = vector.load %arg8[%c0_30, %c0_31] : memref<1x32xf32, #tpu.memory_space<vmem>>, vector<1x32xf32>
    %79 = vector.shape_cast %78 : vector<1x32xf32> to vector<1x1x32xf32>
    %80 = vector.broadcast %79 : vector<1x1x32xf32> to vector<16x16x32xf32>
    %81 = arith.mulf %77, %80 : vector<16x16x32xf32>
    %cst_32 = arith.constant dense<0.000000e+00> : vector<16x16xf32>
    %82 = vector.multi_reduction <add>, %81, %cst_32 [2] : vector<16x16x32xf32> to vector<16x16xf32>
    %83 = arith.addf %82, %20 : vector<16x16xf32>
    %cst_33 = arith.constant dense<0xFF800000> : vector<16xf32>
    %84 = vector.multi_reduction <maximumf>, %83, %cst_33 [1] : vector<16x16xf32> to vector<16xf32>
    %85 = vector.shape_cast %84 : vector<16xf32> to vector<16x1xf32>
    %86 = vector.broadcast %85 : vector<16x1xf32> to vector<16x16xf32>
    %87 = arith.subf %83, %86 : vector<16x16xf32>
    %88 = math.exp %87 : vector<16x16xf32>
    %cst_34 = arith.constant dense<0.000000e+00> : vector<16xf32>
    %89 = vector.multi_reduction <add>, %88, %cst_34 [1] : vector<16x16xf32> to vector<16xf32>
    %90 = vector.shape_cast %89 : vector<16xf32> to vector<16x1xf32>
    %91 = tpu.reciprocal %90 {approx = true} : vector<16x1xf32> -> vector<16x1xf32>
    %92 = vector.broadcast %91 : vector<16x1xf32> to vector<16x16xf32>
    %93 = arith.mulf %88, %92 : vector<16x16xf32>
    %cst_35 = arith.constant dense<0.000000e+00> : vector<16x32xf32>
    %94 = tpu.matmul %93, %66, %cst_35 {dimension_numbers = #tpu.dot_dimension_numbers<[1], [0], [0], [1], [0, 0, 1, 1], [], []>} : vector<16x16xf32>, vector<16x32xf32>, vector<16x32xf32> -> vector<16x32xf32>
    %c0_36 = arith.constant 0 : index
    %c0_37 = arith.constant 0 : index
    %95 = vector.load %arg9[%c0_36, %c0_37] : memref<1x32xf32, #tpu.memory_space<vmem>>, vector<1x32xf32>
    %96 = vector.broadcast %95 : vector<1x32xf32> to vector<16x32xf32>
    %97 = arith.addf %94, %96 : vector<16x32xf32>
    %cst_38 = arith.constant 0.000000e+00 : f32
    %98 = vector.broadcast %cst_38 : f32 to vector<16x32xf32>
    %99 = arith.maximumf %97, %98 : vector<16x32xf32>
    %c0_39 = arith.constant 0 : index
    %c0_40 = arith.constant 0 : index
    %100 = vector.load %arg10[%c0_39, %c0_40] : memref<32x64xf32, #tpu.memory_space<vmem>>, vector<32x64xf32>
    %cst_41 = arith.constant dense<0.000000e+00> : vector<16x64xf32>
    %101 = tpu.matmul %99, %100, %cst_41 {dimension_numbers = #tpu.dot_dimension_numbers<[1], [0], [0], [1], [0, 0, 1, 1], [], []>} : vector<16x32xf32>, vector<32x64xf32>, vector<16x64xf32> -> vector<16x64xf32>
    %c0_42 = arith.constant 0 : index
    %c0_43 = arith.constant 0 : index
    %102 = vector.load %arg11[%c0_42, %c0_43] : memref<1x64xf32, #tpu.memory_space<vmem>>, vector<1x64xf32>
    %103 = vector.broadcast %102 : vector<1x64xf32> to vector<16x64xf32>
    %104 = arith.addf %101, %103 : vector<16x64xf32>
    %105 = vector.extract_strided_slice %104 {offsets = [0, 0], sizes = [16, 32], strides = [1, 1]} : vector<16x64xf32> to vector<16x32xf32>
    %106 = vector.extract_strided_slice %104 {offsets = [0, 32], sizes = [16, 32], strides = [1, 1]} : vector<16x64xf32> to vector<16x32xf32>
    %107 = vector.shape_cast %106 : vector<16x32xf32> to vector<16x1x32xf32>
    %108 = vector.shape_cast %105 : vector<16x32xf32> to vector<1x16x32xf32>
    %109 = vector.broadcast %107 : vector<16x1x32xf32> to vector<16x16x32xf32>
    %110 = vector.broadcast %108 : vector<1x16x32xf32> to vector<16x16x32xf32>
    %111 = arith.addf %109, %110 : vector<16x16x32xf32>
    %cst_44 = arith.constant 0.000000e+00 : f32
    %112 = vector.broadcast %cst_44 : f32 to vector<16x16x32xf32>
    %113 = arith.cmpf ogt, %111, %112 : vector<16x16x32xf32>
    %cst_45 = arith.constant 2.000000e-01 : f32
    %114 = vector.broadcast %cst_45 : f32 to vector<16x16x32xf32>
    %115 = arith.mulf %114, %111 : vector<16x16x32xf32>
    %116 = arith.select %113, %111, %115 : vector<16x16x32xi1>, vector<16x16x32xf32>
    %c0_46 = arith.constant 0 : index
    %c0_47 = arith.constant 0 : index
    %117 = vector.load %arg12[%c0_46, %c0_47] : memref<1x32xf32, #tpu.memory_space<vmem>>, vector<1x32xf32>
    %118 = vector.shape_cast %117 : vector<1x32xf32> to vector<1x1x32xf32>
    %119 = vector.broadcast %118 : vector<1x1x32xf32> to vector<16x16x32xf32>
    %120 = arith.mulf %116, %119 : vector<16x16x32xf32>
    %cst_48 = arith.constant dense<0.000000e+00> : vector<16x16xf32>
    %121 = vector.multi_reduction <add>, %120, %cst_48 [2] : vector<16x16x32xf32> to vector<16x16xf32>
    %122 = arith.addf %121, %20 : vector<16x16xf32>
    %cst_49 = arith.constant dense<0xFF800000> : vector<16xf32>
    %123 = vector.multi_reduction <maximumf>, %122, %cst_49 [1] : vector<16x16xf32> to vector<16xf32>
    %124 = vector.shape_cast %123 : vector<16xf32> to vector<16x1xf32>
    %125 = vector.broadcast %124 : vector<16x1xf32> to vector<16x16xf32>
    %126 = arith.subf %122, %125 : vector<16x16xf32>
    %127 = math.exp %126 : vector<16x16xf32>
    %cst_50 = arith.constant dense<0.000000e+00> : vector<16xf32>
    %128 = vector.multi_reduction <add>, %127, %cst_50 [1] : vector<16x16xf32> to vector<16xf32>
    %129 = vector.shape_cast %128 : vector<16xf32> to vector<16x1xf32>
    %130 = tpu.reciprocal %129 {approx = true} : vector<16x1xf32> -> vector<16x1xf32>
    %131 = vector.broadcast %130 : vector<16x1xf32> to vector<16x16xf32>
    %132 = arith.mulf %127, %131 : vector<16x16xf32>
    %cst_51 = arith.constant dense<0.000000e+00> : vector<16x32xf32>
    %133 = tpu.matmul %132, %105, %cst_51 {dimension_numbers = #tpu.dot_dimension_numbers<[1], [0], [0], [1], [0, 0, 1, 1], [], []>} : vector<16x16xf32>, vector<16x32xf32>, vector<16x32xf32> -> vector<16x32xf32>
    %c0_52 = arith.constant 0 : index
    %c0_53 = arith.constant 0 : index
    %134 = vector.load %arg13[%c0_52, %c0_53] : memref<1x32xf32, #tpu.memory_space<vmem>>, vector<1x32xf32>
    %135 = vector.broadcast %134 : vector<1x32xf32> to vector<16x32xf32>
    %136 = arith.addf %133, %135 : vector<16x32xf32>
    %cst_54 = arith.constant dense<0.000000e+00> : vector<16xf32>
    %137 = vector.multi_reduction <add>, %136, %cst_54 [1] : vector<16x32xf32> to vector<16xf32>
    %138 = vector.shape_cast %137 : vector<16xf32> to vector<16x1xf32>
    %139 = vector.broadcast %138 : vector<16x1xf32> to vector<16x24xf32>
    %140 = arith.mulf %6, %139 : vector<16x24xf32>
    %cst_55 = arith.constant dense<0.000000e+00> : vector<24xf32>
    %141 = vector.multi_reduction <add>, %140, %cst_55 [0] : vector<16x24xf32> to vector<24xf32>
    %142 = vector.shape_cast %141 : vector<24xf32> to vector<1x24xf32>
    %c0_56 = arith.constant 0 : index
    %c0_57 = arith.constant 0 : index
    %143 = vector.load %arg14[%c0_56, %c0_57] : memref<1x24xf32, #tpu.memory_space<vmem>>, vector<1x24xf32>
    tpu.vector_store %arg14[%c0_56, %c0_57], %142 {strides = array<i32>} : memref<1x24xf32, #tpu.memory_space<vmem>>, vector<1x24xf32>,
    return
  }
}

</mosaic_0001>

<bundles_post_ra>
// kernel: gat_model_forward.1
= control target key start
LH: loop header
LB: loop body
LE: loop exit
PB: predicated region body
PF: predicated region fallthrough
CT: control target
= control target key end

     0   :  { %v50_v0 = vlaneseq  ;;  %vm73_vm0 = vcmask 195584   ;;  %v6771_v13 = vmov 0.0   ;;  %s9512_s0 = inlined_call_operand.vmem [shape: f32[16,128], index: 0, kind: input, shape index: {}]   ;;  %s9513_s1 = inlined_call_operand.vmem [shape: s32[2,24], index: 1, kind: input, shape index: {}]   ;;  %s9514_s2 = inlined_call_operand.vmem [shape: f32[128,64], index: 2, kind: input, shape index: {}]   ;;  %s9515_s3 = inlined_call_operand.vmem [shape: f32[1,64], index: 3, kind: input, shape index: {}]   ;;  %s9516_s4 = inlined_call_operand.vmem [shape: f32[1,32], index: 4, kind: input, shape index: {}]   ;;  %s9517_s5 = inlined_call_operand.vmem [shape: f32[1,32], index: 5, kind: input, shape index: {}]   ;;  %s9518_s6 = inlined_call_operand.vmem [shape: f32[32,64], index: 6, kind: input, shape index: {}]   ;;  %s9519_s7 = inlined_call_operand.vmem [shape: f32[1,64], index: 7, kind: input, shape index: {}]   ;;  %s9520_s8 = inlined_call_operand.vmem [shape: f32[1,32], index: 8, kind: input, shape index: {}]   ;;  %s9521_s9 = inlined_call_operand.vmem [shape: f32[1,32], index: 9, kind: input, shape index: {}]   ;;  %s9522_s10 = inlined_call_operand.vmem [shape: f32[32,64], index: 10, kind: input, shape index: {}]   ;;  %s9523_s11 = inlined_call_operand.vmem [shape: f32[1,64], index: 11, kind: input, shape index: {}]   ;;  %s9524_s12 = inlined_call_operand.vmem [shape: f32[1,32], index: 12, kind: input, shape index: {}]   ;;  %s9525_s13 = inlined_call_operand.vmem [shape: f32[1,32], index: 13, kind: input, shape index: {}]   ;;  %s9526_s14 = inlined_call_operand.hbm [shape: f32[1,24], index: 14, kind: output, shape index: {}]  }
   0x1   :  { %v6311_v1 = vld [vmem:[%s9513_s1] ss:$0 sm:$0xff]  ;;  %v6308_v2 = vld [vmem:[%s9513_s1 + $0x1] ss:$0 sm:$0xff]  ;;  %v174_v5 = vld [vmem:[%s9514_s2 + $0x8] sm:$0xff] }
   0x2   :  { %v173_v3 = vld [vmem:[%s9514_s2] sm:$0xff]  ;;  %v6863_v4 = vshrl.u32 %v50_v0, 7  ;;  %v175_v6 = vld [vmem:[%s9514_s2 + $0x10] sm:$0xff]  ;;  %v176_v7 = vld [vmem:[%s9514_s2 + $0x18] sm:$0xff] }
   0x3   :  { %v6474_v8 = vpack.c.bf16 %v174_v5, %v173_v3  ;;  %v6478_v9 = vpack.c.bf16 %v176_v7, %v175_v6  ;;  %v177_v11 = vld [vmem:[%s9514_s2 + $0x20] sm:$0xff]  ;;  %v178_v12 = vld [vmem:[%s9514_s2 + $0x28] sm:$0xff]  ;;  %vm6469_vm4 = vmpackc.low %vm73_vm0, %vm73_vm0 }
   0x4   :  { %v6875_v10 = vadd.s32 8, %v6863_v4  ;;  %vm67_vm1 = vcmp.eq.s32.totalorder %v6863_v4, %v6311_v1  ;;  %vm57_vm2 = vcmp.eq.s32.totalorder %v6863_v4, %v6308_v2  ;;  %v6482_v17 = vpack.c.bf16 %v178_v12, %v177_v11  ;;  %v171_v18 = vld [vmem:[%s9512_s0] sm:$0xff] }
   0x5   :  { %v6312_v14 = vsel %vm67_vm1, 1.0, %v6771_v13  ;;  %v6885_v15 = vsel %vm57_vm2, 1.0, %v6771_v13  ;;  %6475 = vmatprep.subr.bf16.mxu1 %v6474_v8 }
   0x6   :  { %9682 = vst [vmem:[#allocation5_spill] sm:$0xff] %v6885_v15  ;;  %vm68_vm3 = vcmp.eq.s32.totalorder %v6875_v10, %v6311_v1  ;;  %6387 = vmatprep.mubr.msk.f32.mxu0 %vm73_vm0, %v6885_v15  ;;  %6477 = vmatpush3.bf16.msra.mxu1 %v6474_v8 }
   0x7   :  { %v6313_v16 = vsel %vm68_vm3, 1.0, %v6771_v13  ;;  %6479 = vmatprep.subr.bf16.mxu1 %v6478_v9 }
   0x8   :  { %19 = vsyncpa [#allocation3], 0  ;;  %v6468_v19 = vpack.c.bf16 %v6313_v16, %v6312_v14  ;;  %v179_v20 = vld [vmem:[%s9514_s2 + $0x30] sm:$0xff]  ;;  %v180_v21 = vld [vmem:[%s9514_s2 + $0x38] sm:$0xff]  ;;  %6422 = vmatprep.mubr.f32.mxu1 %v171_v18  ;;  %vm58_vm5 = vcmp.eq.s32.totalorder %v6875_v10, %v6308_v2  ;;  %s6772_s21 = smov 32   ;;  %v6938_v38 = vand.u32 127, %v50_v0 }
   0x9   :  { %v6486_v22 = vpack.c.bf16 %v180_v21, %v179_v20  ;;  %v181_v23 = vld [vmem:[%s9514_s2 + $0x40] sm:$0xff]  ;;  %v182_v24 = vld [vmem:[%s9514_s2 + $0x48] sm:$0xff]  ;;  %v6908_v25 = vsel %vm58_vm5, 1.0, %v6771_v13  ;;  %v183_v27 = vld [vmem:[%s9514_s2 + $0x50] sm:$0xff]  ;;  %v6943_v39 = vsub.s32 0, %v6863_v4  ;;  %v6947_v45 = vsub.s32 1, %v6863_v4 }
   0xa   :  { %6470 = vmatprep.subr.msk.bf16.mxu0 %vm6469_vm4, %v6468_v19  ;;  %6481 = vmatpush3.bf16.msra.mxu1 %v6478_v9  ;;  %9683 = vst [vmem:[#allocation6_spill] sm:$0xff] %v6908_v25  ;;  %v6490_v26 = vpack.c.bf16 %v182_v24, %v181_v23  ;;  %v184_v28 = vld [vmem:[%s9514_s2 + $0x58] sm:$0xff]  ;;  %v185_v30 = vld [vmem:[%s9514_s2 + $0x60] sm:$0xff]  ;;  %v186_v31 = vld [vmem:[%s9514_s2 + $0x68] sm:$0xff]  ;;  %vm164_vm6 = vcmp.eq.s32.totalorder %v6875_v10, %v6938_v38  ;;  %v6773_v42 = vmov -1e+30  }
   0xb   :  { %6473 = vmatpush3.bf16.xpose.msk.msra.mxu0 %vm6469_vm4, %v6468_v19  ;;  %6483 = vmatprep.subr.bf16.mxu1 %v6482_v17  ;;  %v6494_v29 = vpack.c.bf16 %v184_v28, %v183_v27  ;;  %v6498_v32 = vpack.c.bf16 %v186_v31, %v185_v30  ;;  %v187_v33 = vld [vmem:[%s9514_s2 + $0x70] sm:$0xff]  ;;  %v188_v34 = vld [vmem:[%s9514_s2 + $0x78] sm:$0xff]  ;;  %v172_v36 = vld [vmem:[%s9512_s0 + $0x8] sm:$0xff]  ;;  %v6951_v47 = vsub.s32 2, %v6863_v4  ;;  %v6955_v49 = vsub.s32 3, %v6863_v4 }
   0xc   :  { %v6502_v35 = vpack.c.bf16 %v188_v34, %v187_v33  ;;  %v6319_v37 = vld [vmem:[%s9516_s4] ss:$0 sm:$0xff]  ;;  %v6959_v51 = vsub.s32 4, %v6863_v4  ;;  %v6966_v55 = vsub.s32 5, %v6863_v4  ;;  %v6976_v61 = vsub.s32 6, %v6863_v4 }
   0xd   :  { %591 = vrot.lane.b32.xlu1 %v6319_v37, %s6772_s21  ;;  %v6318_v52 = vld [vmem:[%s9515_s3] ss:$0 sm:$0xff]  ;;  %vm163_vm9 = vcmp.eq.s32.totalorder %v6863_v4, %v6938_v38  ;;  %v6982_v63 = vsub.s32 7, %v6863_v4  ;;  %s6775_s3 = smov 96  }
   0xe   :  { %6485 = vmatpush3.bf16.msra.mxu1 %v6482_v17  ;;  %9684 = vst [vmem:[#allocation7_spill] sm:$0xff] %v6976_v61 }
   0xf   :  { %6487 = vmatprep.subr.bf16.mxu1 %v6486_v22  ;;  %9685 = vst [vmem:[#allocation8_spill] sm:$0xff] %v6982_v63 }
  0x12   :  { %6388 = vmatmul.mubr.msk.f32.vlgmr.msra.gmra.mrb[0].mxu0 %vm73_vm0, %v6908_v25  ;;  %6489 = vmatpush3.bf16.msra.mxu1 %v6486_v22  ;;  %v6774_v22 = vmov 1966171168  }
  0x13   :  { %6491 = vmatprep.subr.bf16.mxu1 %v6490_v26  ;;  %v275_v23 = vunpack.c.l.s4 %v6774_v22 }
  0x16   :  { %6493 = vmatpush3.bf16.msra.mxu1 %v6490_v26  ;;  %v276_v26 = vunpack.c.0.s8 %v275_v23 }
  0x17   :  { %6495 = vmatprep.subr.bf16.mxu1 %v6494_v29 }
  0x18   :  { %v7022_v28 = vsub.s32 %v276_v26, %v6863_v4 }
  0x1a   :  { %6497 = vmatpush3.bf16.msra.mxu1 %v6494_v29  ;;  %9698 = vst [vmem:[#allocation21_spill] sm:$0xff] %v7022_v28 }
  0x1b   :  { %6499 = vmatprep.subr.bf16.mxu1 %v6498_v32 }
  0x1e   :  { %6501 = vmatpush3.bf16.msra.mxu1 %v6498_v32 }
  0x1f   :  { %6503 = vmatprep.subr.bf16.mxu1 %v6502_v35 }
  0x22   :  { %6505 = vmatpush3.bf16.msra.mxu1 %v6502_v35 }
  0x25   :  { %6423 = vmatmul.mubr.f32.vlgmr.msra.gmra.mrb[0].mxu1 %v172_v36 }
  0xe5   :  { %v6389_v40 = vpop.f32.mrb[0].mxu0 }
  0xe6   :  { %vm166_vm7 = vcmp.gt.f32.partialorder %v6389_v40, 0.0  ;;  %v152_v41 = vpop.f32.mrb[1].mxu0 }
  0xe7   :  { %vm168_vm8 = vmor %vm166_vm7, %vm164_vm6  ;;  %vm165_vm10 = vcmp.gt.f32.partialorder %v152_v41, 0.0 }
  0xe8   :  { %v170_v43 = vsel %vm168_vm8, 0.0, %v6773_v42  ;;  %vm167_vm11 = vmor %vm165_vm10, %vm163_vm9 }
  0xe9   :  { %v944_v44 = vrot.slane %v170_v43, %v6943_v39  ;;  %v955_v46 = vrot.slane %v170_v43, %v6947_v45  ;;  %v966_v48 = vrot.slane %v170_v43, %v6951_v47  ;;  %v977_v50 = vrot.slane %v170_v43, %v6955_v49 }
  0xea   :  { %v988_v54 = vrot.slane %v170_v43, %v6959_v51  ;;  %v999_v60 = vrot.slane %v170_v43, %v6966_v55  ;;  %v1010_v62 = vrot.slane %v170_v43, %v6976_v61  ;;  %v1021_v0 = vrot.slane %v170_v43, %v6982_v63 }
  0xeb   :  { %950 = vbcast.lane.b32.xlu0 %v944_v44, 264  ;;  %946 = vbcast.lane.b32.xlu1 %v944_v44, 256  ;;  %v169_v1 = vsel %vm167_vm11, 0.0, %v6773_v42 }
  0xec   :  { %v856_v2 = vrot.slane %v169_v1, %v6943_v39  ;;  %v867_v3 = vrot.slane %v169_v1, %v6947_v45  ;;  %v878_v5 = vrot.slane %v169_v1, %v6951_v47  ;;  %v889_v6 = vrot.slane %v169_v1, %v6955_v49 }
  0xed   :  { %v900_v7 = vrot.slane %v169_v1, %v6959_v51  ;;  %v911_v8 = vrot.slane %v169_v1, %v6966_v55  ;;  %v922_v9 = vrot.slane %v169_v1, %v6976_v61  ;;  %v933_v10 = vrot.slane %v169_v1, %v6982_v63  ;;  %v7055_v1 = vpop.permute.xlu1 %591 }
  0xef   :  { %961 = vbcast.lane.b32.xlu0 %v955_v46, 264  ;;  %957 = vbcast.lane.b32.xlu1 %v955_v46, 256 }
  0xf3   :  { %972 = vbcast.lane.b32.xlu0 %v966_v48, 264  ;;  %968 = vbcast.lane.b32.xlu1 %v966_v48, 256 }
  0xf7   :  { %983 = vbcast.lane.b32.xlu0 %v977_v50, 264  ;;  %979 = vbcast.lane.b32.xlu1 %v977_v50, 256 }
  0xf8   :  { %v6424_v53 = vpop.f32.mrb[0].mxu1 }
  0xf9   :  { %v6968_v56 = vadd.f32 %v6424_v53, %v6318_v52  ;;  %v262_v57 = vpop.f32.mrb[1].mxu1 }
  0xfa   :  { %v6970_v58 = vadd.f32 %v6318_v52, %v262_v57 }
  0xfb   :  { %994 = vbcast.lane.b32.xlu0 %v988_v54, 264  ;;  %990 = vbcast.lane.b32.xlu1 %v988_v54, 256  ;;  %v329_v35 = vrot.slane %v6968_v56, %v7022_v28 }
  0xfc   :  { %v6506_v59 = vpack.c.bf16 %v6968_v56, %v6970_v58  ;;  %v280_v30 = vrot.slane %v6970_v58, %v7022_v28 }
  0xfd   :  { %v337_v41 = vcombine.high %v329_v35, %v329_v35  ;;  %v345_v44 = vrot.slane %v329_v35, %v7022_v28 }
  0xfe   :  { %6507 = vmatprep.subr.bf16.mxu0 %v6506_v59  ;;  %v288_v32 = vcombine.high %v280_v30, %v280_v30  ;;  %v296_v34 = vrot.slane %v280_v30, %v7022_v28 }
  0xff   :  { %1005 = vbcast.lane.b32.xlu0 %v999_v60, 264  ;;  %1001 = vbcast.lane.b32.xlu1 %v999_v60, 256  ;;  %v7047_v53 = vrot.slane %v337_v41, %v7022_v28  ;;  %v367_v30 = vcombine.high %v345_v44, %v345_v44 }
 0x100   :  { %6509 = vmatpush3.bf16.msra.mxu0 %v6506_v59  ;;  %v310_v36 = vrot.slane %v288_v32, %v7022_v28  ;;  %v318_v40 = vcombine.high %v296_v34, %v296_v34  ;;  %v374_v42 = vrot.slane %v296_v34, %v6943_v39 }
 0x102   :  { %v378_v43 = vrot.slane %v310_v36, %v6943_v39  ;;  %v382_v52 = vrot.slane %v318_v40, %v6943_v39 }
 0x103   :  { %1016 = vbcast.lane.b32.xlu0 %v1010_v62, 264  ;;  %1012 = vbcast.lane.b32.xlu1 %v1010_v62, 256  ;;  %v406_v62 = vrot.slane %v345_v44, %v6943_v39 }
 0x107   :  { %1027 = vbcast.lane.b32.xlu0 %v1021_v0, 264  ;;  %1023 = vbcast.lane.b32.xlu1 %v1021_v0, 256  ;;  %v273_v0 = vcombine.high %v6970_v58, %v6970_v58 }
 0x109   :  { %v287_v32 = vrot.slane %v273_v0, %v7022_v28 }
 0x10b   :  { %862 = vbcast.lane.b32.xlu1 %v856_v2, 264  ;;  %858 = vbcast.lane.b32.xlu0 %v856_v2, 256 }
 0x10f   :  { %869 = vbcast.lane.b32.xlu1 %v867_v3, 256  ;;  %873 = vbcast.lane.b32.xlu0 %v867_v3, 264 }
 0x113   :  { %880 = vbcast.lane.b32.xlu1 %v878_v5, 256  ;;  %884 = vbcast.lane.b32.xlu0 %v878_v5, 264 }
 0x117   :  { %891 = vbcast.lane.b32.xlu1 %v889_v6, 256  ;;  %895 = vbcast.lane.b32.xlu0 %v889_v6, 264 }
 0x11b   :  { %902 = vbcast.lane.b32.xlu1 %v900_v7, 256  ;;  %906 = vbcast.lane.b32.xlu0 %v900_v7, 264 }
 0x11f   :  { %913 = vbcast.lane.b32.xlu1 %v911_v8, 256  ;;  %917 = vbcast.lane.b32.xlu0 %v911_v8, 264  ;;  %v410_v8 = vrot.slane %v7047_v53, %v6943_v39 }
 0x123   :  { %924 = vbcast.lane.b32.xlu1 %v922_v9, 256  ;;  %928 = vbcast.lane.b32.xlu0 %v922_v9, 264  ;;  %v320_v9 = vcombine.high %v310_v36, %v310_v36 }
 0x125   :  { %v386_v44 = vrot.slane %v320_v9, %v6943_v39 }
 0x127   :  { %935 = vbcast.lane.b32.xlu1 %v933_v10, 256  ;;  %939 = vbcast.lane.b32.xlu0 %v933_v10, 264 }
 0x12b   :  { %453 = vrot.lane.b32.xlu0 %v6968_v56, %s6772_s21 }
 0x12f   :  { %451 = vrot.lane.b32.xlu0 %v6970_v58, %s6772_s21 }
 0x15d   :  { %v6997_v11 = vpop.permute.xlu0 %950 }
 0x15e   :  { %9686 = vst [vmem:[#allocation9_spill] sm:$0xff] %v6997_v11 }
 0x161   :  { %v6999_v12 = vpop.permute.xlu0 %961 }
 0x162   :  { %9687 = vst [vmem:[#allocation10_spill] sm:$0xff] %v6999_v12 }
 0x165   :  { %v7001_v13 = vpop.permute.xlu0 %972 }
 0x166   :  { %9688 = vst [vmem:[#allocation11_spill] sm:$0xff] %v7001_v13 }
 0x169   :  { %v7003_v14 = vpop.permute.xlu0 %983 }
 0x16a   :  { %9689 = vst [vmem:[#allocation12_spill] sm:$0xff] %v7003_v14 }
 0x16d   :  { %v7005_v16 = vpop.permute.xlu0 %994 }
 0x16e   :  { %9690 = vst [vmem:[#allocation13_spill] sm:$0xff] %v7005_v16 }
 0x171   :  { %v7007_v17 = vpop.permute.xlu0 %1005 }
 0x172   :  { %9691 = vst [vmem:[#allocation14_spill] sm:$0xff] %v7007_v17 }
 0x175   :  { %v7009_v18 = vpop.permute.xlu0 %1016 }
 0x176   :  { %9692 = vst [vmem:[#allocation15_spill] sm:$0xff] %v7009_v18 }
 0x179   :  { %v7011_v19 = vpop.permute.xlu0 %1027 }
 0x17a   :  { %9693 = vst [vmem:[#allocation16_spill] sm:$0xff] %v7011_v19 }
 0x17d   :  { %v7013_v20 = vpop.permute.xlu0 %858 }
 0x17e   :  { %9694 = vst [vmem:[#allocation17_spill] sm:$0xff] %v7013_v20 }
 0x181   :  { %v7015_v21 = vpop.permute.xlu0 %873 }
 0x182   :  { %9695 = vst [vmem:[#allocation18_spill] sm:$0xff] %v7015_v21 }
 0x185   :  { %v7017_v24 = vpop.permute.xlu0 %884 }
 0x186   :  { %9696 = vst [vmem:[#allocation19_spill] sm:$0xff] %v7017_v24 }
 0x189   :  { %v7019_v27 = vpop.permute.xlu0 %895 }
 0x18a   :  { %9697 = vst [vmem:[#allocation20_spill] sm:$0xff] %v7019_v27 }
 0x18d   :  { %v7024_v29 = vpop.permute.xlu0 %906 }
 0x18e   :  { %9699 = vst [vmem:[#allocation22_spill] sm:$0xff] %v7024_v29 }
 0x191   :  { %v7028_v31 = vpop.permute.xlu0 %917 }
 0x192   :  { %9700 = vst [vmem:[#allocation23_spill] sm:$0xff] %v7028_v31 }
 0x195   :  { %v7030_v33 = vpop.permute.xlu0 %928 }
 0x196   :  { %9701 = vst [vmem:[#allocation24_spill] sm:$0xff] %v7030_v33 }
 0x199   :  { %v7036_v37 = vpop.permute.xlu0 %939 }
 0x19a   :  { %9702 = vst [vmem:[#allocation25_spill] sm:$0xff] %v7036_v37 }
 0x19d   :  { %v7041_v46 = vpop.permute.xlu0 %453 }
 0x19e   :  { %v458_v48 = vadd.f32 %v7041_v46, %v374_v42  ;;  %v460_v50 = vadd.f32 %v7041_v46, %v378_v43  ;;  %v462_v59 = vadd.f32 %v7041_v46, %v382_v52  ;;  %v474_v7 = vadd.f32 %v7041_v46, %v406_v62 }
 0x19f   :  { %v476_v35 = vadd.f32 %v7041_v46, %v410_v8 }
 0x1a0   :  { %vm490_vm12 = vcmp.gt.f32.partialorder %v458_v48, 0.0  ;;  %v522_v54 = vmul.f32 0.2, %v458_v48  ;;  %v524_v57 = vmul.f32 0.2, %v460_v50  ;;  %vm492_vm13 = vcmp.gt.f32.partialorder %v460_v50, 0.0 }
 0x1a1   :  { %v7050_v60 = vpop.permute.xlu0 %451  ;;  %v526_v23 = vmul.f32 0.2, %v462_v59  ;;  %vm494_vm15 = vcmp.gt.f32.partialorder %v462_v59, 0.0  ;;  %vm506_vm2 = vcmp.gt.f32.partialorder %v474_v7, 0.0  ;;  %v538_v41 = vmul.f32 0.2, %v474_v7 }
 0x1a2   :  { %v554_v2 = vsel %vm490_vm12, %v458_v48, %v522_v54  ;;  %v457_v3 = vadd.f32 %v7050_v60, %v374_v42  ;;  %v459_v5 = vadd.f32 %v7050_v60, %v378_v43  ;;  %v556_v10 = vsel %vm492_vm13, %v460_v50, %v524_v57 }
 0x1a3   :  { %v595_v6 = vmul.f32 %v7055_v1, %v554_v2  ;;  %v461_v26 = vadd.f32 %v7050_v60, %v382_v52  ;;  %v597_v36 = vmul.f32 %v7055_v1, %v556_v10  ;;  %v558_v42 = vsel %vm494_vm15, %v462_v59, %v526_v23 }
 0x1a4   :  { %vm489_vm14 = vcmp.gt.f32.partialorder %v457_v3, 0.0  ;;  %v521_v22 = vmul.f32 0.2, %v457_v3  ;;  %vm491_vm1 = vcmp.gt.f32.partialorder %v459_v5, 0.0  ;;  %v523_v58 = vmul.f32 0.2, %v459_v5 }
 0x1a5   :  { %660 = vrot.lane.b32.xlu0 %v595_v6, %s6775_s3  ;;  %v525_v48 = vmul.f32 0.2, %v461_v26  ;;  %v473_v50 = vadd.f32 %v7050_v60, %v406_v62  ;;  %vm493_vm3 = vcmp.gt.f32.partialorder %v461_v26, 0.0  ;;  %v7074_v52 = vrot.slane %v287_v32, %v7022_v28 }
 0x1a6   :  { %v553_v34 = vsel %vm489_vm14, %v457_v3, %v521_v22  ;;  %v555_v43 = vsel %vm491_vm1, %v459_v5, %v523_v58  ;;  %v414_v54 = vrot.slane %v367_v30, %v6943_v39  ;;  %v599_v57 = vmul.f32 %v7055_v1, %v558_v42 }
 0x1a7   :  { %v594_v40 = vmul.f32 %v7055_v1, %v553_v34  ;;  %v596_v59 = vmul.f32 %v7055_v1, %v555_v43  ;;  %v570_v0 = vsel %vm506_vm2, %v474_v7, %v538_v41  ;;  %v464_v2 = vadd.f32 %v7041_v46, %v386_v44 }
 0x1a8   :  { %v557_v62 = vsel %vm493_vm3, %v461_v26, %v525_v48  ;;  %v540_v3 = vmul.f32 0.2, %v476_v35  ;;  %v537_v5 = vmul.f32 0.2, %v473_v50  ;;  %v475_v6 = vadd.f32 %v7050_v60, %v410_v8 }
 0x1a9   :  { %664 = vrot.lane.b32.xlu0 %v597_v36, %s6775_s3  ;;  %658 = vrot.lane.b32.xlu1 %v594_v40, %s6775_s3  ;;  %vm508_vm4 = vcmp.gt.f32.partialorder %v476_v35, 0.0  ;;  %vm505_vm5 = vcmp.gt.f32.partialorder %v473_v50, 0.0  ;;  %v478_v9 = vadd.f32 %v7041_v46, %v414_v54  ;;  %v390_v10 = vrot.slane %v7074_v52, %v6943_v39 }
 0x1aa   :  { %v611_v7 = vmul.f32 %v7055_v1, %v570_v0  ;;  %v598_v22 = vmul.f32 %v7055_v1, %v557_v62  ;;  %vm496_vm6 = vcmp.gt.f32.partialorder %v464_v2, 0.0  ;;  %v528_v23 = vmul.f32 0.2, %v464_v2 }
 0x1ab   :  { %v572_v58 = vsel %vm508_vm4, %v476_v35, %v540_v3  ;;  %v569_v26 = vsel %vm505_vm5, %v473_v50, %v537_v5  ;;  %v539_v8 = vmul.f32 0.2, %v475_v6  ;;  %v463_v30 = vadd.f32 %v7050_v60, %v386_v44 }
 0x1ac   :  { %v322_v34 = vcombine.high %v6968_v56, %v6968_v56  ;;  %v289_v36 = vcombine.high %v287_v32, %v287_v32  ;;  %vm507_vm7 = vcmp.gt.f32.partialorder %v475_v6, 0.0  ;;  %v369_v40 = vcombine.high %v7047_v53, %v7047_v53 }
 0x1ad   :  { %668 = vrot.lane.b32.xlu0 %v599_v57, %s6775_s3  ;;  %662 = vrot.lane.b32.xlu1 %v596_v59, %s6775_s3  ;;  %v466_v41 = vadd.f32 %v7041_v46, %v390_v10  ;;  %v613_v35 = vmul.f32 %v7055_v1, %v572_v58  ;;  %v610_v42 = vmul.f32 %v7055_v1, %v569_v26  ;;  %v542_v48 = vmul.f32 0.2, %v478_v9 }
 0x1ae   :  { %v560_v43 = vsel %vm496_vm6, %v464_v2, %v528_v23  ;;  %v571_v50 = vsel %vm507_vm7, %v475_v6, %v539_v8  ;;  %vm510_vm8 = vcmp.gt.f32.partialorder %v478_v9, 0.0  ;;  %v527_v56 = vmul.f32 0.2, %v463_v30 }
 0x1af   :  { %v477_v32 = vadd.f32 %v7050_v60, %v414_v54  ;;  %v336_v44 = vrot.slane %v322_v34, %v7022_v28  ;;  %vm495_vm9 = vcmp.gt.f32.partialorder %v463_v30, 0.0  ;;  %v418_v53 = vrot.slane %v369_v40, %v6943_v39  ;;  %v7121_v40 = vpop.permute.xlu1 %946 }
 0x1b0   :  { %v7104_v57 = vrot.slane %v289_v36, %v7022_v28  ;;  %v601_v59 = vmul.f32 %v7055_v1, %v560_v43  ;;  %v612_v0 = vmul.f32 %v7055_v1, %v571_v50  ;;  %v574_v2 = vsel %vm510_vm8, %v478_v9, %v542_v48  ;;  %9703 = vst [vmem:[#allocation26_spill] sm:$0xff] %v7121_v40 }
 0x1b1   :  { %692 = vrot.lane.b32.xlu0 %v611_v7, %s6775_s3  ;;  %666 = vrot.lane.b32.xlu1 %v598_v22, %s6775_s3  ;;  %v530_v62 = vmul.f32 0.2, %v466_v41  ;;  %v480_v54 = vadd.f32 %v7041_v46, %v418_v53  ;;  %v559_v3 = vsel %vm495_vm9, %v463_v30, %v527_v56  ;;  %vm498_vm10 = vcmp.gt.f32.partialorder %v466_v41, 0.0 }
 0x1b2   :  { %v541_v5 = vmul.f32 0.2, %v477_v32  ;;  %v465_v6 = vadd.f32 %v7050_v60, %v390_v10  ;;  %v7111_v7 = vrot.slane %v336_v44, %v7022_v28  ;;  %vm509_vm11 = vcmp.gt.f32.partialorder %v477_v32, 0.0 }
 0x1b3   :  { %v394_v22 = vrot.slane %v7104_v57, %v6943_v39  ;;  %v615_v9 = vmul.f32 %v7055_v1, %v574_v2  ;;  %v600_v23 = vmul.f32 %v7055_v1, %v559_v3  ;;  %v562_v58 = vsel %vm498_vm10, %v466_v41, %v530_v62  ;;  %v7138_v2 = vpop.permute.xlu1 %957 }
 0x1b4   :  { %v544_v26 = vmul.f32 0.2, %v480_v54  ;;  %v573_v10 = vsel %vm509_vm11, %v477_v32, %v541_v5  ;;  %vm512_vm12 = vcmp.gt.f32.partialorder %v480_v54, 0.0  ;;  %v529_v30 = vmul.f32 0.2, %v465_v6  ;;  %9704 = vst [vmem:[#allocation27_spill] sm:$0xff] %v7138_v2 }
 0x1b5   :  { %696 = vrot.lane.b32.xlu0 %v613_v35, %s6775_s3  ;;  %690 = vrot.lane.b32.xlu1 %v610_v42, %s6775_s3  ;;  %v468_v8 = vadd.f32 %v7041_v46, %v394_v22  ;;  %v479_v34 = vadd.f32 %v7050_v60, %v418_v53  ;;  %v338_v36 = vcombine.high %v336_v44, %v336_v44  ;;  %vm497_vm13 = vcmp.gt.f32.partialorder %v465_v6, 0.0 }
 0x1b6   :  { %v422_v35 = vrot.slane %v7111_v7, %v6943_v39  ;;  %v603_v41 = vmul.f32 %v7055_v1, %v562_v58  ;;  %v319_v42 = vcombine.high %v7074_v52, %v7074_v52  ;;  %v614_v43 = vmul.f32 %v7055_v1, %v573_v10 }
 0x1b7   :  { %v576_v48 = vsel %vm512_vm12, %v480_v54, %v544_v26  ;;  %v532_v50 = vmul.f32 0.2, %v468_v8  ;;  %v561_v32 = vsel %vm497_vm13, %v465_v6, %v529_v30  ;;  %vm500_vm14 = vcmp.gt.f32.partialorder %v468_v8, 0.0 }
 0x1b8   :  { %v482_v56 = vadd.f32 %v7041_v46, %v422_v35  ;;  %v543_v44 = vmul.f32 0.2, %v479_v34  ;;  %v467_v53 = vadd.f32 %v7050_v60, %v394_v22  ;;  %vm511_vm15 = vcmp.gt.f32.partialorder %v479_v34, 0.0 }
 0x1b9   :  { %672 = vrot.lane.b32.xlu0 %v601_v59, %s6775_s3  ;;  %694 = vrot.lane.b32.xlu1 %v612_v0, %s6775_s3  ;;  %v366_v59 = vrot.slane %v338_v36, %v7022_v28  ;;  %v617_v52 = vmul.f32 %v7055_v1, %v576_v48  ;;  %v398_v0 = vrot.slane %v319_v42, %v6943_v39 }
 0x1ba   :  { %v602_v62 = vmul.f32 %v7055_v1, %v561_v32  ;;  %v564_v54 = vsel %vm500_vm14, %v468_v8, %v532_v50  ;;  %vm514_vm1 = vcmp.gt.f32.partialorder %v482_v56, 0.0  ;;  %v546_v3 = vmul.f32 0.2, %v482_v56 }
 0x1bb   :  { %v575_v5 = vsel %vm511_vm15, %v479_v34, %v543_v44  ;;  %v531_v6 = vmul.f32 0.2, %v467_v53  ;;  %v470_v22 = vadd.f32 %v7041_v46, %v398_v0  ;;  %vm499_vm2 = vcmp.gt.f32.partialorder %v467_v53, 0.0 }
 0x1bc   :  { %v321_v58 = vcombine.high %v7104_v57, %v7104_v57  ;;  %v368_v26 = vcombine.high %v7111_v7, %v7111_v7  ;;  %v605_v8 = vmul.f32 %v7055_v1, %v564_v54  ;;  %v616_v10 = vmul.f32 %v7055_v1, %v575_v5 }
 0x1bd   :  { %700 = vrot.lane.b32.xlu0 %v615_v9, %s6775_s3  ;;  %670 = vrot.lane.b32.xlu1 %v600_v23, %s6775_s3  ;;  %v481_v9 = vadd.f32 %v7050_v60, %v422_v35  ;;  %v426_v23 = vrot.slane %v366_v59, %v6943_v39  ;;  %v578_v30 = vsel %vm514_vm1, %v482_v56, %v546_v3  ;;  %v534_v35 = vmul.f32 0.2, %v470_v22 }
 0x1be   :  { %v563_v36 = vsel %vm499_vm2, %v467_v53, %v531_v6  ;;  %v469_v42 = vadd.f32 %v7050_v60, %v398_v0  ;;  %vm502_vm3 = vcmp.gt.f32.partialorder %v470_v22, 0.0  ;;  %v402_v57 = vrot.slane %v321_v58, %v6943_v39 }
 0x1bf   :  { %v484_v34 = vadd.f32 %v7041_v46, %v426_v23  ;;  %vm513_vm4 = vcmp.gt.f32.partialorder %v481_v9, 0.0  ;;  %v619_v7 = vmul.f32 %v7055_v1, %v578_v30  ;;  %v430_v48 = vrot.slane %v368_v26, %v6943_v39 }
 0x1c0   :  { %v604_v50 = vmul.f32 %v7055_v1, %v563_v36  ;;  %v472_v32 = vadd.f32 %v7041_v46, %v402_v57  ;;  %v566_v44 = vsel %vm502_vm3, %v470_v22, %v534_v35  ;;  %v483_v0 = vadd.f32 %v7050_v60, %v426_v23 }
 0x1c1   :  { %676 = vrot.lane.b32.xlu0 %v603_v41, %s6775_s3  ;;  %698 = vrot.lane.b32.xlu1 %v614_v43, %s6775_s3  ;;  %v545_v41 = vmul.f32 0.2, %v481_v9  ;;  %v7154_v43 = vpop.permute.xlu1 %968  ;;  %vm516_vm5 = vcmp.gt.f32.partialorder %v484_v34, 0.0  ;;  %v548_v56 = vmul.f32 0.2, %v484_v34  ;;  %vm501_vm6 = vcmp.gt.f32.partialorder %v469_v42, 0.0 }
 0x1c2   :  { %9705 = vst [vmem:[#allocation28_spill] sm:$0xff] %v7154_v43  ;;  %v370_v54 = vcombine.high %v366_v59, %v366_v59  ;;  %v607_v5 = vmul.f32 %v7055_v1, %v566_v44  ;;  %v536_v22 = vmul.f32 0.2, %v472_v32  ;;  %vm504_vm7 = vcmp.gt.f32.partialorder %v472_v32, 0.0 }
 0x1c3   :  { %v577_v53 = vsel %vm513_vm4, %v481_v9, %v545_v41  ;;  %v580_v58 = vsel %vm516_vm5, %v484_v34, %v548_v56  ;;  %v547_v26 = vmul.f32 0.2, %v483_v0  ;;  %v471_v23 = vadd.f32 %v7050_v60, %v402_v57 }
 0x1c4   :  { %v618_v6 = vmul.f32 %v7055_v1, %v577_v53  ;;  %vm515_vm8 = vcmp.gt.f32.partialorder %v483_v0, 0.0  ;;  %v621_v59 = vmul.f32 %v7055_v1, %v580_v58  ;;  %v568_v30 = vsel %vm504_vm7, %v472_v32, %v536_v22 }
 0x1c5   :  { %704 = vrot.lane.b32.xlu0 %v617_v52, %s6775_s3  ;;  %674 = vrot.lane.b32.xlu1 %v602_v62, %s6775_s3  ;;  %v533_v52 = vmul.f32 0.2, %v469_v42  ;;  %v486_v62 = vadd.f32 %v7041_v46, %v430_v48  ;;  %v7167_v3 = vpop.permute.xlu1 %979  ;;  %v579_v36 = vsel %vm515_vm8, %v483_v0, %v547_v26  ;;  %v535_v35 = vmul.f32 0.2, %v471_v23 }
 0x1c6   :  { %9706 = vst [vmem:[#allocation29_spill] sm:$0xff] %v7167_v3  ;;  %vm503_vm10 = vcmp.gt.f32.partialorder %v471_v23, 0.0  ;;  %vm754_vm14 = vcmask 261120   ;;  %vm1230_vm15 = vcmask 130112   ;;  %vm1367_vm1 = vcmask 1041409  }
 0x1c7   :  { %v565_v9 = vsel %vm501_vm6, %v469_v42, %v533_v52  ;;  %vm518_vm9 = vcmp.gt.f32.partialorder %v486_v62, 0.0  ;;  %v550_v34 = vmul.f32 0.2, %v486_v62  ;;  %v485_v42 = vadd.f32 %v7050_v60, %v430_v48 }
 0x1c8   :  { %v567_v32 = vsel %vm503_vm10, %v471_v23, %v535_v35  ;;  %vm1369_vm2 = vcmask 1042434   ;;  %vm1371_vm3 = vcmask 1043459   ;;  %vm1373_vm4 = vcmask 1044484  }
 0x1c9   :  { %680 = vrot.lane.b32.xlu0 %v605_v8, %s6775_s3  ;;  %702 = vrot.lane.b32.xlu1 %v616_v10, %s6775_s3  ;;  %v434_v8 = vrot.slane %v370_v54, %v6943_v39  ;;  %v606_v10 = vmul.f32 %v7055_v1, %v565_v9  ;;  %v7179_v57 = vpop.permute.xlu1 %990  ;;  %v582_v56 = vsel %vm518_vm9, %v486_v62, %v550_v34  ;;  %v549_v53 = vmul.f32 0.2, %v485_v42 }
 0x1ca   :  { %9707 = vst [vmem:[#allocation30_spill] sm:$0xff] %v7179_v57  ;;  %vm517_vm12 = vcmp.gt.f32.partialorder %v485_v42, 0.0  ;;  %v623_v48 = vmul.f32 %v7055_v1, %v582_v56  ;;  %v608_v0 = vmul.f32 %v7055_v1, %v567_v32  ;;  %vm1377_vm5 = vcmask 1046534  }
 0x1cb   :  { %v488_v41 = vadd.f32 %v7041_v46, %v434_v8  ;;  %v487_v52 = vadd.f32 %v7050_v60, %v434_v8  ;;  %vm1375_vm6 = vcmask 1045509   ;;  %vm1379_vm7 = vcmask 1047559  }
 0x1cc   :  { %vm1390_vm8 = vcmask 130048  }
 0x1cd   :  { %708 = vrot.lane.b32.xlu0 %v619_v7, %s6775_s3  ;;  %678 = vrot.lane.b32.xlu1 %v604_v50, %s6775_s3  ;;  %v609_v7 = vmul.f32 %v7055_v1, %v568_v30  ;;  %v620_v50 = vmul.f32 %v7055_v1, %v579_v36  ;;  %v552_v44 = vmul.f32 0.2, %v488_v41  ;;  %vm520_vm11 = vcmp.gt.f32.partialorder %v488_v41, 0.0  ;;  %v7188_v46 = vpop.permute.xlu1 %1001 }
 0x1ce   :  { %9708 = vst [vmem:[#allocation31_spill] sm:$0xff] %v7188_v46  ;;  %v551_v62 = vmul.f32 0.2, %v487_v52  ;;  %vm519_vm13 = vcmp.gt.f32.partialorder %v487_v52, 0.0 }
 0x1cf   :  { %v584_v54 = vsel %vm520_vm11, %v488_v41, %v552_v44 }
 0x1d0   :  { %v625_v60 = vmul.f32 %v7055_v1, %v584_v54  ;;  %v583_v58 = vsel %vm519_vm13, %v487_v52, %v551_v62 }
 0x1d1   :  { %684 = vrot.lane.b32.xlu0 %v607_v5, %s6775_s3  ;;  %706 = vrot.lane.b32.xlu1 %v618_v6, %s6775_s3  ;;  %v581_v5 = vsel %vm517_vm12, %v485_v42, %v549_v53  ;;  %v7196_v22 = vpop.permute.xlu1 %1012  ;;  %v624_v9 = vmul.f32 %v7055_v1, %v583_v58  ;;  %v6776_v58 = vmov 0  }
 0x1d2   :  { %v622_v6 = vmul.f32 %v7055_v1, %v581_v5  ;;  %9709 = vst [vmem:[#allocation32_spill] sm:$0xff] %v7196_v22  ;;  %6541 = vset.pattern.permute.xlu0 %v6776_v58  ;;  %6542 = vset.pattern.permute.xlu1 %v6776_v58 }
 0x1d5   :  { %712 = vrot.lane.b32.xlu0 %v621_v59, %s6775_s3  ;;  %682 = vrot.lane.b32.xlu1 %v606_v10, %s6775_s3  ;;  %v7202_v26 = vpop.permute.xlu1 %1023 }
 0x1d6   :  { %9710 = vst [vmem:[#allocation33_spill] sm:$0xff] %v7202_v26 }
 0x1d9   :  { %688 = vrot.lane.b32.xlu0 %v609_v7, %s6775_s3  ;;  %710 = vrot.lane.b32.xlu1 %v620_v50, %s6775_s3  ;;  %v7204_v23 = vpop.permute.xlu1 %862 }
 0x1da   :  { %9711 = vst [vmem:[#allocation34_spill] sm:$0xff] %v7204_v23 }
 0x1dd   :  { %716 = vrot.lane.b32.xlu0 %v623_v48, %s6775_s3  ;;  %686 = vrot.lane.b32.xlu1 %v608_v0, %s6775_s3  ;;  %v7206_v59 = vpop.permute.xlu1 %869 }
 0x1de   :  { %9712 = vst [vmem:[#allocation35_spill] sm:$0xff] %v7206_v59 }
 0x1e1   :  { %720 = vrot.lane.b32.xlu0 %v625_v60, %s6775_s3  ;;  %714 = vrot.lane.b32.xlu1 %v622_v6, %s6775_s3  ;;  %v7208_v8 = vpop.permute.xlu1 %880 }
 0x1e2   :  { %9713 = vst [vmem:[#allocation36_spill] sm:$0xff] %v7208_v8 }
 0x1e5   :  { %718 = vrot.lane.b32.xlu1 %v624_v9, %s6775_s3  ;;  %v7210_v10 = vpop.permute.xlu1 %891 }
 0x1e6   :  { %9714 = vst [vmem:[#allocation37_spill] sm:$0xff] %v7210_v10 }
 0x1e9   :  { %v7212_v30 = vpop.permute.xlu1 %902 }
 0x1ea   :  { %9715 = vst [vmem:[#allocation38_spill] sm:$0xff] %v7212_v30 }
 0x1ed   :  { %v7214_v34 = vpop.permute.xlu1 %913 }
 0x1ee   :  { %9716 = vst [vmem:[#allocation39_spill] sm:$0xff] %v7214_v34 }
 0x1f1   :  { %v7216_v36 = vpop.permute.xlu1 %924 }
 0x1f2   :  { %9717 = vst [vmem:[#allocation40_spill] sm:$0xff] %v7216_v36 }
 0x1f5   :  { %v7218_v1 = vpop.permute.xlu1 %935 }
 0x1f6   :  { %9718 = vst [vmem:[#allocation41_spill] sm:$0xff] %v7218_v1 }
 0x217   :  { %v661_v35 = vpop.permute.xlu0 %660 }
 0x218   :  { %v758_v41 = vsel %vm754_vm14, %v661_v35, 0.0 }
 0x219   :  { %759 = vadd.xlane.f32.xlu0 %v758_v41 }
 0x21b   :  { %v7221_v42 = vpop.permute.xlu1 %658  ;;  %v665_v7 = vpop.permute.xlu0 %664 }
 0x21c   :  { %v764_v50 = vsel %vm754_vm14, %v665_v7, 0.0 }
 0x21d   :  { %765 = vadd.xlane.f32.xlu1 %v764_v50 }
 0x21f   :  { %v663_v56 = vpop.permute.xlu1 %662  ;;  %v669_v32 = vpop.permute.xlu0 %668 }
 0x220   :  { %v761_v44 = vsel %vm754_vm14, %v663_v56, 0.0  ;;  %v770_v53 = vsel %vm754_vm14, %v669_v32, 0.0 }
 0x221   :  { %762 = vadd.xlane.f32.xlu0 %v761_v44  ;;  %771 = vadd.xlane.f32.xlu1 %v770_v53 }
 0x223   :  { %v667_v52 = vpop.permute.xlu1 %666  ;;  %v693_v48 = vpop.permute.xlu0 %692 }
 0x224   :  { %v767_v0 = vsel %vm754_vm14, %v667_v52, 0.0  ;;  %v806_v54 = vsel %vm754_vm14, %v693_v48, 0.0 }
 0x225   :  { %768 = vadd.xlane.f32.xlu0 %v767_v0  ;;  %807 = vadd.xlane.f32.xlu1 %v806_v54 }
 0x227   :  { %v691_v5 = vpop.permute.xlu1 %690  ;;  %v697_v62 = vpop.permute.xlu0 %696 }
 0x228   :  { %v803_v60 = vsel %vm754_vm14, %v691_v5, 0.0  ;;  %v812_v6 = vsel %vm754_vm14, %v697_v62, 0.0 }
 0x229   :  { %804 = vadd.xlane.f32.xlu0 %v803_v60  ;;  %813 = vadd.xlane.f32.xlu1 %v812_v6 }
 0x22b   :  { %v695_v9 = vpop.permute.xlu1 %694  ;;  %v673_v35 = vpop.permute.xlu0 %672 }
 0x22c   :  { %v809_v41 = vsel %vm754_vm14, %v695_v9, 0.0  ;;  %v776_v7 = vsel %vm754_vm14, %v673_v35, 0.0 }
 0x22d   :  { %810 = vadd.xlane.f32.xlu0 %v809_v41  ;;  %777 = vadd.xlane.f32.xlu1 %v776_v7 }
 0x22f   :  { %v671_v50 = vpop.permute.xlu1 %670  ;;  %v701_v56 = vpop.permute.xlu0 %700 }
 0x230   :  { %v773_v32 = vsel %vm754_vm14, %v671_v50, 0.0  ;;  %v818_v44 = vsel %vm754_vm14, %v701_v56, 0.0 }
 0x231   :  { %774 = vadd.xlane.f32.xlu0 %v773_v32  ;;  %819 = vadd.xlane.f32.xlu1 %v818_v44 }
 0x233   :  { %v699_v53 = vpop.permute.xlu1 %698  ;;  %v677_v52 = vpop.permute.xlu0 %676 }
 0x234   :  { %v815_v48 = vsel %vm754_vm14, %v699_v53, 0.0  ;;  %v782_v0 = vsel %vm754_vm14, %v677_v52, 0.0 }
 0x235   :  { %816 = vadd.xlane.f32.xlu0 %v815_v48  ;;  %783 = vadd.xlane.f32.xlu1 %v782_v0 }
 0x237   :  { %v675_v54 = vpop.permute.xlu1 %674  ;;  %v705_v5 = vpop.permute.xlu0 %704 }
 0x238   :  { %v779_v62 = vsel %vm754_vm14, %v675_v54, 0.0  ;;  %v824_v60 = vsel %vm754_vm14, %v705_v5, 0.0 }
 0x239   :  { %780 = vadd.xlane.f32.xlu0 %v779_v62  ;;  %825 = vadd.xlane.f32.xlu1 %v824_v60 }
 0x23b   :  { %v703_v6 = vpop.permute.xlu1 %702  ;;  %v681_v58 = vpop.permute.xlu0 %680 }
 0x23c   :  { %v821_v9 = vsel %vm754_vm14, %v703_v6, 0.0  ;;  %v788_v35 = vsel %vm754_vm14, %v681_v58, 0.0 }
 0x23d   :  { %822 = vadd.xlane.f32.xlu0 %v821_v9  ;;  %789 = vadd.xlane.f32.xlu1 %v788_v35 }
 0x23f   :  { %v679_v41 = vpop.permute.xlu1 %678  ;;  %v709_v7 = vpop.permute.xlu0 %708 }
 0x240   :  { %v785_v50 = vsel %vm754_vm14, %v679_v41, 0.0  ;;  %v830_v56 = vsel %vm754_vm14, %v709_v7, 0.0 }
 0x241   :  { %786 = vadd.xlane.f32.xlu0 %v785_v50  ;;  %831 = vadd.xlane.f32.xlu1 %v830_v56 }
 0x243   :  { %v707_v32 = vpop.permute.xlu1 %706  ;;  %v685_v44 = vpop.permute.xlu0 %684 }
 0x244   :  { %v827_v53 = vsel %vm754_vm14, %v707_v32, 0.0  ;;  %v794_v52 = vsel %vm754_vm14, %v685_v44, 0.0 }
 0x245   :  { %828 = vadd.xlane.f32.xlu0 %v827_v53  ;;  %795 = vadd.xlane.f32.xlu1 %v794_v52 }
 0x247   :  { %v683_v48 = vpop.permute.xlu1 %682  ;;  %v713_v0 = vpop.permute.xlu0 %712 }
 0x248   :  { %v791_v54 = vsel %vm754_vm14, %v683_v48, 0.0  ;;  %v836_v5 = vsel %vm754_vm14, %v713_v0, 0.0  ;;  %v755_v48 = vsel %vm754_vm14, %v7221_v42, 0.0 }
 0x249   :  { %792 = vadd.xlane.f32.xlu0 %v791_v54  ;;  %837 = vadd.xlane.f32.xlu1 %v836_v5 }
 0x24b   :  { %v711_v62 = vpop.permute.xlu1 %710  ;;  %v689_v60 = vpop.permute.xlu0 %688 }
 0x24c   :  { %v833_v6 = vsel %vm754_vm14, %v711_v62, 0.0  ;;  %v800_v58 = vsel %vm754_vm14, %v689_v60, 0.0 }
 0x24d   :  { %834 = vadd.xlane.f32.xlu0 %v833_v6  ;;  %801 = vadd.xlane.f32.xlu1 %v800_v58 }
 0x24f   :  { %v687_v9 = vpop.permute.xlu1 %686  ;;  %v717_v35 = vpop.permute.xlu0 %716 }
 0x250   :  { %v797_v41 = vsel %vm754_vm14, %v687_v9, 0.0  ;;  %v842_v7 = vsel %vm754_vm14, %v717_v35, 0.0 }
 0x251   :  { %798 = vadd.xlane.f32.xlu0 %v797_v41  ;;  %843 = vadd.xlane.f32.xlu1 %v842_v7 }
 0x253   :  { %v715_v50 = vpop.permute.xlu1 %714  ;;  %v721_v56 = vpop.permute.xlu0 %720 }
 0x254   :  { %v839_v32 = vsel %vm754_vm14, %v715_v50, 0.0  ;;  %v848_v44 = vsel %vm754_vm14, %v721_v56, 0.0 }
 0x255   :  { %840 = vadd.xlane.f32.xlu0 %v839_v32  ;;  %849 = vadd.xlane.f32.xlu1 %v848_v44 }
 0x257   :  { %v719_v53 = vpop.permute.xlu1 %718 }
 0x258   :  { %v845_v52 = vsel %vm754_vm14, %v719_v53, 0.0 }
 0x259   :  { %846 = vadd.xlane.f32.xlu0 %v845_v52  ;;  %756 = vadd.xlane.f32.xlu1 %v755_v48 }
 0x2a6   :  { %v760_v0 = vpop.xlane.xlu0 %759 }
 0x2a7   :  { %v7256_v54 = vadd.f32 %v7204_v23, %v760_v0 }
 0x2a9   :  { %1129 = vperm.xlu0 %6541, %v7256_v54  }
 0x2aa   :  { %v766_v5 = vpop.xlane.xlu1 %765 }
 0x2ab   :  { %v7260_v62 = vadd.f32 %v7015_v21, %v766_v5 }
 0x2ad   :  { %1135 = vperm.xlu1 %6542, %v7260_v62  }
 0x2ae   :  { %v772_v60 = vpop.xlane.xlu1 %771  ;;  %v7263_v6 = vpop.xlane.xlu0 %762 }
 0x2af   :  { %v7266_v58 = vadd.f32 %v7017_v24, %v772_v60 }
 0x2b1   :  { %1141 = vperm.xlu1 %6542, %v7266_v58  }
 0x2b2   :  { %v808_v42 = vpop.xlane.xlu1 %807  ;;  %v769_v9 = vpop.xlane.xlu0 %768 }
 0x2b3   :  { %v7270_v35 = vadd.f32 %v6997_v11, %v808_v42  ;;  %v7273_v41 = vadd.f32 %v7208_v8, %v769_v9 }
 0x2b5   :  { %1177 = vperm.xlu1 %6542, %v7270_v35   ;;  %1138 = vperm.xlu0 %6541, %v7273_v41  }
 0x2b6   :  { %v814_v7 = vpop.xlane.xlu1 %813  ;;  %v805_v50 = vpop.xlane.xlu0 %804 }
 0x2b7   :  { %v7278_v56 = vadd.f32 %v6999_v12, %v814_v7  ;;  %v7281_v32 = vadd.f32 %v7121_v40, %v805_v50 }
 0x2b9   :  { %1183 = vperm.xlu1 %6542, %v7278_v56   ;;  %1174 = vperm.xlu0 %6541, %v7281_v32  }
 0x2ba   :  { %v778_v44 = vpop.xlane.xlu1 %777  ;;  %v811_v53 = vpop.xlane.xlu0 %810 }
 0x2bb   :  { %v7286_v52 = vadd.f32 %v7019_v27, %v778_v44  ;;  %v7289_v48 = vadd.f32 %v7138_v2, %v811_v53 }
 0x2bd   :  { %1147 = vperm.xlu1 %6542, %v7286_v52   ;;  %1180 = vperm.xlu0 %6541, %v7289_v48  }
 0x2be   :  { %v820_v0 = vpop.xlane.xlu1 %819  ;;  %v775_v5 = vpop.xlane.xlu0 %774 }
 0x2bf   :  { %v7294_v60 = vadd.f32 %v7001_v13, %v820_v0  ;;  %v7297_v42 = vadd.f32 %v7210_v10, %v775_v5 }
 0x2c1   :  { %1189 = vperm.xlu1 %6542, %v7294_v60   ;;  %1144 = vperm.xlu0 %6541, %v7297_v42  }
 0x2c2   :  { %v784_v9 = vpop.xlane.xlu1 %783  ;;  %v817_v7 = vpop.xlane.xlu0 %816 }
 0x2c3   :  { %v7302_v50 = vadd.f32 %v7024_v29, %v784_v9  ;;  %v7305_v44 = vadd.f32 %v7154_v43, %v817_v7 }
 0x2c5   :  { %1153 = vperm.xlu1 %6542, %v7302_v50   ;;  %1186 = vperm.xlu0 %6541, %v7305_v44  }
 0x2c6   :  { %v826_v53 = vpop.xlane.xlu1 %825  ;;  %v781_v0 = vpop.xlane.xlu0 %780 }
 0x2c7   :  { %v7310_v5 = vadd.f32 %v7003_v14, %v826_v53  ;;  %v7313_v15 = vadd.f32 %v7212_v30, %v781_v0 }
 0x2c9   :  { %1195 = vperm.xlu1 %6542, %v7310_v5   ;;  %1150 = vperm.xlu0 %6541, %v7313_v15  }
 0x2ca   :  { %v790_v9 = vpop.xlane.xlu1 %789  ;;  %v823_v25 = vpop.xlane.xlu0 %822 }
 0x2cb   :  { %v7318_v7 = vadd.f32 %v7028_v31, %v790_v9  ;;  %v7321_v29 = vadd.f32 %v7167_v3, %v823_v25 }
 0x2cd   :  { %1159 = vperm.xlu1 %6542, %v7318_v7   ;;  %1192 = vperm.xlu0 %6541, %v7321_v29  }
 0x2ce   :  { %v832_v53 = vpop.xlane.xlu1 %831  ;;  %v787_v14 = vpop.xlane.xlu0 %786 }
 0x2cf   :  { %v7326_v0 = vadd.f32 %v7005_v16, %v832_v53  ;;  %v7329_v30 = vadd.f32 %v7214_v34, %v787_v14 }
 0x2d1   :  { %9719 = vst [vmem:[#allocation42_spill] sm:$0xff] %v7326_v0  ;;  %1201 = vperm.xlu1 %6542, %v7326_v0   ;;  %1156 = vperm.xlu0 %6541, %v7329_v30  }
 0x2d2   :  { %v796_v9 = vpop.xlane.xlu1 %795  ;;  %v829_v31 = vpop.xlane.xlu0 %828 }
 0x2d3   :  { %v7334_v25 = vadd.f32 %v7030_v33, %v796_v9  ;;  %v7337_v3 = vadd.f32 %v7179_v57, %v829_v31 }
 0x2d5   :  { %9720 = vst [vmem:[#allocation43_spill] sm:$0xff] %v7334_v25  ;;  %9721 = vst [vmem:[#allocation44_spill] sm:$0xff] %v7337_v3  ;;  %1165 = vperm.xlu1 %6542, %v7334_v25   ;;  %1198 = vperm.xlu0 %6541, %v7337_v3  }
 0x2d6   :  { %v838_v53 = vpop.xlane.xlu1 %837  ;;  %v793_v16 = vpop.xlane.xlu0 %792 }
 0x2d7   :  { %v7342_v14 = vadd.f32 %v7007_v17, %v838_v53  ;;  %v7345_v34 = vadd.f32 %v7216_v36, %v793_v16 }
 0x2d9   :  { %9722 = vst [vmem:[#allocation45_spill] sm:$0xff] %v7342_v14  ;;  %9723 = vst [vmem:[#allocation46_spill] sm:$0xff] %v7345_v34  ;;  %1207 = vperm.xlu1 %6542, %v7342_v14   ;;  %1162 = vperm.xlu0 %6541, %v7345_v34  }
 0x2da   :  { %v802_v9 = vpop.xlane.xlu1 %801  ;;  %v835_v33 = vpop.xlane.xlu0 %834 }
 0x2db   :  { %v7350_v31 = vadd.f32 %v7036_v37, %v802_v9  ;;  %v7353_v57 = vadd.f32 %v7188_v46, %v835_v33 }
 0x2dd   :  { %9724 = vst [vmem:[#allocation47_spill] sm:$0xff] %v7350_v31  ;;  %9725 = vst [vmem:[#allocation48_spill] sm:$0xff] %v7353_v57  ;;  %1171 = vperm.xlu1 %6542, %v7350_v31   ;;  %1204 = vperm.xlu0 %6541, %v7353_v57  }
 0x2de   :  { %v844_v53 = vpop.xlane.xlu1 %843  ;;  %v799_v17 = vpop.xlane.xlu0 %798 }
 0x2df   :  { %v7358_v16 = vadd.f32 %v7218_v1, %v799_v17  ;;  %v7375_v17 = vadd.f32 %v7206_v59, %v7263_v6 }
 0x2e1   :  { %9726 = vst [vmem:[#allocation49_spill] sm:$0xff] %v7358_v16  ;;  %1168 = vperm.xlu0 %6541, %v7358_v16  }
 0x2e2   :  { %v850_v36 = vpop.xlane.xlu1 %849  ;;  %v841_v43 = vpop.xlane.xlu0 %840 }
 0x2e3   :  { %v7362_v13 = vadd.f32 %v7196_v22, %v841_v43  ;;  %v7379_v43 = vadd.f32 %v7009_v18, %v844_v53 }
 0x2e5   :  { %9727 = vst [vmem:[#allocation50_spill] sm:$0xff] %v7362_v13  ;;  %1210 = vperm.xlu0 %6541, %v7362_v13   ;;  %9729 = vst [vmem:[#allocation52_spill] sm:$0xff] %v7379_v43  ;;  %v7405_v13 = vsub.s32 %v6938_v38, %v6863_v4 }
 0x2e6   :  { %v757_v33 = vpop.xlane.xlu1 %756  ;;  %v847_v9 = vpop.xlane.xlu0 %846 }
 0x2e7   :  { %v7366_v37 = vadd.f32 %v7013_v20, %v757_v33  ;;  %v7369_v46 = vadd.f32 %v7202_v26, %v847_v9  ;;  %v7383_v33 = vadd.f32 %v7011_v19, %v850_v36 }
 0x2e9   :  { %9728 = vst [vmem:[#allocation51_spill] sm:$0xff] %v7369_v46  ;;  %1126 = vperm.xlu1 %6542, %v7366_v37   ;;  %1216 = vperm.xlu0 %6541, %v7369_v46   ;;  %9730 = vst [vmem:[#allocation53_spill] sm:$0xff] %v7383_v33  ;;  %v1225_v46 = vadd.s32 4294967288, %v6938_v38 }
 0x2eb   :  { %v7408_v31 = vsub.s32 %v1225_v46, %v6863_v4 }
 0x2ed   :  { %1132 = vperm.xlu1 %6542, %v7375_v17  }
 0x2f1   :  { %1213 = vperm.xlu1 %6542, %v7379_v43  }
 0x2f5   :  { %1219 = vperm.xlu1 %6542, %v7383_v33  }
 0x328   :  { %v7388_v20 = vpop.permute.xlu0 %1129 }
 0x329   :  { %v1229_v25 = vrot.slane %v7388_v20, %v7408_v31 }
 0x32c   :  { %v7386_v9 = vpop.permute.xlu1 %1135 }
 0x32d   :  { %v1239_v46 = vrot.slane %v7386_v9, %v7408_v31 }
 0x330   :  { %v1142_v26 = vpop.permute.xlu1 %1141 }
 0x331   :  { %v1248_v61 = vrot.slane %v1142_v26, %v7408_v31 }
 0x334   :  { %v1178_v22 = vpop.permute.xlu1 %1177  ;;  %v1139_v6 = vpop.permute.xlu0 %1138 }
 0x338   :  { %v1184_v1 = vpop.permute.xlu1 %1183  ;;  %v1175_v10 = vpop.permute.xlu0 %1174 }
 0x339   :  { %v1311_v38 = vrot.slane %v1184_v1, %v7408_v31  ;;  %v1298_v34 = vrot.slane %v1175_v10, %v7405_v13 }
 0x33c   :  { %v1148_v27 = vpop.permute.xlu1 %1147  ;;  %v1181_v2 = vpop.permute.xlu0 %1180 }
 0x33d   :  { %v1307_v14 = vrot.slane %v1181_v2, %v7405_v13  ;;  %v1244_v2 = vrot.slane %v1139_v6, %v7405_v13  ;;  %v1257_v9 = vrot.slane %v1148_v27, %v7408_v31 }
 0x33f   :  { %v1312_v20 = vsel %vm1230_vm15, %v1311_v38, %v1307_v14  ;;  %v1249_v26 = vsel %vm1230_vm15, %v1248_v61, %v1244_v2 }
 0x340   :  { %v1190_v53 = vpop.permute.xlu1 %1189  ;;  %v1145_v18 = vpop.permute.xlu0 %1144 }
 0x341   :  { %v1320_v0 = vrot.slane %v1190_v53, %v7408_v31  ;;  %v1253_v3 = vrot.slane %v1145_v18, %v7405_v13 }
 0x344   :  { %v1154_v12 = vpop.permute.xlu1 %1153  ;;  %v1187_v40 = vpop.permute.xlu0 %1186 }
 0x345   :  { %v1316_v63 = vrot.slane %v1187_v40, %v7405_v13  ;;  %v1302_v40 = vrot.slane %v1178_v22, %v7408_v31  ;;  %v1266_v22 = vrot.slane %v1154_v12, %v7408_v31 }
 0x347   :  { %v1321_v6 = vsel %vm1230_vm15, %v1320_v0, %v1316_v63  ;;  %v1303_v18 = vsel %vm1230_vm15, %v1302_v40, %v1298_v34  ;;  %v1258_v63 = vsel %vm1230_vm15, %v1257_v9, %v1253_v3 }
 0x348   :  { %v1196_v11 = vpop.permute.xlu1 %1195  ;;  %v1151_v36 = vpop.permute.xlu0 %1150  ;;  %v1381_v27 = vsel %vm1367_vm1, %v1312_v20, %v1303_v18 }
 0x349   :  { %v1262_v1 = vrot.slane %v1151_v36, %v7405_v13  ;;  %v1329_v14 = vrot.slane %v1196_v11, %v7408_v31 }
 0x34b   :  { %v1267_v34 = vsel %vm1230_vm15, %v1266_v22, %v1262_v1 }
 0x34c   :  { %v7390_v19 = vpop.permute.xlu1 %1159  ;;  %v1193_v8 = vpop.permute.xlu0 %1192 }
 0x34d   :  { %v1325_v10 = vrot.slane %v1193_v8, %v7405_v13  ;;  %v1275_v40 = vrot.slane %v7390_v19, %v7408_v31 }
 0x34f   :  { %v1330_v12 = vsel %vm1230_vm15, %v1329_v14, %v1325_v10 }
 0x350   :  { %v7392_v24 = vpop.permute.xlu0 %1156  ;;  %v1202_v59 = vpop.permute.xlu1 %1201 }
 0x351   :  { %v1338_v11 = vrot.slane %v1202_v59, %v7408_v31 }
 0x354   :  { %v1199_v21 = vpop.permute.xlu0 %1198  ;;  %v7394_v23 = vpop.permute.xlu1 %1165 }
 0x355   :  { %v1334_v36 = vrot.slane %v1199_v21, %v7405_v13  ;;  %v1271_v21 = vrot.slane %v7392_v24, %v7405_v13  ;;  %v1284_v9 = vrot.slane %v7394_v23, %v7408_v31 }
 0x357   :  { %v1339_v20 = vsel %vm1230_vm15, %v1338_v11, %v1334_v36  ;;  %v1276_v18 = vsel %vm1230_vm15, %v1275_v40, %v1271_v21 }
 0x358   :  { %v7396_v28 = vpop.permute.xlu0 %1162  ;;  %v7398_v33 = vpop.permute.xlu1 %1207 }
 0x359   :  { %v1280_v1 = vrot.slane %v7396_v28, %v7405_v13  ;;  %v1347_v24 = vrot.slane %v7398_v33, %v7408_v31 }
 0x35b   :  { %v1285_v36 = vsel %vm1230_vm15, %v1284_v9, %v1280_v1 }
 0x35c   :  { %v7401_v43 = vpop.permute.xlu0 %1204  ;;  %v7410_v16 = vpop.permute.xlu1 %1171 }
 0x35d   :  { %v1343_v61 = vrot.slane %v7401_v43, %v7405_v13  ;;  %v1293_v33 = vrot.slane %v7410_v16, %v7408_v31 }
 0x360   :  { %v7413_v57 = vpop.permute.xlu0 %1168 }
 0x361   :  { %v1289_v43 = vrot.slane %v7413_v57, %v7405_v13  ;;  %v1348_v57 = vsel %vm1230_vm15, %v1347_v24, %v1343_v61 }
 0x364   :  { %v1211_v8 = vpop.permute.xlu0 %1210 }
 0x365   :  { %v1352_v28 = vrot.slane %v1211_v8, %v7405_v13 }
 0x368   :  { %v1127_v4 = vpop.permute.xlu1 %1126 }
 0x369   :  { %v1224_v53 = vrot.slane %v1127_v4, %v7405_v13  ;;  %v1382_v4 = vsel %vm1369_vm2, %v1321_v6, %v1381_v27  ;;  %v1217_v6 = vpop.permute.xlu0 %1216 }
 0x36a   :  { %v1383_v19 = vsel %vm1371_vm3, %v1330_v12, %v1382_v4 }
 0x36b   :  { %v1231_v2 = vsel %vm1230_vm15, %v1229_v25, %v1224_v53  ;;  %v1384_v14 = vsel %vm1373_vm4, %v1339_v20, %v1383_v19 }
 0x36c   :  { %v1133_v38 = vpop.permute.xlu1 %1132  ;;  %v1385_v4 = vsel %vm1375_vm6, %v1348_v57, %v1384_v14 }
 0x36d   :  { %v1235_v0 = vrot.slane %v1133_v38, %v7405_v13 }
 0x36f   :  { %v1240_v3 = vsel %vm1230_vm15, %v1239_v46, %v1235_v0 }
 0x370   :  { %v1368_v59 = vsel %vm1367_vm1, %v1240_v3, %v1231_v2  ;;  %v1214_v10 = vpop.permute.xlu1 %1213 }
 0x371   :  { %v1370_v25 = vsel %vm1369_vm2, %v1249_v26, %v1368_v59  ;;  %v1356_v46 = vrot.slane %v1214_v10, %v7408_v31  ;;  %v1361_v26 = vrot.slane %v1217_v6, %v7405_v13 }
 0x372   :  { %v1372_v53 = vsel %vm1371_vm3, %v1258_v63, %v1370_v25  ;;  %v1294_v63 = vsel %vm1230_vm15, %v1293_v33, %v1289_v43 }
 0x373   :  { %v1374_v22 = vsel %vm1373_vm4, %v1267_v34, %v1372_v53  ;;  %v1357_v23 = vsel %vm1230_vm15, %v1356_v46, %v1352_v28 }
 0x374   :  { %v1220_v38 = vpop.permute.xlu1 %1219  ;;  %v1376_v8 = vsel %vm1375_vm6, %v1276_v18, %v1374_v22  ;;  %v1386_v11 = vsel %vm1377_vm5, %v1357_v23, %v1385_v4 }
 0x375   :  { %v1365_v27 = vrot.slane %v1220_v38, %v7408_v31  ;;  %v1378_v16 = vsel %vm1377_vm5, %v1285_v36, %v1376_v8 }
 0x376   :  { %v1380_v0 = vsel %vm1379_vm7, %v1294_v63, %v1378_v16 }
 0x377   :  { %v1391_v34 = vsel %vm1390_vm8, %v1380_v0, -inf  ;;  %v1366_v12 = vsel %vm1230_vm15, %v1365_v27, %v1361_v26 }
 0x378   :  { %1392 = vmax.xlane.f32.xlu0 %v1391_v34  ;;  %v1387_v21 = vsel %vm1379_vm7, %v1366_v12, %v1386_v11 }
 0x379   :  { %v1394_v61 = vsel %vm1390_vm8, %v1387_v21, -inf }
 0x37a   :  { %1395 = vmax.xlane.f32.xlu1 %v1394_v61 }
 0x405   :  { %v7488_v2 = vpop.xlane.xlu0 %1392 }
 0x406   :  { %v1402_v3 = vrot.slane %v7488_v2, %v6943_v39  ;;  %v1406_v40 = vrot.slane %v7488_v2, %v6947_v45  ;;  %v1410_v59 = vrot.slane %v7488_v2, %v6951_v47  ;;  %v1414_v33 = vrot.slane %v7488_v2, %v6955_v49 }
 0x408   :  { %v1479_v20 = vsub.f32 %v7366_v37, %v1402_v3  ;;  %v1480_v1 = vsub.f32 %v7256_v54, %v1402_v3  ;;  %v1481_v10 = vsub.f32 %v7375_v17, %v1406_v40  ;;  %v1482_v24 = vsub.f32 %v7260_v62, %v1406_v40  ;;  %v7502_v37 = vpop.xlane.xlu1 %1395 }
 0x409   :  { %v1483_v46 = vsub.f32 %v7273_v41, %v1410_v59  ;;  %v1484_v9 = vsub.f32 %v7266_v58, %v1410_v59  ;;  %v1434_v6 = vrot.slane %v7502_v37, %v6943_v39  ;;  %v1438_v62 = vrot.slane %v7502_v37, %v6947_v45 }
 0x40a   :  { %v1511_v43 = vmul.f32 1.442695, %v1479_v20  ;;  %v1513_v25 = vmul.f32 1.442695, %v1480_v1  ;;  %v1515_v19 = vmul.f32 1.442695, %v1481_v10  ;;  %v1485_v23 = vsub.f32 %v7297_v42, %v1414_v33 }
 0x40b   :  { %v1517_v28 = vmul.f32 1.442695, %v1482_v24  ;;  %v1519_v54 = vmul.f32 1.442695, %v1483_v46  ;;  %v1521_v17 = vmul.f32 1.442695, %v1484_v9  ;;  %v1495_v41 = vsub.f32 %v7281_v32, %v1434_v6 }
 0x40c   :  { %6543 = vpow2.f32 %v1511_v43  ;;  %v1496_v58 = vsub.f32 %v7270_v35, %v1434_v6  ;;  %v1497_v57 = vsub.f32 %v7289_v48, %v1438_v62  ;;  %v1498_v14 = vsub.f32 %v7278_v56, %v1438_v62  ;;  %v9731_v46 = vld [vmem:[#allocation7_spill] sm:$0xff]  ;;  %v9732_v9 = vld [vmem:[#allocation44_spill] sm:$0xff]  ;;  %v9733_v6 = vld [vmem:[#allocation42_spill] sm:$0xff] }
 0x40d   :  { %6545 = vpow2.f32 %v1513_v25  ;;  %v1543_v22 = vmul.f32 1.442695, %v1495_v41  ;;  %v1442_v38 = vrot.slane %v7502_v37, %v6951_v47  ;;  %v1486_v48 = vsub.f32 %v7286_v52, %v1414_v33  ;;  %v9734_v41 = vld [vmem:[#allocation46_spill] sm:$0xff] }
 0x40e   :  { %6547 = vpow2.f32 %v1515_v19  ;;  %v1545_v32 = vmul.f32 1.442695, %v1496_v58  ;;  %v1547_v8 = vmul.f32 1.442695, %v1497_v57  ;;  %v1549_v56 = vmul.f32 1.442695, %v1498_v14 }
 0x40f   :  { %6549 = vpow2.f32 %v1517_v28  ;;  %v1418_v42 = vrot.slane %v7488_v2, %v6959_v51  ;;  %v1523_v63 = vmul.f32 1.442695, %v1485_v23  ;;  %v1499_v16 = vsub.f32 %v7305_v44, %v1442_v38 }
 0x410   :  { %6551 = vpow2.f32 %v1519_v54  ;;  %v1525_v0 = vmul.f32 1.442695, %v1486_v48  ;;  %v1500_v52 = vsub.f32 %v7294_v60, %v1442_v38  ;;  %v1446_v34 = vrot.slane %v7502_v37, %v6955_v49 }
 0x411   :  { %6553 = vpow2.f32 %v1521_v17  ;;  %v1487_v4 = vsub.f32 %v7313_v15, %v1418_v42  ;;  %v1551_v12 = vmul.f32 1.442695, %v1499_v16  ;;  %v1488_v11 = vsub.f32 %v7302_v50, %v1418_v42  ;;  %v9737_v42 = vld [vmem:[#allocation48_spill] sm:$0xff] }
 0x412   :  { %6555 = vpow2.f32 %v1543_v22  ;;  %v1553_v21 = vmul.f32 1.442695, %v1500_v52  ;;  %v1422_v60 = vrot.slane %v7488_v2, %v6966_v55  ;;  %v1501_v15 = vsub.f32 %v7321_v29, %v1446_v34  ;;  %v9735_v22 = vld [vmem:[#allocation43_spill] sm:$0xff] }
 0x413   :  { %6557 = vpow2.f32 %v1545_v32  ;;  %v1527_v3 = vmul.f32 1.442695, %v1487_v4  ;;  %v1529_v40 = vmul.f32 1.442695, %v1488_v11  ;;  %v1502_v50 = vsub.f32 %v7310_v5, %v1446_v34 }
 0x414   :  { %6559 = vpow2.f32 %v1547_v8  ;;  %v1489_v59 = vsub.f32 %v7329_v30, %v1422_v60  ;;  %v1450_v10 = vrot.slane %v7502_v37, %v6959_v51  ;;  %v1555_v29 = vmul.f32 1.442695, %v1501_v15  ;;  %v9736_v8 = vld [vmem:[#allocation8_spill] sm:$0xff] }
 0x415   :  { %6561 = vpow2.f32 %v1549_v56  ;;  %v1490_v24 = vsub.f32 %v7318_v7, %v1422_v60  ;;  %v1557_v5 = vmul.f32 1.442695, %v1502_v50  ;;  %v1426_v30 = vrot.slane %v7488_v2, %v9731_v46  ;;  %v9740_v60 = vld [vmem:[#allocation47_spill] sm:$0xff] }
 0x416   :  { %v7510_v53 = vpop.eup %6543  ;;  %6563 = vpow2.f32 %v1523_v63  ;;  %v1531_v19 = vmul.f32 1.442695, %v1489_v59  ;;  %v1503_v28 = vsub.f32 %v9732_v9, %v1450_v10  ;;  %v1504_v7 = vsub.f32 %v9733_v6, %v1450_v10 }
 0x417   :  { %v7512_v18 = vpop.eup %6545  ;;  %1608 = vperm.xlu0 %6541, %v7510_v53   ;;  %6565 = vpow2.f32 %v1525_v0  ;;  %v1533_v54 = vmul.f32 1.442695, %v1490_v24  ;;  %v1491_v58 = vsub.f32 %v9734_v41, %v1426_v30  ;;  %v1454_v33 = vrot.slane %v7502_v37, %v6966_v55  ;;  %v9738_v0 = vld [vmem:[#allocation45_spill] sm:$0xff] }
 0x418   :  { %1611 = vperm.xlu1 %6542, %v7512_v18   ;;  %v7520_v36 = vpop.eup %6547  ;;  %6567 = vpow2.f32 %v1551_v12  ;;  %v1559_v57 = vmul.f32 1.442695, %v1503_v28  ;;  %v1492_v14 = vsub.f32 %v9735_v22, %v1426_v30  ;;  %v1561_v32 = vmul.f32 1.442695, %v1504_v7  ;;  %v9739_v12 = vld [vmem:[#allocation49_spill] sm:$0xff]  ;;  %v9742_v30 = vld [vmem:[#allocation52_spill] sm:$0xff] }
 0x419   :  { %v7522_v35 = vpop.eup %6549  ;;  %6569 = vpow2.f32 %v1553_v21  ;;  %v1430_v48 = vrot.slane %v7488_v2, %v9736_v8  ;;  %v1535_v56 = vmul.f32 1.442695, %v1491_v58  ;;  %v1505_v63 = vsub.f32 %v9737_v42, %v1454_v33 }
 0x41a   :  { %v7530_v26 = vpop.eup %6551  ;;  %6571 = vpow2.f32 %v1527_v3  ;;  %v1537_v16 = vmul.f32 1.442695, %v1492_v14  ;;  %v1506_v52 = vsub.f32 %v9738_v0, %v1454_v33  ;;  %v1458_v2 = vrot.slane %v7502_v37, %v9731_v46 }
 0x41b   :  { %1614 = vperm.xlu0 %6541, %v7520_v36   ;;  %v7532_v27 = vpop.eup %6553  ;;  %6573 = vpow2.f32 %v1529_v40  ;;  %v1493_v11 = vsub.f32 %v9739_v12, %v1430_v48  ;;  %v1563_v21 = vmul.f32 1.442695, %v1505_v63  ;;  %v1494_v3 = vsub.f32 %v9740_v60, %v1430_v48 }
 0x41c   :  { %1617 = vperm.xlu1 %6542, %v7522_v35   ;;  %v7544_v61 = vpop.eup %6555  ;;  %6575 = vpow2.f32 %v1555_v29  ;;  %v1565_v15 = vmul.f32 1.442695, %v1506_v52  ;;  %v1462_v10 = vrot.slane %v7502_v37, %v9736_v8  ;;  %v9741_v29 = vld [vmem:[#allocation50_spill] sm:$0xff]  ;;  %v9745_v37 = vld [vmem:[#allocation53_spill] sm:$0xff] }
 0x41d   :  { %v7546_v44 = vpop.eup %6557  ;;  %6577 = vpow2.f32 %v1557_v5  ;;  %v1539_v59 = vmul.f32 1.442695, %v1493_v11  ;;  %v1507_v24 = vsub.f32 %v9741_v29, %v1458_v2  ;;  %v1541_v5 = vmul.f32 1.442695, %v1494_v3 }
 0x41e   :  { %v7554_v20 = vpop.eup %6559  ;;  %6579 = vpow2.f32 %v1531_v19  ;;  %v1508_v19 = vsub.f32 %v9742_v30, %v1458_v2  ;;  %v1510_v41 = vsub.f32 %v9745_v37, %v1462_v10 }
 0x41f   :  { %1620 = vperm.xlu0 %6541, %v7530_v26   ;;  %v7556_v1 = vpop.eup %6561  ;;  %6581 = vpow2.f32 %v1533_v54  ;;  %v9744_v54 = vld [vmem:[#allocation51_spill] sm:$0xff]  ;;  %v1567_v7 = vmul.f32 1.442695, %v1507_v24 }
 0x420   :  { %1623 = vperm.xlu1 %6542, %v7532_v27   ;;  %v7564_v43 = vpop.eup %6563  ;;  %6583 = vpow2.f32 %v1559_v57  ;;  %v1509_v6 = vsub.f32 %v9744_v54, %v1462_v10  ;;  %v1569_v58 = vmul.f32 1.442695, %v1508_v19  ;;  %v1573_v14 = vmul.f32 1.442695, %v1510_v41 }
 0x421   :  { %v7566_v25 = vpop.eup %6565  ;;  %6585 = vpow2.f32 %v1561_v32 }
 0x422   :  { %v7574_v17 = vpop.eup %6567  ;;  %6587 = vpow2.f32 %v1535_v56  ;;  %v1571_v22 = vmul.f32 1.442695, %v1509_v6 }
 0x423   :  { %1656 = vperm.xlu0 %6541, %v7544_v61   ;;  %v7576_v62 = vpop.eup %6569  ;;  %6589 = vpow2.f32 %v1537_v16 }
 0x424   :  { %1659 = vperm.xlu1 %6542, %v7546_v44   ;;  %v7584_v23 = vpop.eup %6571  ;;  %6591 = vpow2.f32 %v1563_v21 }
 0x425   :  { %v7586_v38 = vpop.eup %6573  ;;  %6593 = vpow2.f32 %v1565_v15 }
 0x426   :  { %v7594_v4 = vpop.eup %6575  ;;  %6595 = vpow2.f32 %v1539_v59 }
 0x427   :  { %1662 = vperm.xlu0 %6541, %v7554_v20   ;;  %v7596_v34 = vpop.eup %6577  ;;  %6597 = vpow2.f32 %v1541_v5 }
 0x428   :  { %1665 = vperm.xlu1 %6542, %v7556_v1   ;;  %v7604_v40 = vpop.eup %6579  ;;  %6599 = vpow2.f32 %v1567_v7 }
 0x429   :  { %v7606_v50 = vpop.eup %6581  ;;  %6601 = vpow2.f32 %v1569_v58 }
 0x42a   :  { %v7614_v9 = vpop.eup %6583  ;;  %6603 = vpow2.f32 %v1571_v22 }
 0x42b   :  { %1626 = vperm.xlu0 %6541, %v7564_v43   ;;  %9743 = vst [vmem:[#allocation44_spill] sm:$0xff] %v7614_v9  ;;  %v7616_v28 = vpop.eup %6585  ;;  %6605 = vpow2.f32 %v1573_v14 }
 0x42c   :  { %1629 = vperm.xlu1 %6542, %v7566_v25   ;;  %v7622_v33 = vpop.eup %6587 }
 0x42d   :  { %9746 = vst [vmem:[#allocation42_spill] sm:$0xff] %v7622_v33  ;;  %v7624_v57 = vpop.eup %6589 }
 0x42e   :  { %9747 = vst [vmem:[#allocation46_spill] sm:$0xff] %v7624_v57  ;;  %v7628_v32 = vpop.eup %6591 }
 0x42f   :  { %1668 = vperm.xlu0 %6541, %v7574_v17   ;;  %9748 = vst [vmem:[#allocation43_spill] sm:$0xff] %v7628_v32  ;;  %v7630_v48 = vpop.eup %6593 }
 0x430   :  { %1671 = vperm.xlu1 %6542, %v7576_v62   ;;  %9749 = vst [vmem:[#allocation48_spill] sm:$0xff] %v7630_v48  ;;  %v7634_v56 = vpop.eup %6595 }
 0x431   :  { %9750 = vst [vmem:[#allocation45_spill] sm:$0xff] %v7634_v56  ;;  %v7636_v42 = vpop.eup %6597 }
 0x432   :  { %9751 = vst [vmem:[#allocation49_spill] sm:$0xff] %v7636_v42  ;;  %v7640_v63 = vpop.eup %6599 }
 0x433   :  { %1632 = vperm.xlu0 %6541, %v7584_v23   ;;  %9752 = vst [vmem:[#allocation47_spill] sm:$0xff] %v7640_v63  ;;  %v7642_v16 = vpop.eup %6601 }
 0x434   :  { %1635 = vperm.xlu1 %6542, %v7586_v38   ;;  %9753 = vst [vmem:[#allocation50_spill] sm:$0xff] %v7642_v16  ;;  %v7646_v0 = vpop.eup %6603 }
 0x435   :  { %9754 = vst [vmem:[#allocation52_spill] sm:$0xff] %v7646_v0  ;;  %v7648_v52 = vpop.eup %6605 }
 0x436   :  { %9755 = vst [vmem:[#allocation51_spill] sm:$0xff] %v7648_v52 }
 0x437   :  { %1674 = vperm.xlu0 %6541, %v7594_v4  }
 0x438   :  { %1677 = vperm.xlu1 %6542, %v7596_v34  }
 0x43b   :  { %1638 = vperm.xlu0 %6541, %v7604_v40  }
 0x43c   :  { %1641 = vperm.xlu1 %6542, %v7606_v50  }
 0x43f   :  { %1680 = vperm.xlu0 %6541, %v7614_v9  }
 0x440   :  { %1683 = vperm.xlu1 %6542, %v7616_v28  }
 0x443   :  { %1644 = vperm.xlu0 %6541, %v7622_v33  }
 0x444   :  { %1647 = vperm.xlu1 %6542, %v7624_v57  }
 0x447   :  { %1686 = vperm.xlu0 %6541, %v7628_v32  }
 0x448   :  { %1689 = vperm.xlu1 %6542, %v7630_v48  }
 0x44b   :  { %1650 = vperm.xlu0 %6541, %v7634_v56  }
 0x44c   :  { %1653 = vperm.xlu1 %6542, %v7636_v42  }
 0x44f   :  { %1692 = vperm.xlu0 %6541, %v7640_v63  }
 0x450   :  { %1695 = vperm.xlu1 %6542, %v7642_v16  }
 0x453   :  { %1698 = vperm.xlu0 %6541, %v7646_v0  }
 0x454   :  { %1701 = vperm.xlu1 %6542, %v7648_v52  }
 0x496   :  { %v1609_v12 = vpop.permute.xlu0 %1608 }
 0x497   :  { %v1612_v11 = vpop.permute.xlu1 %1611  ;;  %v1706_v8 = vrot.slane %v1609_v12, %v7405_v13 }
 0x498   :  { %v1710_v42 = vrot.slane %v1612_v11, %v7408_v31 }
 0x49a   :  { %v1615_v2 = vpop.permute.xlu0 %1614  ;;  %v1711_v12 = vsel %vm1230_vm15, %v1710_v42, %v1706_v8 }
 0x49b   :  { %v1618_v21 = vpop.permute.xlu1 %1617  ;;  %v1715_v52 = vrot.slane %v1615_v2, %v7405_v13 }
 0x49c   :  { %v1719_v0 = vrot.slane %v1618_v21, %v7408_v31 }
 0x49e   :  { %v1621_v60 = vpop.permute.xlu0 %1620  ;;  %v1720_v57 = vsel %vm1230_vm15, %v1719_v0, %v1715_v52 }
 0x49f   :  { %v1624_v3 = vpop.permute.xlu1 %1623  ;;  %v1724_v16 = vrot.slane %v1621_v60, %v7405_v13  ;;  %v1847_v52 = vsel %vm1367_vm1, %v1720_v57, %v1711_v12 }
 0x4a0   :  { %v1728_v63 = vrot.slane %v1624_v3, %v7408_v31 }
 0x4a2   :  { %v7652_v15 = vpop.permute.xlu0 %1656  ;;  %v1729_v3 = vsel %vm1230_vm15, %v1728_v63, %v1724_v16 }
 0x4a3   :  { %v7654_v59 = vpop.permute.xlu1 %1659 }
 0x4a4   :  { %v1782_v8 = vrot.slane %v7654_v59, %v7408_v31 }
 0x4a6   :  { %v1663_v10 = vpop.permute.xlu0 %1662 }
 0x4a7   :  { %v1666_v29 = vpop.permute.xlu1 %1665  ;;  %v1787_v16 = vrot.slane %v1663_v10, %v7405_v13 }
 0x4a8   :  { %v1791_v63 = vrot.slane %v1666_v29, %v7408_v31 }
 0x4aa   :  { %v1627_v24 = vpop.permute.xlu0 %1626 }
 0x4ab   :  { %v1630_v5 = vpop.permute.xlu1 %1629  ;;  %v1733_v48 = vrot.slane %v1627_v24, %v7405_v13 }
 0x4ac   :  { %v1737_v32 = vrot.slane %v1630_v5, %v7408_v31 }
 0x4ae   :  { %v1669_v30 = vpop.permute.xlu0 %1668  ;;  %v1738_v5 = vsel %vm1230_vm15, %v1737_v32, %v1733_v48  ;;  %v1778_v32 = vrot.slane %v7652_v15, %v7405_v13 }
 0x4af   :  { %v1672_v19 = vpop.permute.xlu1 %1671  ;;  %v1796_v42 = vrot.slane %v1669_v30, %v7405_v13 }
 0x4b0   :  { %v1800_v57 = vrot.slane %v1672_v19, %v7408_v31 }
 0x4b2   :  { %v1633_v54 = vpop.permute.xlu0 %1632  ;;  %v1801_v12 = vsel %vm1230_vm15, %v1800_v57, %v1796_v42 }
 0x4b3   :  { %v1636_v6 = vpop.permute.xlu1 %1635  ;;  %v1742_v2 = vrot.slane %v1633_v54, %v7405_v13  ;;  %v1848_v54 = vsel %vm1369_vm2, %v1729_v3, %v1847_v52 }
 0x4b4   :  { %v1746_v21 = vrot.slane %v1636_v6, %v7408_v31 }
 0x4b6   :  { %v7656_v7 = vpop.permute.xlu0 %1674  ;;  %v1747_v6 = vsel %vm1230_vm15, %v1746_v21, %v1742_v2 }
 0x4b7   :  { %v1678_v37 = vpop.permute.xlu1 %1677  ;;  %v1805_v15 = vrot.slane %v7656_v7, %v7405_v13 }
 0x4b8   :  { %v1809_v59 = vrot.slane %v1678_v37, %v7408_v31 }
 0x4ba   :  { %v1639_v41 = vpop.permute.xlu0 %1638  ;;  %v1810_v52 = vsel %vm1230_vm15, %v1809_v59, %v1805_v15 }
 0x4bb   :  { %v1642_v58 = vpop.permute.xlu1 %1641  ;;  %v1751_v46 = vrot.slane %v1639_v41, %v7405_v13 }
 0x4bc   :  { %v1755_v60 = vrot.slane %v1642_v58, %v7408_v31 }
 0x4be   :  { %v7658_v22 = vpop.permute.xlu0 %1680  ;;  %v1756_v48 = vsel %vm1230_vm15, %v1755_v60, %v1751_v46  ;;  %v1792_v46 = vsel %vm1230_vm15, %v1791_v63, %v1787_v16 }
 0x4bf   :  { %v1684_v14 = vpop.permute.xlu1 %1683  ;;  %v1814_v30 = vrot.slane %v7658_v22, %v7405_v13  ;;  %v1783_v22 = vsel %vm1230_vm15, %v1782_v8, %v1778_v32 }
 0x4c0   :  { %v1818_v19 = vrot.slane %v1684_v14, %v7408_v31 }
 0x4c2   :  { %v1645_v56 = vpop.permute.xlu0 %1644  ;;  %v1819_v63 = vsel %vm1230_vm15, %v1818_v19, %v1814_v30 }
 0x4c3   :  { %v1648_v33 = vpop.permute.xlu1 %1647  ;;  %v1760_v9 = vrot.slane %v1645_v56, %v7405_v13 }
 0x4c4   :  { %v1764_v24 = vrot.slane %v1648_v33, %v7408_v31  ;;  %v1849_v33 = vsel %vm1371_vm3, %v1738_v5, %v1848_v54  ;;  %v1854_v54 = vsel %vm1367_vm1, %v1792_v46, %v1783_v22 }
 0x4c5   :  { %v1850_v58 = vsel %vm1373_vm4, %v1747_v6, %v1849_v33  ;;  %v1855_v16 = vsel %vm1369_vm2, %v1801_v12, %v1854_v54 }
 0x4c6   :  { %v1687_v11 = vpop.permute.xlu0 %1686  ;;  %v1765_v29 = vsel %vm1230_vm15, %v1764_v24, %v1760_v9  ;;  %v1851_v9 = vsel %vm1375_vm6, %v1756_v48, %v1850_v58  ;;  %v1856_v48 = vsel %vm1371_vm3, %v1810_v52, %v1855_v16  ;;  %v9757_v16 = vld [vmem:[#allocation7_spill] sm:$0xff] }
 0x4c7   :  { %v1690_v0 = vpop.permute.xlu1 %1689  ;;  %v1823_v3 = vrot.slane %v1687_v11, %v7405_v13  ;;  %v1852_v7 = vsel %vm1377_vm5, %v1765_v29, %v1851_v9  ;;  %v1857_v57 = vsel %vm1373_vm4, %v1819_v63, %v1856_v48  ;;  %v9756_v63 = vld [vmem:[#allocation44_spill] sm:$0xff]  ;;  %v9759_v48 = vld [vmem:[#allocation42_spill] sm:$0xff] }
 0x4c8   :  { %v1827_v2 = vrot.slane %v1690_v0, %v7408_v31 }
 0x4ca   :  { %v1651_v56 = vpop.permute.xlu0 %1650  ;;  %v1828_v6 = vsel %vm1230_vm15, %v1827_v2, %v1823_v3 }
 0x4cb   :  { %v1654_v10 = vpop.permute.xlu1 %1653  ;;  %v1769_v41 = vrot.slane %v1651_v56, %v7405_v13  ;;  %v1858_v29 = vsel %vm1375_vm6, %v1828_v6, %v1857_v57  ;;  %v9758_v6 = vld [vmem:[#allocation46_spill] sm:$0xff]  ;;  %v9762_v57 = vld [vmem:[#allocation8_spill] sm:$0xff] }
 0x4cc   :  { %v1773_v21 = vrot.slane %v1654_v10, %v7408_v31 }
 0x4ce   :  { %v1693_v60 = vpop.permute.xlu0 %1692  ;;  %v1774_v37 = vsel %vm1230_vm15, %v1773_v21, %v1769_v41 }
 0x4cf   :  { %v1696_v5 = vpop.permute.xlu1 %1695  ;;  %v1832_v24 = vrot.slane %v1693_v60, %v7405_v13  ;;  %v1853_v14 = vsel %vm1379_vm7, %v1774_v37, %v1852_v7 }
 0x4d0   :  { %v1836_v0 = vrot.slane %v1696_v5, %v7408_v31  ;;  %v1863_v11 = vsel %vm1390_vm8, %v1853_v14, 0.0 }
 0x4d1   :  { %1864 = vadd.xlane.f32.xlu0 %v1863_v11 }
 0x4d2   :  { %v1699_v33 = vpop.permute.xlu0 %1698  ;;  %v1837_v8 = vsel %vm1230_vm15, %v1836_v0, %v1832_v24 }
 0x4d3   :  { %v1702_v32 = vpop.permute.xlu1 %1701  ;;  %v1841_v56 = vrot.slane %v1699_v33, %v7405_v13  ;;  %v1859_v41 = vsel %vm1377_vm5, %v1837_v8, %v1858_v29  ;;  %v9760_v8 = vld [vmem:[#allocation48_spill] sm:$0xff]  ;;  %v9763_v29 = vld [vmem:[#allocation49_spill] sm:$0xff] }
 0x4d4   :  { %v1845_v42 = vrot.slane %v1702_v32, %v7408_v31 }
 0x4d6   :  { %v1846_v10 = vsel %vm1230_vm15, %v1845_v42, %v1841_v56  ;;  %v9761_v56 = vld [vmem:[#allocation43_spill] sm:$0xff] }
 0x4d7   :  { %v1860_v58 = vsel %vm1379_vm7, %v1846_v10, %v1859_v41  ;;  %v9764_v41 = vld [vmem:[#allocation45_spill] sm:$0xff] }
 0x4d8   :  { %v1866_v59 = vsel %vm1390_vm8, %v1860_v58, 0.0 }
 0x4d9   :  { %1867 = vadd.xlane.f32.xlu1 %v1866_v59 }
 0x55e   :  { %v1865_v15 = vpop.xlane.xlu0 %1864 }
 0x55f   :  { %6607 = vrcp.f32 %v1865_v15  ;;  %v9765_v15 = vld [vmem:[#allocation50_spill] sm:$0xff] }
 0x566   :  { %v1868_v21 = vpop.xlane.xlu1 %1867 }
 0x567   :  { %6609 = vrcp.f32 %v1868_v21 }
 0x569   :  { %v7728_v46 = vpop.eup %6607 }
 0x56a   :  { %v1876_v19 = vrot.slane %v7728_v46, %v6943_v39  ;;  %v1880_v2 = vrot.slane %v7728_v46, %v6947_v45  ;;  %v1884_v37 = vrot.slane %v7728_v46, %v6951_v47  ;;  %v1904_v42 = vrot.slane %v7728_v46, %v9762_v57 }
 0x56c   :  { %v1954_v30 = vmul.f32 %v7512_v18, %v1876_v19  ;;  %v1953_v9 = vmul.f32 %v7510_v53, %v1876_v19  ;;  %v1956_v3 = vmul.f32 %v7522_v35, %v1880_v2  ;;  %v1955_v60 = vmul.f32 %v7520_v36, %v1880_v2  ;;  %v9766_v19 = vld [vmem:[#allocation47_spill] sm:$0xff] }
 0x56d   :  { %v1958_v18 = vmul.f32 %v7532_v27, %v1884_v37  ;;  %v1957_v53 = vmul.f32 %v7530_v26, %v1884_v37  ;;  %v1888_v26 = vrot.slane %v7728_v46, %v6955_v49  ;;  %v1968_v10 = vmul.f32 %v9763_v29, %v1904_v42  ;;  %v2359_v37 = vld [vmem:[%s9518_s6] sm:$0xff] }
 0x56e   :  { %2028 = vperm.xlu1 %6542, %v1954_v30   ;;  %2025 = vperm.xlu0 %6541, %v1953_v9   ;;  %v1967_v58 = vmul.f32 %v9764_v41, %v1904_v42 }
 0x56f   :  { %v1960_v14 = vmul.f32 %v7566_v25, %v1888_v26 }
 0x571   :  { %v7740_v7 = vpop.eup %6609 }
 0x572   :  { %2034 = vperm.xlu1 %6542, %v1956_v3   ;;  %2031 = vperm.xlu0 %6541, %v1955_v60   ;;  %v1908_v12 = vrot.slane %v7740_v7, %v6943_v39  ;;  %v1912_v5 = vrot.slane %v7740_v7, %v6947_v45  ;;  %v1932_v59 = vrot.slane %v7740_v7, %v9757_v16  ;;  %v9768_v3 = vld [vmem:[#allocation52_spill] sm:$0xff] }
 0x573   :  { %v1936_v9 = vrot.slane %v7740_v7, %v9762_v57 }
 0x574   :  { %v1970_v35 = vmul.f32 %v7546_v44, %v1908_v12  ;;  %v1969_v36 = vmul.f32 %v7544_v61, %v1908_v12  ;;  %v1972_v24 = vmul.f32 %v7556_v1, %v1912_v5  ;;  %v1971_v27 = vmul.f32 %v7554_v20, %v1912_v5 }
 0x575   :  { %v1959_v44 = vmul.f32 %v7564_v43, %v1888_v26  ;;  %v1916_v61 = vrot.slane %v7740_v7, %v6951_v47  ;;  %v1892_v20 = vrot.slane %v7728_v46, %v6959_v51  ;;  %v1920_v43 = vrot.slane %v7740_v7, %v6955_v49 }
 0x576   :  { %2040 = vperm.xlu1 %6542, %v1958_v18   ;;  %2037 = vperm.xlu0 %6541, %v1957_v53   ;;  %v1982_v21 = vmul.f32 %v9765_v15, %v1932_v59  ;;  %v1981_v30 = vmul.f32 %v9766_v19, %v1932_v59  ;;  %v1983_v60 = vmul.f32 %v9768_v3, %v1936_v9  ;;  %v2360_v18 = vld [vmem:[%s9518_s6 + $0x8] sm:$0xff] }
 0x577   :  { %v1974_v22 = vmul.f32 %v7576_v62, %v1916_v61  ;;  %v1973_v1 = vmul.f32 %v7574_v17, %v1916_v61  ;;  %v1962_v52 = vmul.f32 %v7586_v38, %v1892_v20  ;;  %v1961_v25 = vmul.f32 %v7584_v23, %v1892_v20 }
 0x578   :  { %v1976_v0 = vmul.f32 %v7596_v34, %v1920_v43  ;;  %v1975_v62 = vmul.f32 %v7594_v4, %v1920_v43  ;;  %v1896_v17 = vrot.slane %v7728_v46, %v6966_v55  ;;  %v1924_v23 = vrot.slane %v7740_v7, %v6959_v51 }
 0x579   :  { %v1900_v4 = vrot.slane %v7728_v46, %v9757_v16  ;;  %v9767_v46 = vld [vmem:[#allocation51_spill] sm:$0xff]  ;;  %v7802_v53 = vpack.c.bf16 %v2360_v18, %v2359_v37 }
 0x57a   :  { %2076 = vperm.xlu1 %6542, %v1970_v35   ;;  %2073 = vperm.xlu0 %6541, %v1969_v36   ;;  %v1964_v11 = vmul.f32 %v7606_v50, %v1896_v17  ;;  %v1963_v38 = vmul.f32 %v7604_v40, %v1896_v17  ;;  %v1978_v54 = vmul.f32 %v7616_v28, %v1924_v23 }
 0x57b   :  { %v1977_v34 = vmul.f32 %v9756_v63, %v1924_v23  ;;  %v1966_v33 = vmul.f32 %v9758_v6, %v1900_v4  ;;  %v1965_v50 = vmul.f32 %v9759_v48, %v1900_v4  ;;  %v1928_v40 = vrot.slane %v7740_v7, %v6966_v55  ;;  %6511 = vmatprep.subr.bf16.mxu0 %v7802_v53 }
 0x57c   :  { %v1984_v2 = vmul.f32 %v9767_v46, %v1936_v9 }
 0x57d   :  { %v1980_v32 = vmul.f32 %v9760_v8, %v1928_v40  ;;  %v1979_v28 = vmul.f32 %v9761_v56, %v1928_v40 }
 0x57e   :  { %2082 = vperm.xlu1 %6542, %v1972_v24   ;;  %2079 = vperm.xlu0 %6541, %v1971_v27  }
 0x582   :  { %2046 = vperm.xlu1 %6542, %v1960_v14   ;;  %2043 = vperm.xlu0 %6541, %v1959_v44  }
 0x586   :  { %2088 = vperm.xlu1 %6542, %v1974_v22   ;;  %2085 = vperm.xlu0 %6541, %v1973_v1  }
 0x58a   :  { %2052 = vperm.xlu1 %6542, %v1962_v52   ;;  %2049 = vperm.xlu0 %6541, %v1961_v25  }
 0x58e   :  { %2094 = vperm.xlu1 %6542, %v1976_v0   ;;  %2091 = vperm.xlu0 %6541, %v1975_v62  }
 0x592   :  { %2058 = vperm.xlu1 %6542, %v1964_v11   ;;  %2055 = vperm.xlu0 %6541, %v1963_v38  }
 0x596   :  { %2100 = vperm.xlu1 %6542, %v1978_v54   ;;  %2097 = vperm.xlu0 %6541, %v1977_v34  }
 0x59a   :  { %2064 = vperm.xlu1 %6542, %v1966_v33   ;;  %2061 = vperm.xlu0 %6541, %v1965_v50  }
 0x59e   :  { %2106 = vperm.xlu1 %6542, %v1980_v32   ;;  %2103 = vperm.xlu0 %6541, %v1979_v28  }
 0x5a2   :  { %2070 = vperm.xlu1 %6542, %v1968_v10   ;;  %2067 = vperm.xlu0 %6541, %v1967_v58  }
 0x5a6   :  { %2112 = vperm.xlu1 %6542, %v1982_v21   ;;  %2109 = vperm.xlu0 %6541, %v1981_v30  }
 0x5aa   :  { %2118 = vperm.xlu1 %6542, %v1984_v2   ;;  %2115 = vperm.xlu0 %6541, %v1983_v60  }
 0x5ed   :  { %v2029_v7 = vpop.permute.xlu1 %2028  ;;  %v2026_v12 = vpop.permute.xlu0 %2025 }
 0x5ee   :  { %v2127_v4 = vrot.slane %v2029_v7, %v7408_v31  ;;  %v2123_v6 = vrot.slane %v2026_v12, %v7405_v13 }
 0x5f0   :  { %v2128_v10 = vsel %vm1230_vm15, %v2127_v4, %v2123_v6 }
 0x5f1   :  { %v2035_v35 = vpop.permute.xlu1 %2034  ;;  %v2032_v36 = vpop.permute.xlu0 %2031 }
 0x5f2   :  { %v2136_v23 = vrot.slane %v2035_v35, %v7408_v31  ;;  %v2132_v54 = vrot.slane %v2032_v36, %v7405_v13 }
 0x5f4   :  { %v2137_v56 = vsel %vm1230_vm15, %v2136_v23, %v2132_v54 }
 0x5f5   :  { %v2041_v5 = vpop.permute.xlu1 %2040  ;;  %v2038_v24 = vpop.permute.xlu0 %2037  ;;  %v2264_v19 = vsel %vm1367_vm1, %v2137_v56, %v2128_v10 }
 0x5f6   :  { %v2145_v63 = vrot.slane %v2041_v5, %v7408_v31  ;;  %v2141_v34 = vrot.slane %v2038_v24, %v7405_v13 }
 0x5f8   :  { %v2146_v28 = vsel %vm1230_vm15, %v2145_v63, %v2141_v34 }
 0x5f9   :  { %v7805_v27 = vpop.permute.xlu1 %2076  ;;  %v7807_v26 = vpop.permute.xlu0 %2073  ;;  %v2265_v9 = vsel %vm1369_vm2, %v2146_v28, %v2264_v19  ;;  %v6326_v19 = vld [vmem:[%s9520_s8] ss:$0 sm:$0xff] }
 0x5fa   :  { %v2199_v3 = vrot.slane %v7805_v27, %v7408_v31  ;;  %v2195_v60 = vrot.slane %v7807_v26, %v7405_v13  ;;  %2771 = vrot.lane.b32.xlu0 %v6326_v19, %s6772_s21 }
 0x5fd   :  { %v2083_v14 = vpop.permute.xlu1 %2082  ;;  %v2080_v44 = vpop.permute.xlu0 %2079 }
 0x5fe   :  { %v2208_v46 = vrot.slane %v2083_v14, %v7408_v31  ;;  %v2204_v2 = vrot.slane %v2080_v44, %v7405_v13 }
 0x601   :  { %v2047_v61 = vpop.permute.xlu1 %2046  ;;  %v2044_v22 = vpop.permute.xlu0 %2043 }
 0x602   :  { %v2154_v33 = vrot.slane %v2047_v61, %v7408_v31  ;;  %v2150_v48 = vrot.slane %v2044_v22, %v7405_v13  ;;  %v2209_v61 = vsel %vm1230_vm15, %v2208_v46, %v2204_v2 }
 0x604   :  { %v2155_v41 = vsel %vm1230_vm15, %v2154_v33, %v2150_v48 }
 0x605   :  { %v2089_v1 = vpop.permute.xlu1 %2088  ;;  %v2086_v20 = vpop.permute.xlu0 %2085  ;;  %v2266_v37 = vsel %vm1371_vm3, %v2155_v41, %v2265_v9 }
 0x606   :  { %v2217_v7 = vrot.slane %v2089_v1, %v7408_v31  ;;  %v2213_v12 = vrot.slane %v2086_v20, %v7405_v13 }
 0x609   :  { %v2053_v52 = vpop.permute.xlu1 %2052  ;;  %v2050_v25 = vpop.permute.xlu0 %2049 }
 0x60a   :  { %v2163_v8 = vrot.slane %v2053_v52, %v7408_v31  ;;  %v2159_v32 = vrot.slane %v2050_v25, %v7405_v13 }
 0x60c   :  { %v2164_v30 = vsel %vm1230_vm15, %v2163_v8, %v2159_v32 }
 0x60d   :  { %v2095_v43 = vpop.permute.xlu1 %2094  ;;  %v2092_v0 = vpop.permute.xlu0 %2091  ;;  %v2267_v35 = vsel %vm1373_vm4, %v2164_v30, %v2266_v37  ;;  %v6323_v37 = vld [vmem:[%s9519_s7] ss:$0 sm:$0xff] }
 0x60e   :  { %v2226_v14 = vrot.slane %v2095_v43, %v7408_v31  ;;  %v2222_v27 = vrot.slane %v2092_v0, %v7405_v13 }
 0x611   :  { %v2059_v62 = vpop.permute.xlu1 %2058  ;;  %v2056_v17 = vpop.permute.xlu0 %2055 }
 0x612   :  { %v2172_v42 = vrot.slane %v2059_v62, %v7408_v31  ;;  %v2168_v29 = vrot.slane %v2056_v17, %v7405_v13  ;;  %v2218_v62 = vsel %vm1230_vm15, %v2217_v7, %v2213_v12 }
 0x614   :  { %v2173_v18 = vsel %vm1230_vm15, %v2172_v42, %v2168_v29 }
 0x615   :  { %v7809_v11 = vpop.permute.xlu1 %2100  ;;  %v2098_v38 = vpop.permute.xlu0 %2097  ;;  %v2268_v20 = vsel %vm1375_vm6, %v2173_v18, %v2267_v35 }
 0x616   :  { %v2235_v22 = vrot.slane %v7809_v11, %v7408_v31  ;;  %v2231_v1 = vrot.slane %v2098_v38, %v7405_v13  ;;  %v2200_v11 = vsel %vm1230_vm15, %v2199_v3, %v2195_v60  ;;  %v2227_v38 = vsel %vm1230_vm15, %v2226_v14, %v2222_v27 }
 0x617   :  { %v2271_v4 = vsel %vm1367_vm1, %v2209_v61, %v2200_v11 }
 0x618   :  { %v2236_v6 = vsel %vm1230_vm15, %v2235_v22, %v2231_v1  ;;  %v2272_v33 = vsel %vm1369_vm2, %v2218_v62, %v2271_v4 }
 0x619   :  { %v2065_v50 = vpop.permute.xlu1 %2064  ;;  %v2062_v40 = vpop.permute.xlu0 %2061 }
 0x61a   :  { %v2181_v58 = vrot.slane %v2065_v50, %v7408_v31  ;;  %v2177_v59 = vrot.slane %v2062_v40, %v7405_v13  ;;  %v2273_v50 = vsel %vm1371_vm3, %v2227_v38, %v2272_v33 }
 0x61b   :  { %v2274_v56 = vsel %vm1373_vm4, %v2236_v6, %v2273_v50 }
 0x61c   :  { %v2182_v36 = vsel %vm1230_vm15, %v2181_v58, %v2177_v59  ;;  %v2361_v59 = vld [vmem:[%s9518_s6 + $0x10] sm:$0xff] }
 0x61d   :  { %v2107_v15 = vpop.permute.xlu1 %2106  ;;  %v2104_v21 = vpop.permute.xlu0 %2103  ;;  %v2269_v0 = vsel %vm1377_vm5, %v2182_v36, %v2268_v20 }
 0x61e   :  { %v2244_v52 = vrot.slane %v2107_v15, %v7408_v31  ;;  %v2240_v25 = vrot.slane %v2104_v21, %v7405_v13  ;;  %v2362_v15 = vld [vmem:[%s9518_s6 + $0x18] sm:$0xff] }
 0x61f   :  { %v6514_v21 = vpack.c.bf16 %v2362_v15, %v2361_v59 }
 0x620   :  { %v2245_v48 = vsel %vm1230_vm15, %v2244_v52, %v2240_v25 }
 0x621   :  { %v2071_v5 = vpop.permute.xlu1 %2070  ;;  %v2068_v24 = vpop.permute.xlu0 %2067  ;;  %v2275_v29 = vsel %vm1375_vm6, %v2245_v48, %v2274_v56 }
 0x622   :  { %v2190_v26 = vrot.slane %v2071_v5, %v7408_v31  ;;  %v2186_v44 = vrot.slane %v2068_v24, %v7405_v13  ;;  %v9769_v5 = vld [vmem:[#allocation21_spill] sm:$0xff] }
 0x624   :  { %v2191_v43 = vsel %vm1230_vm15, %v2190_v26, %v2186_v44 }
 0x625   :  { %v2113_v17 = vpop.permute.xlu1 %2112  ;;  %v2110_v23 = vpop.permute.xlu0 %2109  ;;  %v2270_v54 = vsel %vm1379_vm7, %v2191_v43, %v2269_v0 }
 0x626   :  { %v2253_v63 = vrot.slane %v2113_v17, %v7408_v31  ;;  %v2249_v34 = vrot.slane %v2110_v23, %v7405_v13  ;;  %6429 = vmatprep.mubr.msk.f32.mxu0 %vm1390_vm8, %v2270_v54 }
 0x628   :  { %v2254_v40 = vsel %vm1230_vm15, %v2253_v63, %v2249_v34 }
 0x629   :  { %v2119_v8 = vpop.permute.xlu1 %2118  ;;  %v2116_v32 = vpop.permute.xlu0 %2115  ;;  %v2276_v41 = vsel %vm1377_vm5, %v2254_v40, %v2275_v29 }
 0x62a   :  { %v2262_v28 = vrot.slane %v2119_v8, %v7408_v31  ;;  %v2258_v42 = vrot.slane %v2116_v32, %v7405_v13 }
 0x62c   :  { %v2263_v10 = vsel %vm1230_vm15, %v2262_v28, %v2258_v42 }
 0x62d   :  { %v2277_v58 = vsel %vm1379_vm7, %v2263_v10, %v2276_v41 }
 0x62e   :  { %6430 = vmatmul.mubr.msk.f32.vlgmr.msra.gmra.mrb[2].mxu0 %vm1390_vm8, %v2277_v58 }
 0x62f   :  { %6513 = vmatpush3.bf16.msra.mxu0 %v7802_v53  ;;  %v6320_v53 = vld [vmem:[%s9517_s5] ss:$0 sm:$0xff] }
 0x630   :  { %6515 = vmatprep.subr.bf16.mxu0 %v6514_v21 }
 0x633   :  { %6517 = vmatpush3.bf16.msra.mxu0 %v6514_v21 }
 0x66c   :  { %v7911_v44 = vpop.permute.xlu0 %2771 }
 0x701   :  { %v6431_v30 = vpop.f32.mrb[2].mxu0 }
 0x702   :  { %v2354_v9 = vadd.f32 %v6431_v30, %v6320_v53  ;;  %v2348_v46 = vpop.f32.mrb[3].mxu0 }
 0x703   :  { %v2349_v2 = vadd.f32 %v6320_v53, %v2348_v46 }
 0x704   :  { %v2358_v60 = vmax.f32 %v2354_v9, 0.0 }
 0x705   :  { %v2357_v3 = vmax.f32 %v2349_v2, 0.0 }
 0x707   :  { %6440 = vmatprep.mubr.msk.f32.mxu0 %vm754_vm14, %v2357_v3 }
 0x708   :  { %6441 = vmatmul.mubr.msk.f32.vlgmr.msra.gmra.mrb[4].mxu0 %vm754_vm14, %v2358_v60 }
 0x7db   :  { %v6442_v18 = vpop.f32.mrb[4].mxu0 }
 0x7dc   :  { %v7897_v7 = vadd.f32 %v6442_v18, %v6323_v37  ;;  %v2442_v12 = vpop.f32.mrb[5].mxu0 }
 0x7dd   :  { %v7899_v35 = vadd.f32 %v6323_v37, %v2442_v12 }
 0x7de   :  { %2633 = vrot.lane.b32.xlu1 %v7897_v7, %s6772_s21  ;;  %v2509_v22 = vrot.slane %v7897_v7, %v9769_v5 }
 0x7df   :  { %2631 = vrot.lane.b32.xlu0 %v7899_v35, %s6772_s21  ;;  %v6518_v36 = vpack.c.bf16 %v7897_v7, %v7899_v35  ;;  %v2460_v24 = vrot.slane %v7899_v35, %v9769_v5  ;;  %v2453_v15 = vcombine.high %v7899_v35, %v7899_v35 }
 0x7e0   :  { %v2517_v43 = vcombine.high %v2509_v22, %v2509_v22  ;;  %v2525_v0 = vrot.slane %v2509_v22, %v9769_v5 }
 0x7e1   :  { %6519 = vmatprep.subr.bf16.mxu0 %v6518_v36  ;;  %v2468_v14 = vcombine.high %v2460_v24, %v2460_v24  ;;  %v2476_v27 = vrot.slane %v2460_v24, %v9769_v5  ;;  %v2467_v18 = vrot.slane %v2453_v15, %v9769_v5 }
 0x7e2   :  { %6521 = vmatpush3.bf16.msra.mxu0 %v6518_v36  ;;  %v7930_v48 = vrot.slane %v2517_v43, %v9769_v5  ;;  %v2586_v50 = vrot.slane %v2525_v0, %v6943_v39  ;;  %v2547_v37 = vcombine.high %v2525_v0, %v2525_v0 }
 0x7e3   :  { %v2490_v26 = vrot.slane %v2468_v14, %v9769_v5  ;;  %v2498_v61 = vcombine.high %v2476_v27, %v2476_v27  ;;  %v2554_v1 = vrot.slane %v2476_v27, %v6943_v39 }
 0x7e4   :  { %v2590_v59 = vrot.slane %v7930_v48, %v6943_v39 }
 0x7e5   :  { %v2558_v20 = vrot.slane %v2490_v26, %v6943_v39  ;;  %v2562_v52 = vrot.slane %v2498_v61, %v6943_v39  ;;  %v2500_v21 = vcombine.high %v2490_v26, %v2490_v26 }
 0x7e7   :  { %v2566_v12 = vrot.slane %v2500_v21, %v6943_v39 }
 0x850   :  { %v7918_v25 = vpop.permute.xlu1 %2633 }
 0x851   :  { %v7921_v62 = vpop.permute.xlu0 %2631  ;;  %v2638_v17 = vadd.f32 %v7918_v25, %v2554_v1  ;;  %v2640_v23 = vadd.f32 %v7918_v25, %v2558_v20  ;;  %v2642_v38 = vadd.f32 %v7918_v25, %v2562_v52  ;;  %v2654_v29 = vadd.f32 %v7918_v25, %v2586_v50 }
 0x852   :  { %v2637_v54 = vadd.f32 %v7921_v62, %v2554_v1  ;;  %v2639_v11 = vadd.f32 %v7921_v62, %v2558_v20  ;;  %v2641_v4 = vadd.f32 %v7921_v62, %v2562_v52  ;;  %v2653_v58 = vadd.f32 %v7921_v62, %v2586_v50 }
 0x853   :  { %vm2670_vm9 = vcmp.gt.f32.partialorder %v2638_v17, 0.0  ;;  %v2702_v63 = vmul.f32 0.2, %v2638_v17  ;;  %v2704_v34 = vmul.f32 0.2, %v2640_v23  ;;  %vm2672_vm11 = vcmp.gt.f32.partialorder %v2640_v23, 0.0 }
 0x854   :  { %vm2669_vm10 = vcmp.gt.f32.partialorder %v2637_v54, 0.0  ;;  %v2701_v6 = vmul.f32 0.2, %v2637_v54  ;;  %v2703_v33 = vmul.f32 0.2, %v2639_v11  ;;  %vm2671_vm12 = vcmp.gt.f32.partialorder %v2639_v11, 0.0 }
 0x855   :  { %v2734_v40 = vsel %vm2670_vm9, %v2638_v17, %v2702_v63  ;;  %v2736_v28 = vsel %vm2672_vm11, %v2640_v23, %v2704_v34  ;;  %v2706_v42 = vmul.f32 0.2, %v2642_v38  ;;  %vm2674_vm13 = vcmp.gt.f32.partialorder %v2642_v38, 0.0 }
 0x856   :  { %v2775_v8 = vmul.f32 %v7911_v44, %v2734_v40  ;;  %v2733_v32 = vsel %vm2669_vm10, %v2637_v54, %v2701_v6  ;;  %v2735_v10 = vsel %vm2671_vm12, %v2639_v11, %v2703_v33  ;;  %v2705_v41 = vmul.f32 0.2, %v2641_v4 }
 0x857   :  { %v2774_v56 = vmul.f32 %v7911_v44, %v2733_v32  ;;  %vm2673_vm9 = vcmp.gt.f32.partialorder %v2641_v4, 0.0  ;;  %v2777_v19 = vmul.f32 %v7911_v44, %v2736_v28  ;;  %v2776_v53 = vmul.f32 %v7911_v44, %v2735_v10 }
 0x858   :  { %2840 = vrot.lane.b32.xlu0 %v2775_v8, %s6775_s3  ;;  %v2738_v30 = vsel %vm2674_vm13, %v2642_v38, %v2706_v42  ;;  %v2718_v9 = vmul.f32 0.2, %v2654_v29  ;;  %v2656_v46 = vadd.f32 %v7918_v25, %v2590_v59  ;;  %v2737_v2 = vsel %vm2673_vm9, %v2641_v4, %v2705_v41 }
 0x859   :  { %2838 = vrot.lane.b32.xlu1 %v2774_v56, %s6775_s3  ;;  %vm2686_vm10 = vcmp.gt.f32.partialorder %v2654_v29, 0.0  ;;  %v2717_v3 = vmul.f32 0.2, %v2653_v58  ;;  %v2655_v60 = vadd.f32 %v7921_v62, %v2590_v59  ;;  %vm2685_vm11 = vcmp.gt.f32.partialorder %v2653_v58, 0.0 }
 0x85a   :  { %v2779_v35 = vmul.f32 %v7911_v44, %v2738_v30  ;;  %v2778_v36 = vmul.f32 %v7911_v44, %v2737_v2  ;;  %v2750_v24 = vsel %vm2686_vm10, %v2654_v29, %v2718_v9  ;;  %v2720_v14 = vmul.f32 0.2, %v2656_v46 }
 0x85b   :  { %v2644_v27 = vadd.f32 %v7918_v25, %v2566_v12  ;;  %v2749_v26 = vsel %vm2685_vm11, %v2653_v58, %v2717_v3  ;;  %vm2688_vm12 = vcmp.gt.f32.partialorder %v2656_v46, 0.0  ;;  %v2719_v61 = vmul.f32 0.2, %v2655_v60 }
 0x85c   :  { %2844 = vrot.lane.b32.xlu0 %v2777_v19, %s6775_s3  ;;  %v2643_v22 = vadd.f32 %v7921_v62, %v2566_v12  ;;  %v2594_v1 = vrot.slane %v2547_v37, %v6943_v39  ;;  %v7958_v20 = vrot.slane %v2467_v18, %v9769_v5  ;;  %vm2687_vm13 = vcmp.gt.f32.partialorder %v2655_v60, 0.0 }
 0x85d   :  { %2842 = vrot.lane.b32.xlu1 %v2776_v53, %s6775_s3  ;;  %v2502_v52 = vcombine.high %v7897_v7, %v7897_v7  ;;  %v2791_v43 = vmul.f32 %v7911_v44, %v2750_v24  ;;  %v2790_v0 = vmul.f32 %v7911_v44, %v2749_v26  ;;  %v2752_v17 = vsel %vm2688_vm12, %v2656_v46, %v2720_v14 }
 0x85e   :  { %v2708_v23 = vmul.f32 0.2, %v2644_v27  ;;  %v2658_v54 = vadd.f32 %v7918_v25, %v2594_v1  ;;  %v2751_v11 = vsel %vm2687_vm13, %v2655_v60, %v2719_v61  ;;  %vm2676_vm9 = vcmp.gt.f32.partialorder %v2644_v27, 0.0 }
 0x85f   :  { %v2707_v38 = vmul.f32 0.2, %v2643_v22  ;;  %v2657_v63 = vadd.f32 %v7921_v62, %v2594_v1  ;;  %v2549_v34 = vcombine.high %v7930_v48, %v7930_v48  ;;  %v2469_v4 = vcombine.high %v2467_v18, %v2467_v18 }
 0x860   :  { %2848 = vrot.lane.b32.xlu0 %v2779_v35, %s6775_s3  ;;  %v2570_v7 = vrot.slane %v7958_v20, %v6943_v39  ;;  %vm2675_vm10 = vcmp.gt.f32.partialorder %v2643_v22, 0.0  ;;  %v2793_v6 = vmul.f32 %v7911_v44, %v2752_v17  ;;  %v2792_v33 = vmul.f32 %v7911_v44, %v2751_v11 }
 0x861   :  { %2846 = vrot.lane.b32.xlu1 %v2778_v36, %s6775_s3  ;;  %v2740_v50 = vsel %vm2676_vm9, %v2644_v27, %v2708_v23  ;;  %v2722_v40 = vmul.f32 0.2, %v2658_v54  ;;  %v2739_v32 = vsel %vm2675_vm10, %v2643_v22, %v2707_v38  ;;  %vm2690_vm11 = vcmp.gt.f32.partialorder %v2658_v54, 0.0 }
 0x862   :  { %v2646_v8 = vadd.f32 %v7918_v25, %v2570_v7  ;;  %v2721_v48 = vmul.f32 0.2, %v2657_v63  ;;  %v2645_v56 = vadd.f32 %v7921_v62, %v2570_v7  ;;  %v2516_v28 = vrot.slane %v2502_v52, %v9769_v5 }
 0x863   :  { %v7980_v42 = vrot.slane %v2469_v4, %v9769_v5  ;;  %vm2689_vm12 = vcmp.gt.f32.partialorder %v2657_v63, 0.0  ;;  %v2598_v29 = vrot.slane %v2549_v34, %v6943_v39  ;;  %v2781_v10 = vmul.f32 %v7911_v44, %v2740_v50 }
 0x864   :  { %2872 = vrot.lane.b32.xlu0 %v2791_v43, %s6775_s3  ;;  %v2780_v41 = vmul.f32 %v7911_v44, %v2739_v32  ;;  %v2754_v58 = vsel %vm2690_vm11, %v2658_v54, %v2722_v40  ;;  %v2710_v59 = vmul.f32 0.2, %v2646_v8  ;;  %v2753_v21 = vsel %vm2689_vm12, %v2657_v63, %v2721_v48 }
 0x865   :  { %2870 = vrot.lane.b32.xlu1 %v2790_v0, %s6775_s3  ;;  %v2660_v15 = vadd.f32 %v7918_v25, %v2598_v29  ;;  %vm2678_vm13 = vcmp.gt.f32.partialorder %v2646_v8, 0.0  ;;  %v2709_v19 = vmul.f32 0.2, %v2645_v56  ;;  %v2659_v53 = vadd.f32 %v7921_v62, %v2598_v29 }
 0x866   :  { %v7990_v30 = vrot.slane %v2516_v28, %v9769_v5  ;;  %vm2677_vm9 = vcmp.gt.f32.partialorder %v2645_v56, 0.0  ;;  %v2574_v9 = vrot.slane %v7980_v42, %v6943_v39  ;;  %v2795_v46 = vmul.f32 %v7911_v44, %v2754_v58 }
 0x867   :  { %v2794_v2 = vmul.f32 %v7911_v44, %v2753_v21  ;;  %v2742_v3 = vsel %vm2678_vm13, %v2646_v8, %v2710_v59  ;;  %v2724_v60 = vmul.f32 0.2, %v2660_v15  ;;  %v2741_v18 = vsel %vm2677_vm9, %v2645_v56, %v2709_v19 }
 0x868   :  { %2876 = vrot.lane.b32.xlu0 %v2793_v6, %s6775_s3  ;;  %v2648_v37 = vadd.f32 %v7918_v25, %v2574_v9  ;;  %vm2692_vm10 = vcmp.gt.f32.partialorder %v2660_v15, 0.0  ;;  %v2723_v12 = vmul.f32 0.2, %v2659_v53  ;;  %v2647_v35 = vadd.f32 %v7921_v62, %v2574_v9 }
 0x869   :  { %2874 = vrot.lane.b32.xlu1 %v2792_v33, %s6775_s3  ;;  %v2518_v36 = vcombine.high %v2516_v28, %v2516_v28  ;;  %v2602_v24 = vrot.slane %v7990_v30, %v6943_v39  ;;  %v2499_v14 = vcombine.high %v7958_v20, %v7958_v20  ;;  %vm2691_vm11 = vcmp.gt.f32.partialorder %v2659_v53, 0.0 }
 0x86a   :  { %v2783_v27 = vmul.f32 %v7911_v44, %v2742_v3  ;;  %v2782_v26 = vmul.f32 %v7911_v44, %v2741_v18  ;;  %v2756_v61 = vsel %vm2692_vm10, %v2660_v15, %v2724_v60  ;;  %v2712_v22 = vmul.f32 0.2, %v2648_v37 }
 0x86b   :  { %v2662_v1 = vadd.f32 %v7918_v25, %v2602_v24  ;;  %v2755_v52 = vsel %vm2691_vm11, %v2659_v53, %v2723_v12  ;;  %vm2680_vm12 = vcmp.gt.f32.partialorder %v2648_v37, 0.0  ;;  %v2711_v43 = vmul.f32 0.2, %v2647_v35 }
 0x86c   :  { %2852 = vrot.lane.b32.xlu0 %v2781_v10, %s6775_s3  ;;  %v2661_v0 = vadd.f32 %v7921_v62, %v2602_v24  ;;  %v2546_v20 = vrot.slane %v2518_v36, %v9769_v5  ;;  %vm2679_vm13 = vcmp.gt.f32.partialorder %v2647_v35, 0.0  ;;  %v2578_v17 = vrot.slane %v2499_v14, %v6943_v39 }
 0x86d   :  { %2850 = vrot.lane.b32.xlu1 %v2780_v41, %s6775_s3  ;;  %v2797_v23 = vmul.f32 %v7911_v44, %v2756_v61  ;;  %v2796_v54 = vmul.f32 %v7911_v44, %v2755_v52  ;;  %v2744_v11 = vsel %vm2680_vm12, %v2648_v37, %v2712_v22  ;;  %v2726_v38 = vmul.f32 0.2, %v2662_v1 }
 0x86e   :  { %v2650_v63 = vadd.f32 %v7918_v25, %v2578_v17  ;;  %v2743_v34 = vsel %vm2679_vm13, %v2647_v35, %v2711_v43  ;;  %vm2694_vm9 = vcmp.gt.f32.partialorder %v2662_v1, 0.0  ;;  %v2725_v4 = vmul.f32 0.2, %v2661_v0 }
 0x86f   :  { %v2649_v7 = vadd.f32 %v7921_v62, %v2578_v17  ;;  %v2501_v6 = vcombine.high %v7980_v42, %v7980_v42  ;;  %vm2693_vm10 = vcmp.gt.f32.partialorder %v2661_v0, 0.0  ;;  %v2606_v33 = vrot.slane %v2546_v20, %v6943_v39 }
 0x870   :  { %2880 = vrot.lane.b32.xlu0 %v2795_v46, %s6775_s3  ;;  %v2785_v50 = vmul.f32 %v7911_v44, %v2744_v11  ;;  %v2784_v40 = vmul.f32 %v7911_v44, %v2743_v34  ;;  %v2758_v8 = vsel %vm2694_vm9, %v2662_v1, %v2726_v38  ;;  %v2714_v32 = vmul.f32 0.2, %v2650_v63 }
 0x871   :  { %2878 = vrot.lane.b32.xlu1 %v2794_v2, %s6775_s3  ;;  %v2664_v48 = vadd.f32 %v7918_v25, %v2606_v33  ;;  %v2757_v56 = vsel %vm2693_vm10, %v2661_v0, %v2725_v4  ;;  %vm2682_vm11 = vcmp.gt.f32.partialorder %v2650_v63, 0.0  ;;  %v2713_v28 = vmul.f32 0.2, %v2649_v7 }
 0x872   :  { %v2663_v42 = vadd.f32 %v7921_v62, %v2606_v33  ;;  %v2548_v29 = vcombine.high %v7990_v30, %v7990_v30  ;;  %vm2681_vm12 = vcmp.gt.f32.partialorder %v2649_v7, 0.0  ;;  %v2582_v10 = vrot.slane %v2501_v6, %v6943_v39 }
 0x873   :  { %v2799_v41 = vmul.f32 %v7911_v44, %v2758_v8  ;;  %v2798_v58 = vmul.f32 %v7911_v44, %v2757_v56  ;;  %v2746_v59 = vsel %vm2682_vm11, %v2650_v63, %v2714_v32  ;;  %v2728_v15 = vmul.f32 0.2, %v2664_v48 }
 0x874   :  { %2856 = vrot.lane.b32.xlu0 %v2783_v27, %s6775_s3  ;;  %v2652_v21 = vadd.f32 %v7918_v25, %v2582_v10  ;;  %v2745_v19 = vsel %vm2681_vm12, %v2649_v7, %v2713_v28  ;;  %vm2696_vm13 = vcmp.gt.f32.partialorder %v2664_v48, 0.0  ;;  %v2727_v53 = vmul.f32 0.2, %v2663_v42 }
 0x875   :  { %2854 = vrot.lane.b32.xlu1 %v2782_v26, %s6775_s3  ;;  %v2651_v30 = vadd.f32 %v7921_v62, %v2582_v10  ;;  %v2550_v9 = vcombine.high %v2546_v20, %v2546_v20  ;;  %vm2695_vm9 = vcmp.gt.f32.partialorder %v2663_v42, 0.0  ;;  %v2610_v46 = vrot.slane %v2548_v29, %v6943_v39 }
 0x876   :  { %v2787_v2 = vmul.f32 %v7911_v44, %v2746_v59  ;;  %v2786_v3 = vmul.f32 %v7911_v44, %v2745_v19  ;;  %v2760_v60 = vsel %vm2696_vm13, %v2664_v48, %v2728_v15  ;;  %v2716_v37 = vmul.f32 0.2, %v2652_v21 }
 0x877   :  { %v2666_v18 = vadd.f32 %v7918_v25, %v2610_v46  ;;  %v2759_v12 = vsel %vm2695_vm9, %v2663_v42, %v2727_v53  ;;  %vm2684_vm10 = vcmp.gt.f32.partialorder %v2652_v21, 0.0  ;;  %v2715_v35 = vmul.f32 0.2, %v2651_v30 }
 0x878   :  { %2884 = vrot.lane.b32.xlu0 %v2797_v23, %s6775_s3  ;;  %v2665_v36 = vadd.f32 %v7921_v62, %v2610_v46  ;;  %vm2683_vm11 = vcmp.gt.f32.partialorder %v2651_v30, 0.0  ;;  %v2614_v24 = vrot.slane %v2550_v9, %v6943_v39  ;;  %v2801_v14 = vmul.f32 %v7911_v44, %v2760_v60 }
 0x879   :  { %2882 = vrot.lane.b32.xlu1 %v2796_v54, %s6775_s3  ;;  %v2800_v27 = vmul.f32 %v7911_v44, %v2759_v12  ;;  %v2748_v26 = vsel %vm2684_vm10, %v2652_v21, %v2716_v37  ;;  %v2730_v61 = vmul.f32 0.2, %v2666_v18  ;;  %v2747_v1 = vsel %vm2683_vm11, %v2651_v30, %v2715_v35 }
 0x87a   :  { %v2668_v22 = vadd.f32 %v7918_v25, %v2614_v24  ;;  %vm2698_vm12 = vcmp.gt.f32.partialorder %v2666_v18, 0.0  ;;  %v2729_v52 = vmul.f32 0.2, %v2665_v36  ;;  %v2667_v43 = vadd.f32 %v7921_v62, %v2614_v24 }
 0x87b   :  { %vm2697_vm13 = vcmp.gt.f32.partialorder %v2665_v36, 0.0  ;;  %v2789_v0 = vmul.f32 %v7911_v44, %v2748_v26  ;;  %v2788_v20 = vmul.f32 %v7911_v44, %v2747_v1  ;;  %v2762_v17 = vsel %vm2698_vm12, %v2666_v18, %v2730_v61 }
 0x87c   :  { %2860 = vrot.lane.b32.xlu0 %v2785_v50, %s6775_s3  ;;  %v2732_v23 = vmul.f32 0.2, %v2668_v22  ;;  %v2761_v54 = vsel %vm2697_vm13, %v2665_v36, %v2729_v52  ;;  %vm2700_vm9 = vcmp.gt.f32.partialorder %v2668_v22, 0.0  ;;  %v2731_v25 = vmul.f32 0.2, %v2667_v43 }
 0x87d   :  { %2858 = vrot.lane.b32.xlu1 %v2784_v40, %s6775_s3  ;;  %vm2699_vm10 = vcmp.gt.f32.partialorder %v2667_v43, 0.0  ;;  %v2803_v11 = vmul.f32 %v7911_v44, %v2762_v17  ;;  %v2802_v62 = vmul.f32 %v7911_v44, %v2761_v54 }
 0x87e   :  { %v2764_v38 = vsel %vm2700_vm9, %v2668_v22, %v2732_v23  ;;  %v2763_v63 = vsel %vm2699_vm10, %v2667_v43, %v2731_v25 }
 0x87f   :  { %v2805_v34 = vmul.f32 %v7911_v44, %v2764_v38  ;;  %v2804_v4 = vmul.f32 %v7911_v44, %v2763_v63 }
 0x880   :  { %2888 = vrot.lane.b32.xlu0 %v2799_v41, %s6775_s3 }
 0x881   :  { %2886 = vrot.lane.b32.xlu1 %v2798_v58, %s6775_s3 }
 0x884   :  { %2864 = vrot.lane.b32.xlu0 %v2787_v2, %s6775_s3 }
 0x885   :  { %2862 = vrot.lane.b32.xlu1 %v2786_v3, %s6775_s3 }
 0x888   :  { %2892 = vrot.lane.b32.xlu0 %v2801_v14, %s6775_s3 }
 0x889   :  { %2890 = vrot.lane.b32.xlu1 %v2800_v27, %s6775_s3 }
 0x88c   :  { %2868 = vrot.lane.b32.xlu0 %v2789_v0, %s6775_s3 }
 0x88d   :  { %2866 = vrot.lane.b32.xlu1 %v2788_v20, %s6775_s3 }
 0x890   :  { %2896 = vrot.lane.b32.xlu0 %v2803_v11, %s6775_s3 }
 0x891   :  { %2894 = vrot.lane.b32.xlu1 %v2802_v62, %s6775_s3 }
 0x894   :  { %2900 = vrot.lane.b32.xlu0 %v2805_v34, %s6775_s3 }
 0x895   :  { %2898 = vrot.lane.b32.xlu1 %v2804_v4, %s6775_s3 }
 0x8ca   :  { %v2841_v7 = vpop.permute.xlu0 %2840 }
 0x8cb   :  { %v8063_v6 = vpop.permute.xlu1 %2838  ;;  %v2937_v33 = vsel %vm754_vm14, %v2841_v7, 0.0 }
 0x8cc   :  { %2938 = vadd.xlane.f32.xlu0 %v2937_v33 }
 0x8ce   :  { %v2845_v50 = vpop.permute.xlu0 %2844 }
 0x8cf   :  { %v2843_v40 = vpop.permute.xlu1 %2842  ;;  %v2943_v8 = vsel %vm754_vm14, %v2845_v50, 0.0 }
 0x8d0   :  { %2944 = vadd.xlane.f32.xlu1 %v2943_v8  ;;  %v2940_v32 = vsel %vm754_vm14, %v2843_v40, 0.0 }
 0x8d1   :  { %2941 = vadd.xlane.f32.xlu0 %v2940_v32 }
 0x8d2   :  { %v2849_v48 = vpop.permute.xlu0 %2848 }
 0x8d3   :  { %v2847_v44 = vpop.permute.xlu1 %2846  ;;  %v2949_v56 = vsel %vm754_vm14, %v2849_v48, 0.0 }
 0x8d4   :  { %2950 = vadd.xlane.f32.xlu1 %v2949_v56  ;;  %v2946_v28 = vsel %vm754_vm14, %v2847_v44, 0.0 }
 0x8d5   :  { %2947 = vadd.xlane.f32.xlu0 %v2946_v28 }
 0x8d6   :  { %v2873_v42 = vpop.permute.xlu0 %2872 }
 0x8d7   :  { %v2871_v29 = vpop.permute.xlu1 %2870  ;;  %v2985_v10 = vsel %vm754_vm14, %v2873_v42, 0.0  ;;  %v2934_v42 = vsel %vm754_vm14, %v8063_v6, 0.0  ;;  %v9773_v6 = vld [vmem:[#allocation19_spill] sm:$0xff] }
 0x8d8   :  { %2986 = vadd.xlane.f32.xlu1 %v2985_v10  ;;  %v2982_v41 = vsel %vm754_vm14, %v2871_v29, 0.0  ;;  %v9770_v10 = vld [vmem:[#allocation34_spill] sm:$0xff] }
 0x8d9   :  { %2983 = vadd.xlane.f32.xlu0 %v2982_v41 }
 0x8da   :  { %v2877_v58 = vpop.permute.xlu0 %2876 }
 0x8db   :  { %v2875_v59 = vpop.permute.xlu1 %2874  ;;  %v2991_v15 = vsel %vm754_vm14, %v2877_v58, 0.0 }
 0x8dc   :  { %2992 = vadd.xlane.f32.xlu1 %v2991_v15  ;;  %v2988_v21 = vsel %vm754_vm14, %v2875_v59, 0.0  ;;  %v9771_v59 = vld [vmem:[#allocation18_spill] sm:$0xff] }
 0x8dd   :  { %2989 = vadd.xlane.f32.xlu0 %v2988_v21 }
 0x8de   :  { %v2853_v19 = vpop.permute.xlu0 %2852 }
 0x8df   :  { %v2851_v53 = vpop.permute.xlu1 %2850  ;;  %v2955_v30 = vsel %vm754_vm14, %v2853_v19, 0.0  ;;  %v9772_v19 = vld [vmem:[#allocation35_spill] sm:$0xff] }
 0x8e0   :  { %2956 = vadd.xlane.f32.xlu1 %v2955_v30  ;;  %v2952_v9 = vsel %vm754_vm14, %v2851_v53, 0.0 }
 0x8e1   :  { %2953 = vadd.xlane.f32.xlu0 %v2952_v9 }
 0x8e2   :  { %v2881_v46 = vpop.permute.xlu0 %2880 }
 0x8e3   :  { %v2879_v2 = vpop.permute.xlu1 %2878  ;;  %v2997_v3 = vsel %vm754_vm14, %v2881_v46, 0.0 }
 0x8e4   :  { %2998 = vadd.xlane.f32.xlu1 %v2997_v3  ;;  %v2994_v60 = vsel %vm754_vm14, %v2879_v2, 0.0  ;;  %v9774_v2 = vld [vmem:[#allocation36_spill] sm:$0xff] }
 0x8e5   :  { %2995 = vadd.xlane.f32.xlu0 %v2994_v60 }
 0x8e6   :  { %v2857_v37 = vpop.permute.xlu0 %2856 }
 0x8e7   :  { %v2855_v18 = vpop.permute.xlu1 %2854  ;;  %v2961_v12 = vsel %vm754_vm14, %v2857_v37, 0.0  ;;  %v9775_v37 = vld [vmem:[#allocation9_spill] sm:$0xff] }
 0x8e8   :  { %2962 = vadd.xlane.f32.xlu1 %v2961_v12  ;;  %v2958_v35 = vsel %vm754_vm14, %v2855_v18, 0.0 }
 0x8e9   :  { %2959 = vadd.xlane.f32.xlu0 %v2958_v35  ;;  %v9776_v35 = vld [vmem:[#allocation26_spill] sm:$0xff] }
 0x8ea   :  { %v2885_v36 = vpop.permute.xlu0 %2884 }
 0x8eb   :  { %v2883_v24 = vpop.permute.xlu1 %2882  ;;  %v3003_v14 = vsel %vm754_vm14, %v2885_v36, 0.0 }
 0x8ec   :  { %3004 = vadd.xlane.f32.xlu1 %v3003_v14  ;;  %v3000_v27 = vsel %vm754_vm14, %v2883_v24, 0.0  ;;  %v9777_v14 = vld [vmem:[#allocation10_spill] sm:$0xff] }
 0x8ed   :  { %3001 = vadd.xlane.f32.xlu0 %v3000_v27 }
 0x8ee   :  { %v2861_v26 = vpop.permute.xlu0 %2860 }
 0x8ef   :  { %v2859_v61 = vpop.permute.xlu1 %2858  ;;  %v2967_v22 = vsel %vm754_vm14, %v2861_v26, 0.0 }
 0x8f0   :  { %2968 = vadd.xlane.f32.xlu1 %v2967_v22  ;;  %v2964_v1 = vsel %vm754_vm14, %v2859_v61, 0.0  ;;  %v9778_v61 = vld [vmem:[#allocation27_spill] sm:$0xff] }
 0x8f1   :  { %2965 = vadd.xlane.f32.xlu0 %v2964_v1 }
 0x8f2   :  { %v2889_v52 = vpop.permute.xlu0 %2888 }
 0x8f3   :  { %v2887_v43 = vpop.permute.xlu1 %2886  ;;  %v3009_v0 = vsel %vm754_vm14, %v2889_v52, 0.0  ;;  %v9779_v52 = vld [vmem:[#allocation20_spill] sm:$0xff] }
 0x8f4   :  { %3010 = vadd.xlane.f32.xlu1 %v3009_v0  ;;  %v3006_v20 = vsel %vm754_vm14, %v2887_v43, 0.0 }
 0x8f5   :  { %3007 = vadd.xlane.f32.xlu0 %v3006_v20  ;;  %v9780_v20 = vld [vmem:[#allocation37_spill] sm:$0xff] }
 0x8f6   :  { %v2865_v17 = vpop.permute.xlu0 %2864 }
 0x8f7   :  { %v2863_v23 = vpop.permute.xlu1 %2862  ;;  %v2973_v54 = vsel %vm754_vm14, %v2865_v17, 0.0 }
 0x8f8   :  { %2974 = vadd.xlane.f32.xlu1 %v2973_v54  ;;  %v2970_v25 = vsel %vm754_vm14, %v2863_v23, 0.0  ;;  %v9781_v54 = vld [vmem:[#allocation11_spill] sm:$0xff] }
 0x8f9   :  { %2971 = vadd.xlane.f32.xlu0 %v2970_v25 }
 0x8fa   :  { %v2893_v11 = vpop.permute.xlu0 %2892 }
 0x8fb   :  { %v2891_v62 = vpop.permute.xlu1 %2890  ;;  %v3015_v38 = vsel %vm754_vm14, %v2893_v11, 0.0 }
 0x8fc   :  { %3016 = vadd.xlane.f32.xlu1 %v3015_v38  ;;  %v3012_v63 = vsel %vm754_vm14, %v2891_v62, 0.0  ;;  %v9782_v62 = vld [vmem:[#allocation28_spill] sm:$0xff] }
 0x8fd   :  { %3013 = vadd.xlane.f32.xlu0 %v3012_v63 }
 0x8fe   :  { %v2869_v34 = vpop.permute.xlu0 %2868 }
 0x8ff   :  { %v2867_v4 = vpop.permute.xlu1 %2866  ;;  %v2979_v7 = vsel %vm754_vm14, %v2869_v34, 0.0  ;;  %v9783_v34 = vld [vmem:[#allocation22_spill] sm:$0xff] }
 0x900   :  { %2980 = vadd.xlane.f32.xlu1 %v2979_v7  ;;  %v2976_v33 = vsel %vm754_vm14, %v2867_v4, 0.0 }
 0x901   :  { %2977 = vadd.xlane.f32.xlu0 %v2976_v33  ;;  %v9784_v33 = vld [vmem:[#allocation38_spill] sm:$0xff] }
 0x902   :  { %v2897_v50 = vpop.permute.xlu0 %2896 }
 0x903   :  { %v2895_v40 = vpop.permute.xlu1 %2894  ;;  %v3021_v8 = vsel %vm754_vm14, %v2897_v50, 0.0 }
 0x904   :  { %3022 = vadd.xlane.f32.xlu1 %v3021_v8  ;;  %v3018_v32 = vsel %vm754_vm14, %v2895_v40, 0.0  ;;  %v9785_v8 = vld [vmem:[#allocation12_spill] sm:$0xff] }
 0x905   :  { %3019 = vadd.xlane.f32.xlu0 %v3018_v32 }
 0x906   :  { %v2901_v48 = vpop.permute.xlu0 %2900 }
 0x907   :  { %v2899_v44 = vpop.permute.xlu1 %2898  ;;  %v3027_v56 = vsel %vm754_vm14, %v2901_v48, 0.0 }
 0x908   :  { %3028 = vadd.xlane.f32.xlu1 %v3027_v56  ;;  %v3024_v28 = vsel %vm754_vm14, %v2899_v44, 0.0  ;;  %v9786_v44 = vld [vmem:[#allocation29_spill] sm:$0xff] }
 0x909   :  { %3025 = vadd.xlane.f32.xlu0 %v3024_v28 }
 0x90c   :  { %2935 = vadd.xlane.f32.xlu1 %v2934_v42  ;;  %v9787_v42 = vld [vmem:[#allocation23_spill] sm:$0xff] }
 0x959   :  { %v2939_v29 = vpop.xlane.xlu0 %2938 }
 0x95a   :  { %v8099_v41 = vadd.f32 %v2939_v29, %v9770_v10 }
 0x95c   :  { %3098 = vperm.xlu1 %6542, %v8099_v41  }
 0x95d   :  { %v2945_v58 = vpop.xlane.xlu1 %2944 }
 0x95e   :  { %v8103_v15 = vadd.f32 %v2945_v58, %v9771_v59  ;;  %v2942_v21 = vpop.xlane.xlu0 %2941 }
 0x95f   :  { %v8106_v53 = vadd.f32 %v2942_v21, %v9772_v19  ;;  %v9789_v21 = vld [vmem:[#allocation39_spill] sm:$0xff] }
 0x960   :  { %3104 = vperm.xlu0 %6541, %v8103_v15  }
 0x961   :  { %v2951_v30 = vpop.xlane.xlu1 %2950  ;;  %3101 = vperm.xlu1 %6542, %v8106_v53  }
 0x962   :  { %v8111_v9 = vadd.f32 %v2951_v30, %v9773_v6  ;;  %v2948_v46 = vpop.xlane.xlu0 %2947 }
 0x963   :  { %v8114_v3 = vadd.f32 %v2948_v46, %v9774_v2 }
 0x964   :  { %3110 = vperm.xlu0 %6541, %v8111_v9  }
 0x965   :  { %v2987_v60 = vpop.xlane.xlu1 %2986  ;;  %3107 = vperm.xlu1 %6542, %v8114_v3  }
 0x966   :  { %v8119_v18 = vadd.f32 %v2987_v60, %v9775_v37  ;;  %v2984_v12 = vpop.xlane.xlu0 %2983  ;;  %v9791_v60 = vld [vmem:[#allocation13_spill] sm:$0xff] }
 0x967   :  { %v8122_v36 = vadd.f32 %v2984_v12, %v9776_v35 }
 0x968   :  { %3146 = vperm.xlu0 %6541, %v8119_v18  }
 0x969   :  { %v2993_v24 = vpop.xlane.xlu1 %2992  ;;  %3143 = vperm.xlu1 %6542, %v8122_v36  }
 0x96a   :  { %v8127_v27 = vadd.f32 %v2993_v24, %v9777_v14  ;;  %v2990_v26 = vpop.xlane.xlu0 %2989 }
 0x96b   :  { %v8130_v22 = vadd.f32 %v2990_v26, %v9778_v61  ;;  %v9793_v26 = vld [vmem:[#allocation30_spill] sm:$0xff] }
 0x96c   :  { %3152 = vperm.xlu0 %6541, %v8127_v27  }
 0x96d   :  { %v2957_v1 = vpop.xlane.xlu1 %2956  ;;  %3149 = vperm.xlu1 %6542, %v8130_v22  }
 0x96e   :  { %v8135_v43 = vadd.f32 %v2957_v1, %v9779_v52  ;;  %v2954_v0 = vpop.xlane.xlu0 %2953 }
 0x96f   :  { %v8138_v17 = vadd.f32 %v2954_v0, %v9780_v20 }
 0x970   :  { %3116 = vperm.xlu0 %6541, %v8135_v43  }
 0x971   :  { %v2999_v23 = vpop.xlane.xlu1 %2998  ;;  %3113 = vperm.xlu1 %6542, %v8138_v17  }
 0x972   :  { %v8143_v25 = vadd.f32 %v2999_v23, %v9781_v54  ;;  %v2996_v11 = vpop.xlane.xlu0 %2995  ;;  %v9795_v23 = vld [vmem:[#allocation24_spill] sm:$0xff] }
 0x973   :  { %v8146_v38 = vadd.f32 %v2996_v11, %v9782_v62 }
 0x974   :  { %3158 = vperm.xlu0 %6541, %v8143_v25  }
 0x975   :  { %v2963_v63 = vpop.xlane.xlu1 %2962  ;;  %3155 = vperm.xlu1 %6542, %v8146_v38  }
 0x976   :  { %v8151_v4 = vadd.f32 %v2963_v63, %v9783_v34  ;;  %v2960_v7 = vpop.xlane.xlu0 %2959 }
 0x977   :  { %v8154_v50 = vadd.f32 %v2960_v7, %v9784_v33  ;;  %v9797_v7 = vld [vmem:[#allocation40_spill] sm:$0xff] }
 0x978   :  { %3122 = vperm.xlu0 %6541, %v8151_v4  }
 0x979   :  { %v3005_v40 = vpop.xlane.xlu1 %3004  ;;  %3119 = vperm.xlu1 %6542, %v8154_v50  }
 0x97a   :  { %v8159_v32 = vadd.f32 %v3005_v40, %v9785_v8  ;;  %v3002_v48 = vpop.xlane.xlu0 %3001  ;;  %v9812_v8 = vld [vmem:[#allocation15_spill] sm:$0xff] }
 0x97b   :  { %v8162_v56 = vadd.f32 %v3002_v48, %v9786_v44  ;;  %v9809_v44 = vld [vmem:[#allocation33_spill] sm:$0xff] }
 0x97c   :  { %3164 = vperm.xlu0 %6541, %v8159_v32  }
 0x97d   :  { %v2969_v28 = vpop.xlane.xlu1 %2968  ;;  %3161 = vperm.xlu1 %6542, %v8162_v56  }
 0x97e   :  { %v8167_v29 = vadd.f32 %v2969_v28, %v9787_v42  ;;  %v2966_v58 = vpop.xlane.xlu0 %2965  ;;  %v9799_v28 = vld [vmem:[#allocation14_spill] sm:$0xff] }
 0x97f   :  { %v8170_v30 = vadd.f32 %v2966_v58, %v9789_v21 }
 0x980   :  { %9788 = vst [vmem:[#allocation53_spill] sm:$0xff] %v8167_v29  ;;  %3128 = vperm.xlu0 %6541, %v8167_v29  }
 0x981   :  { %9790 = vst [vmem:[#allocation44_spill] sm:$0xff] %v8170_v30  ;;  %v3011_v46 = vpop.xlane.xlu1 %3010  ;;  %3125 = vperm.xlu1 %6542, %v8170_v30  }
 0x982   :  { %v8175_v12 = vadd.f32 %v3011_v46, %v9791_v60  ;;  %v3008_v24 = vpop.xlane.xlu0 %3007 }
 0x983   :  { %v8178_v1 = vadd.f32 %v3008_v24, %v9793_v26  ;;  %v9801_v24 = vld [vmem:[#allocation31_spill] sm:$0xff]  ;;  %v9805_v26 = vld [vmem:[#allocation41_spill] sm:$0xff] }
 0x984   :  { %9792 = vst [vmem:[#allocation46_spill] sm:$0xff] %v8175_v12  ;;  %3170 = vperm.xlu0 %6541, %v8175_v12  }
 0x985   :  { %9794 = vst [vmem:[#allocation42_spill] sm:$0xff] %v8178_v1  ;;  %v2975_v0 = vpop.xlane.xlu1 %2974  ;;  %3167 = vperm.xlu1 %6542, %v8178_v1  }
 0x986   :  { %v8183_v11 = vadd.f32 %v2975_v0, %v9795_v23  ;;  %v2972_v63 = vpop.xlane.xlu0 %2971  ;;  %v9803_v23 = vld [vmem:[#allocation25_spill] sm:$0xff] }
 0x987   :  { %v8186_v40 = vadd.f32 %v2972_v63, %v9797_v7 }
 0x988   :  { %9796 = vst [vmem:[#allocation48_spill] sm:$0xff] %v8183_v11  ;;  %3134 = vperm.xlu0 %6541, %v8183_v11  }
 0x989   :  { %9798 = vst [vmem:[#allocation43_spill] sm:$0xff] %v8186_v40  ;;  %v3017_v48 = vpop.xlane.xlu1 %3016  ;;  %3131 = vperm.xlu1 %6542, %v8186_v40  }
 0x98a   :  { %v8191_v58 = vadd.f32 %v3017_v48, %v9799_v28  ;;  %v3014_v46 = vpop.xlane.xlu0 %3013 }
 0x98b   :  { %v8194_v19 = vadd.f32 %v3014_v46, %v9801_v24  ;;  %v9807_v46 = vld [vmem:[#allocation32_spill] sm:$0xff] }
 0x98c   :  { %9800 = vst [vmem:[#allocation49_spill] sm:$0xff] %v8191_v58  ;;  %3176 = vperm.xlu0 %6541, %v8191_v58  }
 0x98d   :  { %9802 = vst [vmem:[#allocation45_spill] sm:$0xff] %v8194_v19  ;;  %v2981_v0 = vpop.xlane.xlu1 %2980  ;;  %3173 = vperm.xlu1 %6542, %v8194_v19  }
 0x98e   :  { %v8199_v63 = vadd.f32 %v2981_v0, %v9803_v23  ;;  %v2978_v7 = vpop.xlane.xlu0 %2977 }
 0x98f   :  { %v8202_v60 = vadd.f32 %v2978_v7, %v9805_v26  ;;  %v9811_v7 = vld [vmem:[#allocation17_spill] sm:$0xff] }
 0x990   :  { %9804 = vst [vmem:[#allocation50_spill] sm:$0xff] %v8199_v63  ;;  %3140 = vperm.xlu0 %6541, %v8199_v63  }
 0x991   :  { %9806 = vst [vmem:[#allocation47_spill] sm:$0xff] %v8202_v60  ;;  %v3023_v48 = vpop.xlane.xlu1 %3022  ;;  %3137 = vperm.xlu1 %6542, %v8202_v60  }
 0x992   :  { %v3020_v28 = vpop.xlane.xlu0 %3019  ;;  %v8219_v33 = vadd.f32 %v3023_v48, %v9812_v8 }
 0x993   :  { %v8207_v24 = vadd.f32 %v3020_v28, %v9807_v46  ;;  %v9814_v28 = vld [vmem:[#allocation16_spill] sm:$0xff] }
 0x994   :  { %9813 = vst [vmem:[#allocation54_spill] sm:$0xff] %v8219_v33 }
 0x995   :  { %9808 = vst [vmem:[#allocation51_spill] sm:$0xff] %v8207_v24  ;;  %v3029_v21 = vpop.xlane.xlu1 %3028  ;;  %3179 = vperm.xlu1 %6542, %v8207_v24  }
 0x996   :  { %v3026_v42 = vpop.xlane.xlu0 %3025  ;;  %v8223_v46 = vadd.f32 %v3029_v21, %v9814_v28 }
 0x997   :  { %v8211_v0 = vadd.f32 %v3026_v42, %v9809_v44 }
 0x998   :  { %9815 = vst [vmem:[#allocation55_spill] sm:$0xff] %v8223_v46 }
 0x999   :  { %9810 = vst [vmem:[#allocation52_spill] sm:$0xff] %v8211_v0  ;;  %v2936_v23 = vpop.xlane.xlu1 %2935  ;;  %3185 = vperm.xlu1 %6542, %v8211_v0  }
 0x99a   :  { %v8215_v26 = vadd.f32 %v2936_v23, %v9811_v7 }
 0x99c   :  { %3095 = vperm.xlu0 %6541, %v8215_v26  }
 0x9a0   :  { %3182 = vperm.xlu0 %6541, %v8219_v33  }
 0x9a4   :  { %3188 = vperm.xlu0 %6541, %v8223_v46  }
 0x9db   :  { %v8226_v42 = vpop.permute.xlu1 %3098 }
 0x9df   :  { %v3105_v44 = vpop.permute.xlu0 %3104 }
 0x9e0   :  { %v3102_v34 = vpop.permute.xlu1 %3101  ;;  %v3206_v58 = vrot.slane %v3105_v44, %v7408_v31 }
 0x9e1   :  { %v3202_v19 = vrot.slane %v3102_v34, %v7405_v13 }
 0x9e3   :  { %v3111_v62 = vpop.permute.xlu0 %3110 }
 0x9e4   :  { %v3108_v54 = vpop.permute.xlu1 %3107  ;;  %v3215_v57 = vrot.slane %v3111_v62, %v7408_v31 }
 0x9e5   :  { %v3211_v11 = vrot.slane %v3108_v54, %v7405_v13  ;;  %v3197_v54 = vrot.slane %v8226_v42, %v7408_v31 }
 0x9e7   :  { %v3147_v23 = vpop.permute.xlu0 %3146 }
 0x9e8   :  { %v3144_v7 = vpop.permute.xlu1 %3143  ;;  %v3269_v40 = vrot.slane %v3147_v23, %v7408_v31  ;;  %v3216_v23 = vsel %vm1230_vm15, %v3215_v57, %v3211_v11 }
 0x9e9   :  { %v3265_v12 = vrot.slane %v3144_v7, %v7405_v13  ;;  %v3207_v7 = vsel %vm1230_vm15, %v3206_v58, %v3202_v19 }
 0x9eb   :  { %v3153_v20 = vpop.permute.xlu0 %3152 }
 0x9ec   :  { %v3150_v52 = vpop.permute.xlu1 %3149  ;;  %v3278_v24 = vrot.slane %v3153_v20, %v7408_v31 }
 0x9ed   :  { %v3274_v63 = vrot.slane %v3150_v52, %v7405_v13 }
 0x9ef   :  { %v3117_v61 = vpop.permute.xlu0 %3116  ;;  %v3279_v44 = vsel %vm1230_vm15, %v3278_v24, %v3274_v63 }
 0x9f0   :  { %v3114_v48 = vpop.permute.xlu1 %3113  ;;  %v3224_v16 = vrot.slane %v3117_v61, %v7408_v31  ;;  %v3270_v61 = vsel %vm1230_vm15, %v3269_v40, %v3265_v12 }
 0x9f1   :  { %v3220_v20 = vrot.slane %v3114_v48, %v7405_v13  ;;  %v3341_v24 = vsel %vm1367_vm1, %v3279_v44, %v3270_v61 }
 0x9f3   :  { %v3159_v8 = vpop.permute.xlu0 %3158  ;;  %v3225_v63 = vsel %vm1230_vm15, %v3224_v16, %v3220_v20 }
 0x9f4   :  { %v3156_v14 = vpop.permute.xlu1 %3155  ;;  %v3287_v52 = vrot.slane %v3159_v8, %v7408_v31 }
 0x9f5   :  { %v3283_v29 = vrot.slane %v3156_v14, %v7405_v13 }
 0x9f7   :  { %v3123_v35 = vpop.permute.xlu0 %3122 }
 0x9f8   :  { %v3120_v37 = vpop.permute.xlu1 %3119  ;;  %v3233_v19 = vrot.slane %v3123_v35, %v7408_v31 }
 0x9f9   :  { %v3229_v57 = vrot.slane %v3120_v37, %v7405_v13 }
 0x9fb   :  { %v3165_v21 = vpop.permute.xlu0 %3164  ;;  %v3234_v20 = vsel %vm1230_vm15, %v3233_v19, %v3229_v57 }
 0x9fc   :  { %v3162_v28 = vpop.permute.xlu1 %3161  ;;  %v3296_v34 = vrot.slane %v3165_v21, %v7408_v31 }
 0x9fd   :  { %v3292_v62 = vrot.slane %v3162_v28, %v7405_v13  ;;  %v3288_v28 = vsel %vm1230_vm15, %v3287_v52, %v3283_v29 }
 0x9ff   :  { %v3129_v2 = vpop.permute.xlu0 %3128  ;;  %v3297_v12 = vsel %vm1230_vm15, %v3296_v34, %v3292_v62 }
 0xa00   :  { %v3126_v6 = vpop.permute.xlu1 %3125 }
 0xa03   :  { %v3171_v10 = vpop.permute.xlu0 %3170 }
 0xa04   :  { %v3168_v59 = vpop.permute.xlu1 %3167  ;;  %v3305_v48 = vrot.slane %v3171_v10, %v7408_v31  ;;  %v3242_v10 = vrot.slane %v3129_v2, %v7408_v31 }
 0xa05   :  { %v3301_v8 = vrot.slane %v3168_v59, %v7405_v13  ;;  %v3238_v59 = vrot.slane %v3126_v6, %v7405_v13 }
 0xa07   :  { %v3135_v46 = vpop.permute.xlu0 %3134  ;;  %v3306_v29 = vsel %vm1230_vm15, %v3305_v48, %v3301_v8  ;;  %v3243_v34 = vsel %vm1230_vm15, %v3242_v10, %v3238_v59 }
 0xa08   :  { %v3132_v5 = vpop.permute.xlu1 %3131 }
 0xa09   :  { %v3247_v35 = vrot.slane %v3132_v5, %v7405_v13 }
 0xa0b   :  { %v3177_v33 = vpop.permute.xlu0 %3176 }
 0xa0c   :  { %v3174_v0 = vpop.permute.xlu1 %3173  ;;  %v3314_v11 = vrot.slane %v3177_v33, %v7408_v31 }
 0xa0d   :  { %v3310_v40 = vrot.slane %v3174_v0, %v7405_v13  ;;  %v3342_v0 = vsel %vm1369_vm2, %v3288_v28, %v3341_v24 }
 0xa0e   :  { %v3343_v44 = vsel %vm1371_vm3, %v3297_v12, %v3342_v0 }
 0xa0f   :  { %v3141_v1 = vpop.permute.xlu0 %3140  ;;  %v3344_v62 = vsel %vm1373_vm4, %v3306_v29, %v3343_v44 }
 0xa10   :  { %v3138_v60 = vpop.permute.xlu1 %3137  ;;  %v3260_v21 = vrot.slane %v3141_v1, %v7408_v31  ;;  %v3315_v1 = vsel %vm1230_vm15, %v3314_v11, %v3310_v40 }
 0xa11   :  { %v3256_v2 = vrot.slane %v3138_v60, %v7405_v13  ;;  %v3345_v28 = vsel %vm1375_vm6, %v3315_v1, %v3344_v62 }
 0xa14   :  { %v3180_v14 = vpop.permute.xlu1 %3179 }
 0xa15   :  { %v3319_v52 = vrot.slane %v3180_v14, %v7405_v13  ;;  %v3261_v14 = vsel %vm1230_vm15, %v3260_v21, %v3256_v2 }
 0xa1b   :  { %v3096_v30 = vpop.permute.xlu0 %3095 }
 0xa1c   :  { %v3193_v42 = vrot.slane %v3096_v30, %v7405_v13  ;;  %v3251_v30 = vrot.slane %v3135_v46, %v7408_v31  ;;  %v3186_v46 = vpop.permute.xlu1 %3185 }
 0xa1d   :  { %v3328_v48 = vrot.slane %v3186_v46, %v7405_v13 }
 0xa1e   :  { %v3198_v16 = vsel %vm1230_vm15, %v3197_v54, %v3193_v42  ;;  %v3252_v54 = vsel %vm1230_vm15, %v3251_v30, %v3247_v35 }
 0xa1f   :  { %v3334_v37 = vsel %vm1367_vm1, %v3207_v7, %v3198_v16  ;;  %v3183_v58 = vpop.permute.xlu0 %3182 }
 0xa20   :  { %v3335_v6 = vsel %vm1369_vm2, %v3216_v23, %v3334_v37  ;;  %v3323_v33 = vrot.slane %v3183_v58, %v7408_v31 }
 0xa21   :  { %v3336_v5 = vsel %vm1371_vm3, %v3225_v63, %v3335_v6 }
 0xa22   :  { %v3337_v60 = vsel %vm1373_vm4, %v3234_v20, %v3336_v5  ;;  %v3324_v7 = vsel %vm1230_vm15, %v3323_v33, %v3319_v52 }
 0xa23   :  { %v3189_v23 = vpop.permute.xlu0 %3188  ;;  %v3338_v61 = vsel %vm1375_vm6, %v3243_v34, %v3337_v60  ;;  %v3346_v57 = vsel %vm1377_vm5, %v3324_v7, %v3345_v28 }
 0xa24   :  { %v3332_v8 = vrot.slane %v3189_v23, %v7408_v31  ;;  %v3339_v24 = vsel %vm1377_vm5, %v3252_v54, %v3338_v61 }
 0xa25   :  { %v3340_v63 = vsel %vm1379_vm7, %v3261_v14, %v3339_v24 }
 0xa26   :  { %v3350_v42 = vsel %vm1390_vm8, %v3340_v63, -inf  ;;  %v3333_v19 = vsel %vm1230_vm15, %v3332_v8, %v3328_v48 }
 0xa27   :  { %3351 = vmax.xlane.f32.xlu1 %v3350_v42  ;;  %v3347_v12 = vsel %vm1379_vm7, %v3333_v19, %v3346_v57 }
 0xa28   :  { %v3353_v10 = vsel %vm1390_vm8, %v3347_v12, -inf }
 0xa29   :  { %3354 = vmax.xlane.f32.xlu0 %v3353_v10 }
 0xab4   :  { %v8293_v59 = vpop.xlane.xlu1 %3351 }
 0xab5   :  { %v3361_v11 = vrot.slane %v8293_v59, %v6943_v39  ;;  %v3365_v40 = vrot.slane %v8293_v59, %v6947_v45  ;;  %v3369_v30 = vrot.slane %v8293_v59, %v6951_v47  ;;  %v3373_v5 = vrot.slane %v8293_v59, %v6955_v49 }
 0xab7   :  { %v3438_v16 = vsub.f32 %v8215_v26, %v3361_v11  ;;  %v3439_v29 = vsub.f32 %v8099_v41, %v3361_v11  ;;  %v3441_v35 = vsub.f32 %v8103_v15, %v3365_v40  ;;  %v3440_v37 = vsub.f32 %v8106_v53, %v3365_v40  ;;  %v8307_v26 = vpop.xlane.xlu0 %3354 }
 0xab8   :  { %v3443_v2 = vsub.f32 %v8111_v9, %v3369_v30  ;;  %v3442_v33 = vsub.f32 %v8114_v3, %v3369_v30  ;;  %v3393_v20 = vrot.slane %v8307_v26, %v6943_v39  ;;  %v3397_v53 = vrot.slane %v8307_v26, %v6947_v45 }
 0xab9   :  { %v3470_v58 = vmul.f32 1.442695, %v3438_v16  ;;  %v3472_v21 = vmul.f32 1.442695, %v3439_v29  ;;  %v3476_v6 = vmul.f32 1.442695, %v3441_v35  ;;  %v3444_v62 = vsub.f32 %v8138_v17, %v3373_v5 }
 0xaba   :  { %v3474_v0 = vmul.f32 1.442695, %v3440_v37  ;;  %v3480_v41 = vmul.f32 1.442695, %v3443_v2  ;;  %v3478_v15 = vmul.f32 1.442695, %v3442_v33  ;;  %v3454_v9 = vsub.f32 %v8122_v36, %v3393_v20 }
 0xabb   :  { %6611 = vpow2.f32 %v3470_v58  ;;  %v3455_v3 = vsub.f32 %v8119_v18, %v3393_v20  ;;  %v3456_v44 = vsub.f32 %v8130_v22, %v3397_v53  ;;  %v3457_v1 = vsub.f32 %v8127_v27, %v3397_v53  ;;  %v9816_v16 = vld [vmem:[#allocation44_spill] sm:$0xff]  ;;  %v9817_v35 = vld [vmem:[#allocation53_spill] sm:$0xff]  ;;  %v9818_v2 = vld [vmem:[#allocation7_spill] sm:$0xff] }
 0xabc   :  { %6613 = vpow2.f32 %v3472_v21  ;;  %v3502_v34 = vmul.f32 1.442695, %v3454_v9  ;;  %v3401_v54 = vrot.slane %v8307_v26, %v6951_v47  ;;  %v3445_v22 = vsub.f32 %v8135_v43, %v3373_v5  ;;  %v9821_v5 = vld [vmem:[#allocation43_spill] sm:$0xff] }
 0xabd   :  { %6615 = vpow2.f32 %v3476_v6  ;;  %v3504_v36 = vmul.f32 1.442695, %v3455_v3  ;;  %v3506_v7 = vmul.f32 1.442695, %v3456_v44  ;;  %v3508_v27 = vmul.f32 1.442695, %v3457_v1 }
 0xabe   :  { %6617 = vpow2.f32 %v3474_v0  ;;  %v3377_v17 = vrot.slane %v8293_v59, %v6959_v51  ;;  %v3482_v48 = vmul.f32 1.442695, %v3444_v62  ;;  %v3458_v8 = vsub.f32 %v8146_v38, %v3401_v54  ;;  %v9819_v0 = vld [vmem:[#allocation42_spill] sm:$0xff] }
 0xabf   :  { %6619 = vpow2.f32 %v3480_v41  ;;  %v3484_v14 = vmul.f32 1.442695, %v3445_v22  ;;  %v3459_v43 = vsub.f32 %v8143_v25, %v3401_v54  ;;  %v3405_v63 = vrot.slane %v8307_v26, %v6955_v49 }
 0xac0   :  { %6621 = vpow2.f32 %v3478_v15  ;;  %v3446_v24 = vsub.f32 %v8154_v50, %v3377_v17  ;;  %v3510_v28 = vmul.f32 1.442695, %v3458_v8  ;;  %v3447_v42 = vsub.f32 %v8151_v4, %v3377_v17  ;;  %v9820_v15 = vld [vmem:[#allocation46_spill] sm:$0xff]  ;;  %v9824_v8 = vld [vmem:[#allocation45_spill] sm:$0xff] }
 0xac1   :  { %6623 = vpow2.f32 %v3502_v34  ;;  %v3512_v19 = vmul.f32 1.442695, %v3459_v43  ;;  %v3381_v25 = vrot.slane %v8293_v59, %v6966_v55  ;;  %v3460_v50 = vsub.f32 %v8162_v56, %v3405_v63 }
 0xac2   :  { %6625 = vpow2.f32 %v3504_v36  ;;  %v3486_v12 = vmul.f32 1.442695, %v3446_v24  ;;  %v3488_v10 = vmul.f32 1.442695, %v3447_v42  ;;  %v3461_v4 = vsub.f32 %v8159_v32, %v3405_v63  ;;  %v9822_v36 = vld [vmem:[#allocation48_spill] sm:$0xff]  ;;  %v9825_v24 = vld [vmem:[#allocation49_spill] sm:$0xff] }
 0xac3   :  { %6627 = vpow2.f32 %v3506_v7  ;;  %v3448_v29 = vsub.f32 %v9816_v16, %v3381_v25  ;;  %v3409_v30 = vrot.slane %v8307_v26, %v6959_v51  ;;  %v3514_v56 = vmul.f32 1.442695, %v3460_v50  ;;  %v9827_v50 = vld [vmem:[#allocation50_spill] sm:$0xff] }
 0xac4   :  { %6629 = vpow2.f32 %v3508_v27  ;;  %v3449_v37 = vsub.f32 %v9817_v35, %v3381_v25  ;;  %v3516_v32 = vmul.f32 1.442695, %v3461_v4  ;;  %v3385_v6 = vrot.slane %v8293_v59, %v9818_v2  ;;  %v9823_v27 = vld [vmem:[#allocation8_spill] sm:$0xff]  ;;  %v9828_v35 = vld [vmem:[#allocation51_spill] sm:$0xff] }
 0xac5   :  { %v8315_v52 = vpop.eup %6611  ;;  %6631 = vpow2.f32 %v3482_v48  ;;  %v3490_v33 = vmul.f32 1.442695, %v3448_v29  ;;  %v3462_v41 = vsub.f32 %v9819_v0, %v3409_v30  ;;  %v3463_v53 = vsub.f32 %v9820_v15, %v3409_v30 }
 0xac6   :  { %v8317_v46 = vpop.eup %6613  ;;  %3567 = vperm.xlu0 %6541, %v8315_v52   ;;  %6633 = vpow2.f32 %v3484_v14  ;;  %v3492_v20 = vmul.f32 1.442695, %v3449_v37  ;;  %v3450_v44 = vsub.f32 %v9821_v5, %v3385_v6  ;;  %v3413_v34 = vrot.slane %v8307_v26, %v6966_v55 }
 0xac7   :  { %3570 = vperm.xlu1 %6542, %v8317_v46   ;;  %v8325_v60 = vpop.eup %6615  ;;  %6635 = vpow2.f32 %v3510_v28  ;;  %v3518_v1 = vmul.f32 1.442695, %v3462_v41  ;;  %v3451_v62 = vsub.f32 %v9822_v36, %v3385_v6  ;;  %v3520_v54 = vmul.f32 1.442695, %v3463_v53  ;;  %v9829_v6 = vld [vmem:[#allocation54_spill] sm:$0xff] }
 0xac8   :  { %v8327_v18 = vpop.eup %6617  ;;  %6637 = vpow2.f32 %v3512_v19  ;;  %v3389_v17 = vrot.slane %v8293_v59, %v9823_v27  ;;  %v3494_v48 = vmul.f32 1.442695, %v3450_v44  ;;  %v3464_v14 = vsub.f32 %v9824_v8, %v3413_v34  ;;  %v9826_v19 = vld [vmem:[#allocation47_spill] sm:$0xff] }
 0xac9   :  { %v8335_v23 = vpop.eup %6619  ;;  %6639 = vpow2.f32 %v3486_v12  ;;  %v3496_v43 = vmul.f32 1.442695, %v3451_v62  ;;  %v3465_v63 = vsub.f32 %v9825_v24, %v3413_v34  ;;  %v3417_v59 = vrot.slane %v8307_v26, %v9818_v2 }
 0xaca   :  { %3576 = vperm.xlu0 %6541, %v8325_v60   ;;  %v8337_v61 = vpop.eup %6621  ;;  %6641 = vpow2.f32 %v3488_v10  ;;  %v3452_v25 = vsub.f32 %v9826_v19, %v3389_v17  ;;  %v3522_v12 = vmul.f32 1.442695, %v3464_v14  ;;  %v3453_v10 = vsub.f32 %v9827_v50, %v3389_v17 }
 0xacb   :  { %3573 = vperm.xlu1 %6542, %v8327_v18   ;;  %v8349_v57 = vpop.eup %6623  ;;  %6643 = vpow2.f32 %v3514_v56  ;;  %v3524_v4 = vmul.f32 1.442695, %v3465_v63  ;;  %v3421_v56 = vrot.slane %v8307_v26, %v9823_v27  ;;  %v3466_v37 = vsub.f32 %v9828_v35, %v3417_v59  ;;  %v9832_v26 = vld [vmem:[#allocation55_spill] sm:$0xff] }
 0xacc   :  { %v8351_v38 = vpop.eup %6625  ;;  %6645 = vpow2.f32 %v3516_v32  ;;  %v3498_v30 = vmul.f32 1.442695, %v3452_v25  ;;  %v3500_v32 = vmul.f32 1.442695, %v3453_v10 }
 0xacd   :  { %v8359_v11 = vpop.eup %6627  ;;  %6647 = vpow2.f32 %v3490_v33  ;;  %v3467_v33 = vsub.f32 %v9829_v6, %v3417_v59  ;;  %v3526_v53 = vmul.f32 1.442695, %v3466_v37  ;;  %v3469_v5 = vsub.f32 %v9832_v26, %v3421_v56 }
 0xace   :  { %3582 = vperm.xlu0 %6541, %v8335_v23   ;;  %v8361_v40 = vpop.eup %6629  ;;  %6649 = vpow2.f32 %v3492_v20  ;;  %v9831_v20 = vld [vmem:[#allocation52_spill] sm:$0xff] }
 0xacf   :  { %3579 = vperm.xlu1 %6542, %v8337_v61   ;;  %v8369_v58 = vpop.eup %6631  ;;  %6651 = vpow2.f32 %v3518_v1  ;;  %v3468_v15 = vsub.f32 %v9831_v20, %v3421_v56  ;;  %v3528_v44 = vmul.f32 1.442695, %v3467_v33  ;;  %v3532_v62 = vmul.f32 1.442695, %v3469_v5 }
 0xad0   :  { %v8371_v21 = vpop.eup %6633  ;;  %6653 = vpow2.f32 %v3520_v54 }
 0xad1   :  { %v8379_v9 = vpop.eup %6635  ;;  %6655 = vpow2.f32 %v3494_v48  ;;  %v3530_v36 = vmul.f32 1.442695, %v3468_v15 }
 0xad2   :  { %3618 = vperm.xlu0 %6541, %v8351_v38   ;;  %v8381_v3 = vpop.eup %6637  ;;  %6657 = vpow2.f32 %v3496_v43 }
 0xad3   :  { %3615 = vperm.xlu1 %6542, %v8349_v57   ;;  %v8389_v7 = vpop.eup %6639  ;;  %6659 = vpow2.f32 %v3522_v12 }
 0xad4   :  { %v8391_v22 = vpop.eup %6641  ;;  %6661 = vpow2.f32 %v3524_v4 }
 0xad5   :  { %v8399_v28 = vpop.eup %6643  ;;  %6663 = vpow2.f32 %v3498_v30 }
 0xad6   :  { %3624 = vperm.xlu0 %6541, %v8361_v40   ;;  %v8401_v42 = vpop.eup %6645  ;;  %6665 = vpow2.f32 %v3500_v32 }
 0xad7   :  { %3621 = vperm.xlu1 %6542, %v8359_v11   ;;  %v8409_v16 = vpop.eup %6647  ;;  %6667 = vpow2.f32 %v3526_v53 }
 0xad8   :  { %v8411_v29 = vpop.eup %6649  ;;  %6669 = vpow2.f32 %v3528_v44 }
 0xad9   :  { %v8419_v0 = vpop.eup %6651  ;;  %6671 = vpow2.f32 %v3530_v36 }
 0xada   :  { %3588 = vperm.xlu0 %6541, %v8371_v21   ;;  %9830 = vst [vmem:[#allocation44_spill] sm:$0xff] %v8419_v0  ;;  %v8421_v41 = vpop.eup %6653  ;;  %6673 = vpow2.f32 %v3532_v62 }
 0xadb   :  { %3585 = vperm.xlu1 %6542, %v8369_v58   ;;  %v8427_v34 = vpop.eup %6655 }
 0xadc   :  { %9833 = vst [vmem:[#allocation53_spill] sm:$0xff] %v8427_v34  ;;  %v8429_v1 = vpop.eup %6657 }
 0xadd   :  { %9834 = vst [vmem:[#allocation42_spill] sm:$0xff] %v8429_v1  ;;  %v8433_v54 = vpop.eup %6659 }
 0xade   :  { %3630 = vperm.xlu0 %6541, %v8381_v3   ;;  %9835 = vst [vmem:[#allocation46_spill] sm:$0xff] %v8433_v54  ;;  %v8435_v17 = vpop.eup %6661 }
 0xadf   :  { %3627 = vperm.xlu1 %6542, %v8379_v9   ;;  %9836 = vst [vmem:[#allocation43_spill] sm:$0xff] %v8435_v17  ;;  %v8439_v48 = vpop.eup %6663 }
 0xae0   :  { %9837 = vst [vmem:[#allocation48_spill] sm:$0xff] %v8439_v48  ;;  %v8441_v8 = vpop.eup %6665 }
 0xae1   :  { %9838 = vst [vmem:[#allocation45_spill] sm:$0xff] %v8441_v8  ;;  %v8445_v14 = vpop.eup %6667 }
 0xae2   :  { %3594 = vperm.xlu0 %6541, %v8391_v22   ;;  %9839 = vst [vmem:[#allocation49_spill] sm:$0xff] %v8445_v14  ;;  %v8447_v43 = vpop.eup %6669 }
 0xae3   :  { %3591 = vperm.xlu1 %6542, %v8389_v7   ;;  %9840 = vst [vmem:[#allocation47_spill] sm:$0xff] %v8447_v43  ;;  %v8451_v24 = vpop.eup %6671 }
 0xae4   :  { %9841 = vst [vmem:[#allocation50_spill] sm:$0xff] %v8451_v24  ;;  %v8453_v63 = vpop.eup %6673 }
 0xae5   :  { %9842 = vst [vmem:[#allocation51_spill] sm:$0xff] %v8453_v63 }
 0xae6   :  { %3636 = vperm.xlu0 %6541, %v8401_v42  }
 0xae7   :  { %3633 = vperm.xlu1 %6542, %v8399_v28  }
 0xaea   :  { %3600 = vperm.xlu0 %6541, %v8411_v29  }
 0xaeb   :  { %3597 = vperm.xlu1 %6542, %v8409_v16  }
 0xaee   :  { %3642 = vperm.xlu0 %6541, %v8421_v41  }
 0xaef   :  { %3639 = vperm.xlu1 %6542, %v8419_v0  }
 0xaf2   :  { %3606 = vperm.xlu0 %6541, %v8429_v1  }
 0xaf3   :  { %3603 = vperm.xlu1 %6542, %v8427_v34  }
 0xaf6   :  { %3648 = vperm.xlu0 %6541, %v8435_v17  }
 0xaf7   :  { %3645 = vperm.xlu1 %6542, %v8433_v54  }
 0xafa   :  { %3612 = vperm.xlu0 %6541, %v8441_v8  }
 0xafb   :  { %3609 = vperm.xlu1 %6542, %v8439_v48  }
 0xafe   :  { %3654 = vperm.xlu0 %6541, %v8447_v43  }
 0xaff   :  { %3651 = vperm.xlu1 %6542, %v8445_v14  }
 0xb02   :  { %3660 = vperm.xlu0 %6541, %v8453_v63  }
 0xb03   :  { %3657 = vperm.xlu1 %6542, %v8451_v24  }
 0xb45   :  { %v3568_v19 = vpop.permute.xlu0 %3567 }
 0xb46   :  { %v3571_v25 = vpop.permute.xlu1 %3570  ;;  %v3665_v27 = vrot.slane %v3568_v19, %v7405_v13 }
 0xb47   :  { %v3669_v8 = vrot.slane %v3571_v25, %v7408_v31 }
 0xb49   :  { %v3577_v12 = vpop.permute.xlu0 %3576  ;;  %v3670_v19 = vsel %vm1230_vm15, %v3669_v8, %v3665_v27 }
 0xb4a   :  { %v3574_v59 = vpop.permute.xlu1 %3573  ;;  %v3678_v63 = vrot.slane %v3577_v12, %v7408_v31 }
 0xb4b   :  { %v3674_v24 = vrot.slane %v3574_v59, %v7405_v13 }
 0xb4d   :  { %v3583_v10 = vpop.permute.xlu0 %3582  ;;  %v3679_v1 = vsel %vm1230_vm15, %v3678_v63, %v3674_v24 }
 0xb4e   :  { %v3580_v50 = vpop.permute.xlu1 %3579  ;;  %v3687_v43 = vrot.slane %v3583_v10, %v7408_v31  ;;  %v3806_v63 = vsel %vm1367_vm1, %v3679_v1, %v3670_v19 }
 0xb4f   :  { %v3683_v14 = vrot.slane %v3580_v50, %v7405_v13 }
 0xb51   :  { %v8459_v30 = vpop.permute.xlu0 %3618  ;;  %v3688_v50 = vsel %vm1230_vm15, %v3687_v43, %v3683_v14 }
 0xb52   :  { %v8457_v4 = vpop.permute.xlu1 %3615 }
 0xb53   :  { %v3737_v27 = vrot.slane %v8457_v4, %v7405_v13 }
 0xb55   :  { %v3625_v35 = vpop.permute.xlu0 %3624 }
 0xb56   :  { %v3622_v56 = vpop.permute.xlu1 %3621  ;;  %v3750_v43 = vrot.slane %v3625_v35, %v7408_v31 }
 0xb57   :  { %v3746_v14 = vrot.slane %v3622_v56, %v7405_v13 }
 0xb59   :  { %v3589_v32 = vpop.permute.xlu0 %3588 }
 0xb5a   :  { %v3586_v37 = vpop.permute.xlu1 %3585  ;;  %v3696_v17 = vrot.slane %v3589_v32, %v7408_v31 }
 0xb5b   :  { %v3692_v54 = vrot.slane %v3586_v37, %v7405_v13 }
 0xb5d   :  { %v3631_v33 = vpop.permute.xlu0 %3630  ;;  %v3697_v37 = vsel %vm1230_vm15, %v3696_v17, %v3692_v54  ;;  %v3741_v54 = vrot.slane %v8459_v30, %v7408_v31 }
 0xb5e   :  { %v3628_v6 = vpop.permute.xlu1 %3627  ;;  %v3759_v8 = vrot.slane %v3631_v33, %v7408_v31 }
 0xb5f   :  { %v3755_v1 = vrot.slane %v3628_v6, %v7405_v13 }
 0xb61   :  { %v3595_v15 = vpop.permute.xlu0 %3594  ;;  %v3760_v19 = vsel %vm1230_vm15, %v3759_v8, %v3755_v1 }
 0xb62   :  { %v3592_v20 = vpop.permute.xlu1 %3591  ;;  %v3705_v12 = vrot.slane %v3595_v15, %v7408_v31 }
 0xb63   :  { %v3701_v59 = vrot.slane %v3592_v20, %v7405_v13  ;;  %v3807_v20 = vsel %vm1369_vm2, %v3688_v50, %v3806_v63 }
 0xb64   :  { %v3808_v17 = vsel %vm1371_vm3, %v3697_v37, %v3807_v20 }
 0xb65   :  { %v3637_v26 = vpop.permute.xlu0 %3636  ;;  %v3706_v15 = vsel %vm1230_vm15, %v3705_v12, %v3701_v59 }
 0xb66   :  { %v8461_v53 = vpop.permute.xlu1 %3633  ;;  %v3768_v30 = vrot.slane %v3637_v26, %v7408_v31 }
 0xb67   :  { %v3764_v4 = vrot.slane %v8461_v53, %v7405_v13 }
 0xb69   :  { %v3601_v44 = vpop.permute.xlu0 %3600  ;;  %v3769_v63 = vsel %vm1230_vm15, %v3768_v30, %v3764_v4 }
 0xb6a   :  { %v3598_v5 = vpop.permute.xlu1 %3597  ;;  %v3714_v2 = vrot.slane %v3601_v44, %v7408_v31  ;;  %v3809_v44 = vsel %vm1373_vm4, %v3706_v15, %v3808_v17 }
 0xb6b   :  { %v3710_v10 = vrot.slane %v3598_v5, %v7405_v13 }
 0xb6d   :  { %v3643_v62 = vpop.permute.xlu0 %3642 }
 0xb6e   :  { %v8463_v36 = vpop.permute.xlu1 %3639  ;;  %v3777_v33 = vrot.slane %v3643_v62, %v7408_v31  ;;  %v3742_v62 = vsel %vm1230_vm15, %v3741_v54, %v3737_v27 }
 0xb6f   :  { %v3773_v6 = vrot.slane %v8463_v36, %v7405_v13 }
 0xb71   :  { %v3607_v34 = vpop.permute.xlu0 %3606 }
 0xb72   :  { %v3604_v48 = vpop.permute.xlu1 %3603  ;;  %v3723_v0 = vrot.slane %v3607_v34, %v7408_v31  ;;  %v3715_v34 = vsel %vm1230_vm15, %v3714_v2, %v3710_v10  ;;  %v3751_v2 = vsel %vm1230_vm15, %v3750_v43, %v3746_v14  ;;  %v3778_v14 = vsel %vm1230_vm15, %v3777_v33, %v3773_v6 }
 0xb73   :  { %v3719_v32 = vrot.slane %v3604_v48, %v7405_v13  ;;  %v3813_v20 = vsel %vm1367_vm1, %v3751_v2, %v3742_v62 }
 0xb74   :  { %v3814_v43 = vsel %vm1369_vm2, %v3760_v19, %v3813_v20 }
 0xb75   :  { %v3649_v24 = vpop.permute.xlu0 %3648  ;;  %v3724_v56 = vsel %vm1230_vm15, %v3723_v0, %v3719_v32  ;;  %v3810_v0 = vsel %vm1375_vm6, %v3715_v34, %v3809_v44  ;;  %v3815_v34 = vsel %vm1371_vm3, %v3769_v63, %v3814_v43  ;;  %v9844_v43 = vld [vmem:[#allocation7_spill] sm:$0xff] }
 0xb76   :  { %v3646_v25 = vpop.permute.xlu1 %3645  ;;  %v3786_v50 = vrot.slane %v3649_v24, %v7408_v31  ;;  %v3811_v26 = vsel %vm1377_vm5, %v3724_v56, %v3810_v0  ;;  %v3816_v1 = vsel %vm1373_vm4, %v3778_v14, %v3815_v34  ;;  %v9843_v14 = vld [vmem:[#allocation44_spill] sm:$0xff]  ;;  %v9846_v34 = vld [vmem:[#allocation53_spill] sm:$0xff] }
 0xb77   :  { %v3782_v12 = vrot.slane %v3646_v25, %v7405_v13 }
 0xb79   :  { %v3613_v5 = vpop.permute.xlu0 %3612  ;;  %v3787_v15 = vsel %vm1230_vm15, %v3786_v50, %v3782_v12 }
 0xb7a   :  { %v3610_v48 = vpop.permute.xlu1 %3609  ;;  %v3732_v59 = vrot.slane %v3613_v5, %v7408_v31  ;;  %v3817_v56 = vsel %vm1375_vm6, %v3787_v15, %v3816_v1  ;;  %v9845_v15 = vld [vmem:[#allocation42_spill] sm:$0xff]  ;;  %v9849_v1 = vld [vmem:[#allocation8_spill] sm:$0xff] }
 0xb7b   :  { %v3728_v35 = vrot.slane %v3610_v48, %v7405_v13 }
 0xb7d   :  { %v3733_v53 = vsel %vm1230_vm15, %v3732_v59, %v3728_v35  ;;  %v3655_v32 = vpop.permute.xlu0 %3654 }
 0xb7e   :  { %v3652_v10 = vpop.permute.xlu1 %3651  ;;  %v3812_v36 = vsel %vm1379_vm7, %v3733_v53, %v3811_v26  ;;  %v3795_v25 = vrot.slane %v3655_v32, %v7408_v31 }
 0xb7f   :  { %v3791_v37 = vrot.slane %v3652_v10, %v7405_v13  ;;  %v3822_v24 = vsel %vm1390_vm8, %v3812_v36, 0.0 }
 0xb80   :  { %3823 = vadd.xlane.f32.xlu1 %v3822_v24 }
 0xb81   :  { %v3796_v27 = vsel %vm1230_vm15, %v3795_v25, %v3791_v37  ;;  %v3661_v48 = vpop.permute.xlu0 %3660 }
 0xb82   :  { %v3658_v17 = vpop.permute.xlu1 %3657  ;;  %v3804_v8 = vrot.slane %v3661_v48, %v7408_v31  ;;  %v3818_v5 = vsel %vm1377_vm5, %v3796_v27, %v3817_v56  ;;  %v9847_v27 = vld [vmem:[#allocation43_spill] sm:$0xff]  ;;  %v9848_v48 = vld [vmem:[#allocation46_spill] sm:$0xff]  ;;  %v9850_v56 = vld [vmem:[#allocation45_spill] sm:$0xff] }
 0xb83   :  { %v3800_v54 = vrot.slane %v3658_v17, %v7405_v13 }
 0xb85   :  { %v3805_v35 = vsel %vm1230_vm15, %v3804_v8, %v3800_v54 }
 0xb86   :  { %v3819_v44 = vsel %vm1379_vm7, %v3805_v35, %v3818_v5  ;;  %v9851_v5 = vld [vmem:[#allocation48_spill] sm:$0xff] }
 0xb87   :  { %v3825_v4 = vsel %vm1390_vm8, %v3819_v44, 0.0 }
 0xb88   :  { %3826 = vadd.xlane.f32.xlu0 %v3825_v4 }
 0xc0d   :  { %v3824_v30 = vpop.xlane.xlu1 %3823 }
 0xc0e   :  { %6675 = vrcp.f32 %v3824_v30  ;;  %v9852_v30 = vld [vmem:[#allocation47_spill] sm:$0xff] }
 0xc15   :  { %v3827_v59 = vpop.xlane.xlu0 %3826 }
 0xc16   :  { %6677 = vrcp.f32 %v3827_v59 }
 0xc18   :  { %v8533_v2 = vpop.eup %6675 }
 0xc19   :  { %v3835_v6 = vrot.slane %v8533_v2, %v6943_v39  ;;  %v3839_v12 = vrot.slane %v8533_v2, %v6947_v45  ;;  %v3843_v53 = vrot.slane %v8533_v2, %v6951_v47  ;;  %v3863_v8 = vrot.slane %v8533_v2, %v9849_v1 }
 0xc1b   :  { %v3913_v33 = vmul.f32 %v8317_v46, %v3835_v6  ;;  %v3912_v0 = vmul.f32 %v8315_v52, %v3835_v6  ;;  %v3914_v50 = vmul.f32 %v8327_v18, %v3839_v12  ;;  %v3915_v10 = vmul.f32 %v8325_v60, %v3839_v12  ;;  %v9853_v6 = vld [vmem:[#allocation49_spill] sm:$0xff] }
 0xc1c   :  { %v3916_v46 = vmul.f32 %v8337_v61, %v3843_v53  ;;  %v3917_v52 = vmul.f32 %v8335_v23, %v3843_v53  ;;  %v3847_v23 = vrot.slane %v8533_v2, %v6955_v49  ;;  %v3927_v35 = vmul.f32 %v9850_v56, %v3863_v8  ;;  %v4318_v53 = vld [vmem:[%s9522_s10] sm:$0xff] }
 0xc1d   :  { %3987 = vperm.xlu1 %6542, %v3913_v33   ;;  %3984 = vperm.xlu0 %6541, %v3912_v0   ;;  %v3926_v44 = vmul.f32 %v9851_v5, %v3863_v8 }
 0xc1e   :  { %v3919_v36 = vmul.f32 %v8371_v21, %v3847_v23 }
 0xc20   :  { %v8545_v26 = vpop.eup %6677 }
 0xc21   :  { %3990 = vperm.xlu1 %6542, %v3914_v50   ;;  %3993 = vperm.xlu0 %6541, %v3915_v10   ;;  %v3867_v19 = vrot.slane %v8545_v26, %v6943_v39  ;;  %v3871_v37 = vrot.slane %v8545_v26, %v6947_v45  ;;  %v3891_v4 = vrot.slane %v8545_v26, %v9844_v43  ;;  %v9855_v50 = vld [vmem:[#allocation50_spill] sm:$0xff] }
 0xc22   :  { %v3895_v0 = vrot.slane %v8545_v26, %v9849_v1 }
 0xc23   :  { %v3929_v18 = vmul.f32 %v8351_v38, %v3867_v19  ;;  %v3928_v60 = vmul.f32 %v8349_v57, %v3867_v19  ;;  %v3931_v32 = vmul.f32 %v8361_v40, %v3871_v37  ;;  %v3930_v61 = vmul.f32 %v8359_v11, %v3871_v37 }
 0xc24   :  { %v3918_v38 = vmul.f32 %v8369_v58, %v3847_v23  ;;  %v3875_v57 = vrot.slane %v8545_v26, %v6951_v47  ;;  %v3851_v11 = vrot.slane %v8533_v2, %v6959_v51  ;;  %v3879_v58 = vrot.slane %v8545_v26, %v6955_v49 }
 0xc25   :  { %3996 = vperm.xlu1 %6542, %v3916_v46   ;;  %3999 = vperm.xlu0 %6541, %v3917_v52   ;;  %v3941_v59 = vmul.f32 %v9852_v30, %v3891_v4  ;;  %v3940_v33 = vmul.f32 %v9853_v6, %v3891_v4  ;;  %v3942_v10 = vmul.f32 %v9855_v50, %v3895_v0  ;;  %v4319_v46 = vld [vmem:[%s9522_s10 + $0x8] sm:$0xff] }
 0xc26   :  { %v3933_v62 = vmul.f32 %v8381_v3, %v3875_v57  ;;  %v3932_v40 = vmul.f32 %v8379_v9, %v3875_v57  ;;  %v3921_v63 = vmul.f32 %v8391_v22, %v3851_v11  ;;  %v3920_v21 = vmul.f32 %v8389_v7, %v3851_v11 }
 0xc27   :  { %v3935_v25 = vmul.f32 %v8401_v42, %v3879_v58  ;;  %v3934_v3 = vmul.f32 %v8399_v28, %v3879_v58  ;;  %v3855_v9 = vrot.slane %v8533_v2, %v6966_v55  ;;  %v3883_v7 = vrot.slane %v8545_v26, %v6959_v51 }
 0xc28   :  { %v3859_v28 = vrot.slane %v8533_v2, %v9844_v43  ;;  %v9854_v2 = vld [vmem:[#allocation51_spill] sm:$0xff]  ;;  %v8607_v52 = vpack.c.bf16 %v4319_v46, %v4318_v53 }
 0xc29   :  { %4035 = vperm.xlu0 %6541, %v3929_v18   ;;  %4032 = vperm.xlu1 %6542, %v3928_v60   ;;  %v3923_v24 = vmul.f32 %v8411_v29, %v3855_v9  ;;  %v3922_v22 = vmul.f32 %v8409_v16, %v3855_v9  ;;  %v3937_v20 = vmul.f32 %v8421_v41, %v3883_v7 }
 0xc2a   :  { %v3936_v42 = vmul.f32 %v9843_v14, %v3883_v7  ;;  %v3925_v17 = vmul.f32 %v9845_v15, %v3859_v28  ;;  %v3924_v29 = vmul.f32 %v9846_v34, %v3859_v28  ;;  %v3887_v16 = vrot.slane %v8545_v26, %v6966_v55  ;;  %6523 = vmatprep.subr.bf16.mxu0 %v8607_v52 }
 0xc2b   :  { %v3943_v12 = vmul.f32 %v9854_v2, %v3895_v0 }
 0xc2c   :  { %v3939_v54 = vmul.f32 %v9847_v27, %v3887_v16  ;;  %v3938_v41 = vmul.f32 %v9848_v48, %v3887_v16 }
 0xc2d   :  { %4041 = vperm.xlu0 %6541, %v3931_v32   ;;  %4038 = vperm.xlu1 %6542, %v3930_v61  }
 0xc31   :  { %4005 = vperm.xlu0 %6541, %v3919_v36   ;;  %4002 = vperm.xlu1 %6542, %v3918_v38  }
 0xc35   :  { %4047 = vperm.xlu0 %6541, %v3933_v62   ;;  %4044 = vperm.xlu1 %6542, %v3932_v40  }
 0xc39   :  { %4011 = vperm.xlu0 %6541, %v3921_v63   ;;  %4008 = vperm.xlu1 %6542, %v3920_v21  }
 0xc3d   :  { %4053 = vperm.xlu0 %6541, %v3935_v25   ;;  %4050 = vperm.xlu1 %6542, %v3934_v3  }
 0xc41   :  { %4017 = vperm.xlu0 %6541, %v3923_v24   ;;  %4014 = vperm.xlu1 %6542, %v3922_v22  }
 0xc45   :  { %4059 = vperm.xlu0 %6541, %v3937_v20   ;;  %4056 = vperm.xlu1 %6542, %v3936_v42  }
 0xc49   :  { %4023 = vperm.xlu0 %6541, %v3925_v17   ;;  %4020 = vperm.xlu1 %6542, %v3924_v29  }
 0xc4d   :  { %4065 = vperm.xlu0 %6541, %v3939_v54   ;;  %4062 = vperm.xlu1 %6542, %v3938_v41  }
 0xc51   :  { %4029 = vperm.xlu0 %6541, %v3927_v35   ;;  %4026 = vperm.xlu1 %6542, %v3926_v44  }
 0xc55   :  { %4071 = vperm.xlu0 %6541, %v3941_v59   ;;  %4068 = vperm.xlu1 %6542, %v3940_v33  }
 0xc59   :  { %4077 = vperm.xlu0 %6541, %v3943_v12   ;;  %4074 = vperm.xlu1 %6542, %v3942_v10  }
 0xc9c   :  { %v3988_v26 = vpop.permute.xlu1 %3987  ;;  %v3985_v19 = vpop.permute.xlu0 %3984 }
 0xc9d   :  { %v4086_v28 = vrot.slane %v3988_v26, %v7408_v31  ;;  %v4082_v15 = vrot.slane %v3985_v19, %v7405_v13 }
 0xc9f   :  { %v4087_v35 = vsel %vm1230_vm15, %v4086_v28, %v4082_v15 }
 0xca0   :  { %v3991_v18 = vpop.permute.xlu1 %3990  ;;  %v3994_v60 = vpop.permute.xlu0 %3993 }
 0xca1   :  { %v4091_v7 = vrot.slane %v3991_v18, %v7405_v13  ;;  %v4095_v20 = vrot.slane %v3994_v60, %v7408_v31 }
 0xca3   :  { %v4096_v48 = vsel %vm1230_vm15, %v4095_v20, %v4091_v7 }
 0xca4   :  { %v3997_v37 = vpop.permute.xlu1 %3996  ;;  %v4000_v32 = vpop.permute.xlu0 %3999  ;;  %v4223_v6 = vsel %vm1367_vm1, %v4096_v48, %v4087_v35 }
 0xca5   :  { %v4100_v14 = vrot.slane %v3997_v37, %v7405_v13  ;;  %v4104_v42 = vrot.slane %v4000_v32, %v7408_v31 }
 0xca7   :  { %v4105_v41 = vsel %vm1230_vm15, %v4104_v42, %v4100_v14 }
 0xca8   :  { %v8610_v61 = vpop.permute.xlu1 %4032  ;;  %v8612_v23 = vpop.permute.xlu0 %4035  ;;  %v4224_v0 = vsel %vm1369_vm2, %v4105_v41, %v4223_v6  ;;  %v6333_v6 = vld [vmem:[%s9524_s12] ss:$0 sm:$0xff]  ;;  %s6777_s12 = smov [#allocation2]  }
 0xca9   :  { %v4154_v50 = vrot.slane %v8610_v61, %v7405_v13  ;;  %v4158_v10 = vrot.slane %v8612_v23, %v7408_v31  ;;  %4730 = vrot.lane.b32.xlu1 %v6333_v6, %s6772_s21 }
 0xcac   :  { %v4039_v36 = vpop.permute.xlu1 %4038  ;;  %v4042_v38 = vpop.permute.xlu0 %4041 }
 0xcad   :  { %v4163_v2 = vrot.slane %v4039_v36, %v7405_v13  ;;  %v4167_v12 = vrot.slane %v4042_v38, %v7408_v31 }
 0xcb0   :  { %v4003_v57 = vpop.permute.xlu1 %4002  ;;  %v4006_v62 = vpop.permute.xlu0 %4005 }
 0xcb1   :  { %v4109_v17 = vrot.slane %v4003_v57, %v7405_v13  ;;  %v4113_v34 = vrot.slane %v4006_v62, %v7408_v31  ;;  %v4168_v57 = vsel %vm1230_vm15, %v4167_v12, %v4163_v2 }
 0xcb3   :  { %v4114_v5 = vsel %vm1230_vm15, %v4113_v34, %v4109_v17 }
 0xcb4   :  { %v4045_v40 = vpop.permute.xlu1 %4044  ;;  %v4048_v11 = vpop.permute.xlu0 %4047  ;;  %v4225_v53 = vsel %vm1371_vm3, %v4114_v5, %v4224_v0 }
 0xcb5   :  { %v4172_v26 = vrot.slane %v4045_v40, %v7405_v13  ;;  %v4176_v19 = vrot.slane %v4048_v11, %v7408_v31 }
 0xcb8   :  { %v4009_v63 = vpop.permute.xlu1 %4008  ;;  %v4012_v21 = vpop.permute.xlu0 %4011 }
 0xcb9   :  { %v4118_v27 = vrot.slane %v4009_v63, %v7405_v13  ;;  %v4122_v54 = vrot.slane %v4012_v21, %v7408_v31 }
 0xcbb   :  { %v4123_v33 = vsel %vm1230_vm15, %v4122_v54, %v4118_v27 }
 0xcbc   :  { %v4051_v58 = vpop.permute.xlu1 %4050  ;;  %v4054_v25 = vpop.permute.xlu0 %4053  ;;  %v4226_v18 = vsel %vm1373_vm4, %v4123_v33, %v4225_v53  ;;  %v6330_v53 = vld [vmem:[%s9523_s11] ss:$0 sm:$0xff] }
 0xcbd   :  { %v4181_v36 = vrot.slane %v4051_v58, %v7405_v13  ;;  %v4185_v61 = vrot.slane %v4054_v25, %v7408_v31 }
 0xcc0   :  { %v4015_v3 = vpop.permute.xlu1 %4014  ;;  %v4018_v9 = vpop.permute.xlu0 %4017 }
 0xcc1   :  { %v4127_v8 = vrot.slane %v4015_v3, %v7405_v13  ;;  %v4131_v56 = vrot.slane %v4018_v9, %v7408_v31  ;;  %v4177_v3 = vsel %vm1230_vm15, %v4176_v19, %v4172_v26 }
 0xcc3   :  { %v4132_v46 = vsel %vm1230_vm15, %v4131_v56, %v4127_v8 }
 0xcc4   :  { %v8614_v24 = vpop.permute.xlu1 %4056  ;;  %v4060_v22 = vpop.permute.xlu0 %4059  ;;  %v4227_v11 = vsel %vm1375_vm6, %v4132_v46, %v4226_v18 }
 0xcc5   :  { %v4190_v62 = vrot.slane %v8614_v24, %v7405_v13  ;;  %v4194_v40 = vrot.slane %v4060_v22, %v7408_v31  ;;  %v4159_v24 = vsel %vm1230_vm15, %v4158_v10, %v4154_v50  ;;  %v4186_v22 = vsel %vm1230_vm15, %v4185_v61, %v4181_v36 }
 0xcc6   :  { %v4230_v28 = vsel %vm1367_vm1, %v4168_v57, %v4159_v24 }
 0xcc7   :  { %v4195_v15 = vsel %vm1230_vm15, %v4194_v40, %v4190_v62  ;;  %v4231_v17 = vsel %vm1369_vm2, %v4177_v3, %v4230_v28 }
 0xcc8   :  { %v4021_v29 = vpop.permute.xlu1 %4020  ;;  %v4024_v16 = vpop.permute.xlu0 %4023 }
 0xcc9   :  { %v4136_v44 = vrot.slane %v4021_v29, %v7405_v13  ;;  %v4140_v4 = vrot.slane %v4024_v16, %v7408_v31  ;;  %v4232_v29 = vsel %vm1371_vm3, %v4186_v22, %v4231_v17 }
 0xcca   :  { %v4233_v48 = vsel %vm1373_vm4, %v4195_v15, %v4232_v29 }
 0xccb   :  { %v4141_v60 = vsel %vm1230_vm15, %v4140_v4, %v4136_v44  ;;  %v4320_v4 = vld [vmem:[%s9522_s10 + $0x10] sm:$0xff] }
 0xccc   :  { %v4063_v30 = vpop.permute.xlu1 %4062  ;;  %v4066_v59 = vpop.permute.xlu0 %4065  ;;  %v4228_v25 = vsel %vm1377_vm5, %v4141_v60, %v4227_v11 }
 0xccd   :  { %v4199_v63 = vrot.slane %v4063_v30, %v7405_v13  ;;  %v4203_v21 = vrot.slane %v4066_v59, %v7408_v31  ;;  %v4321_v30 = vld [vmem:[%s9522_s10 + $0x18] sm:$0xff] }
 0xcce   :  { %v6526_v59 = vpack.c.bf16 %v4321_v30, %v4320_v4 }
 0xccf   :  { %v4204_v34 = vsel %vm1230_vm15, %v4203_v21, %v4199_v63 }
 0xcd0   :  { %v4027_v37 = vpop.permute.xlu1 %4026  ;;  %v4030_v32 = vpop.permute.xlu0 %4029  ;;  %v4234_v56 = vsel %vm1375_vm6, %v4204_v34, %v4233_v48 }
 0xcd1   :  { %v4145_v23 = vrot.slane %v4027_v37, %v7405_v13  ;;  %v4149_v38 = vrot.slane %v4030_v32, %v7408_v31  ;;  %v9856_v37 = vld [vmem:[#allocation21_spill] sm:$0xff] }
 0xcd3   :  { %v4150_v58 = vsel %vm1230_vm15, %v4149_v38, %v4145_v23 }
 0xcd4   :  { %v4069_v9 = vpop.permute.xlu1 %4068  ;;  %v4072_v7 = vpop.permute.xlu0 %4071  ;;  %v4229_v20 = vsel %vm1379_vm7, %v4150_v58, %v4228_v25 }
 0xcd5   :  { %v4208_v14 = vrot.slane %v4069_v9, %v7405_v13  ;;  %v4212_v42 = vrot.slane %v4072_v7, %v7408_v31  ;;  %6447 = vmatprep.mubr.msk.f32.mxu0 %vm1390_vm8, %v4229_v20 }
 0xcd7   :  { %v4213_v16 = vsel %vm1230_vm15, %v4212_v42, %v4208_v14 }
 0xcd8   :  { %v4075_v27 = vpop.permute.xlu1 %4074  ;;  %v4078_v54 = vpop.permute.xlu0 %4077  ;;  %v4235_v5 = vsel %vm1377_vm5, %v4213_v16, %v4234_v56 }
 0xcd9   :  { %v4217_v41 = vrot.slane %v4075_v27, %v7405_v13  ;;  %v4221_v8 = vrot.slane %v4078_v54, %v7408_v31 }
 0xcdb   :  { %v4222_v35 = vsel %vm1230_vm15, %v4221_v8, %v4217_v41 }
 0xcdc   :  { %v4236_v44 = vsel %vm1379_vm7, %v4222_v35, %v4235_v5 }
 0xcdd   :  { %6448 = vmatmul.mubr.msk.f32.vlgmr.msra.gmra.mrb[6].mxu0 %vm1390_vm8, %v4236_v44 }
 0xcde   :  { %6525 = vmatpush3.bf16.msra.mxu0 %v8607_v52  ;;  %v6327_v52 = vld [vmem:[%s9521_s9] ss:$0 sm:$0xff] }
 0xcdf   :  { %6527 = vmatprep.subr.bf16.mxu0 %v6526_v59 }
 0xce2   :  { %6529 = vmatpush3.bf16.msra.mxu0 %v6526_v59 }
 0xd1b   :  { %v8716_v38 = vpop.permute.xlu1 %4730 }
 0xdb0   :  { %v6449_v33 = vpop.f32.mrb[6].mxu0 }
 0xdb1   :  { %v4313_v0 = vadd.f32 %v6449_v33, %v6327_v52  ;;  %v4307_v2 = vpop.f32.mrb[7].mxu0 }
 0xdb2   :  { %v4308_v12 = vadd.f32 %v6327_v52, %v4307_v2 }
 0xdb3   :  { %v4317_v10 = vmax.f32 %v4313_v0, 0.0 }
 0xdb4   :  { %v4316_v50 = vmax.f32 %v4308_v12, 0.0 }
 0xdb6   :  { %6458 = vmatprep.mubr.msk.f32.mxu0 %vm754_vm14, %v4316_v50 }
 0xdb7   :  { %6459 = vmatmul.mubr.msk.f32.vlgmr.msra.gmra.mrb[8].mxu0 %vm754_vm14, %v4317_v10 }
 0xe8a   :  { %v6460_v46 = vpop.f32.mrb[8].mxu0 }
 0xe8b   :  { %v8702_v26 = vadd.f32 %v6460_v46, %v6330_v53  ;;  %v4401_v19 = vpop.f32.mrb[9].mxu0 }
 0xe8c   :  { %v8704_v18 = vadd.f32 %v6330_v53, %v4401_v19 }
 0xe8d   :  { %4592 = vrot.lane.b32.xlu0 %v8702_v26, %s6772_s21  ;;  %v4468_v62 = vrot.slane %v8702_v26, %v9856_v37 }
 0xe8e   :  { %4590 = vrot.lane.b32.xlu1 %v8704_v18, %s6772_s21  ;;  %v6530_v60 = vpack.c.bf16 %v8702_v26, %v8704_v18  ;;  %v4419_v32 = vrot.slane %v8704_v18, %v9856_v37  ;;  %v4412_v30 = vcombine.high %v8704_v18, %v8704_v18 }
 0xe8f   :  { %v4476_v58 = vcombine.high %v4468_v62, %v4468_v62  ;;  %v4484_v25 = vrot.slane %v4468_v62, %v9856_v37 }
 0xe90   :  { %6531 = vmatprep.subr.bf16.mxu0 %v6530_v60  ;;  %v4427_v36 = vcombine.high %v4419_v32, %v4419_v32  ;;  %v4435_v61 = vrot.slane %v4419_v32, %v9856_v37  ;;  %v4426_v46 = vrot.slane %v4412_v30, %v9856_v37 }
 0xe91   :  { %6533 = vmatpush3.bf16.msra.mxu0 %v6530_v60  ;;  %v8735_v34 = vrot.slane %v4476_v58, %v9856_v37  ;;  %v4545_v29 = vrot.slane %v4484_v25, %v6943_v39  ;;  %v4506_v53 = vcombine.high %v4484_v25, %v4484_v25 }
 0xe92   :  { %v4449_v23 = vrot.slane %v4427_v36, %v9856_v37  ;;  %v4457_v57 = vcombine.high %v4435_v61, %v4435_v61  ;;  %v4513_v40 = vrot.slane %v4435_v61, %v6943_v39 }
 0xe93   :  { %v4549_v4 = vrot.slane %v8735_v34, %v6943_v39 }
 0xe94   :  { %v4517_v11 = vrot.slane %v4449_v23, %v6943_v39  ;;  %v4521_v63 = vrot.slane %v4457_v57, %v6943_v39  ;;  %v4459_v59 = vcombine.high %v4449_v23, %v4449_v23 }
 0xe96   :  { %v4525_v19 = vrot.slane %v4459_v59, %v6943_v39 }
 0xeff   :  { %v8723_v21 = vpop.permute.xlu0 %4592 }
 0xf00   :  { %v8726_v3 = vpop.permute.xlu1 %4590  ;;  %v4597_v9 = vadd.f32 %v8723_v21, %v4513_v40  ;;  %v4599_v7 = vadd.f32 %v8723_v21, %v4517_v11  ;;  %v4601_v22 = vadd.f32 %v8723_v21, %v4521_v63  ;;  %v4613_v56 = vadd.f32 %v8723_v21, %v4545_v29 }
 0xf01   :  { %v4596_v20 = vadd.f32 %v8726_v3, %v4513_v40  ;;  %v4598_v24 = vadd.f32 %v8726_v3, %v4517_v11  ;;  %v4600_v28 = vadd.f32 %v8726_v3, %v4521_v63  ;;  %v4612_v44 = vadd.f32 %v8726_v3, %v4545_v29 }
 0xf02   :  { %vm4629_vm11 = vcmp.gt.f32.partialorder %v4597_v9, 0.0  ;;  %v4661_v14 = vmul.f32 0.2, %v4597_v9  ;;  %v4663_v42 = vmul.f32 0.2, %v4599_v7  ;;  %vm4631_vm13 = vcmp.gt.f32.partialorder %v4599_v7, 0.0 }
 0xf03   :  { %vm4628_vm12 = vcmp.gt.f32.partialorder %v4596_v20, 0.0  ;;  %v4660_v15 = vmul.f32 0.2, %v4596_v20  ;;  %v4662_v17 = vmul.f32 0.2, %v4598_v24  ;;  %vm4630_vm9 = vcmp.gt.f32.partialorder %v4598_v24, 0.0 }
 0xf04   :  { %v4693_v16 = vsel %vm4629_vm11, %v4597_v9, %v4661_v14  ;;  %v4695_v41 = vsel %vm4631_vm13, %v4599_v7, %v4663_v42  ;;  %v4665_v8 = vmul.f32 0.2, %v4601_v22  ;;  %vm4633_vm10 = vcmp.gt.f32.partialorder %v4601_v22, 0.0 }
 0xf05   :  { %v4734_v27 = vmul.f32 %v8716_v38, %v4693_v16  ;;  %v4692_v54 = vsel %vm4628_vm12, %v4596_v20, %v4660_v15  ;;  %v4694_v35 = vsel %vm4630_vm9, %v4598_v24, %v4662_v17  ;;  %v4664_v5 = vmul.f32 0.2, %v4600_v28 }
 0xf06   :  { %v4733_v48 = vmul.f32 %v8716_v38, %v4692_v54  ;;  %vm4632_vm11 = vcmp.gt.f32.partialorder %v4600_v28, 0.0  ;;  %v4736_v6 = vmul.f32 %v8716_v38, %v4695_v41  ;;  %v4735_v52 = vmul.f32 %v8716_v38, %v4694_v35 }
 0xf07   :  { %4799 = vrot.lane.b32.xlu1 %v4734_v27, %s6775_s3  ;;  %v4697_v33 = vsel %vm4633_vm10, %v4601_v22, %v4665_v8  ;;  %v4677_v0 = vmul.f32 0.2, %v4613_v56  ;;  %v4615_v2 = vadd.f32 %v8723_v21, %v4549_v4  ;;  %v4696_v12 = vsel %vm4632_vm11, %v4600_v28, %v4664_v5 }
 0xf08   :  { %4797 = vrot.lane.b32.xlu0 %v4733_v48, %s6775_s3  ;;  %vm4645_vm12 = vcmp.gt.f32.partialorder %v4613_v56, 0.0  ;;  %v4676_v50 = vmul.f32 0.2, %v4612_v44  ;;  %v4614_v10 = vadd.f32 %v8726_v3, %v4549_v4  ;;  %vm4644_vm13 = vcmp.gt.f32.partialorder %v4612_v44, 0.0 }
 0xf09   :  { %v4738_v18 = vmul.f32 %v8716_v38, %v4697_v33  ;;  %v4737_v60 = vmul.f32 %v8716_v38, %v4696_v12  ;;  %v4709_v32 = vsel %vm4645_vm12, %v4613_v56, %v4677_v0  ;;  %v4679_v36 = vmul.f32 0.2, %v4615_v2 }
 0xf0a   :  { %v4603_v61 = vadd.f32 %v8723_v21, %v4525_v19  ;;  %v4708_v23 = vsel %vm4644_vm13, %v4612_v44, %v4676_v50  ;;  %vm4647_vm9 = vcmp.gt.f32.partialorder %v4615_v2, 0.0  ;;  %v4678_v57 = vmul.f32 0.2, %v4614_v10 }
 0xf0b   :  { %4803 = vrot.lane.b32.xlu1 %v4736_v6, %s6775_s3  ;;  %v4602_v62 = vadd.f32 %v8726_v3, %v4525_v19  ;;  %v4553_v40 = vrot.slane %v4506_v53, %v6943_v39  ;;  %v8763_v11 = vrot.slane %v4426_v46, %v9856_v37  ;;  %vm4646_vm10 = vcmp.gt.f32.partialorder %v4614_v10, 0.0 }
 0xf0c   :  { %4801 = vrot.lane.b32.xlu0 %v4735_v52, %s6775_s3  ;;  %v4461_v63 = vcombine.high %v8702_v26, %v8702_v26  ;;  %v4750_v58 = vmul.f32 %v8716_v38, %v4709_v32  ;;  %v4749_v25 = vmul.f32 %v8716_v38, %v4708_v23  ;;  %v4711_v9 = vsel %vm4647_vm9, %v4615_v2, %v4679_v36 }
 0xf0d   :  { %v4667_v7 = vmul.f32 0.2, %v4603_v61  ;;  %v4617_v20 = vadd.f32 %v8723_v21, %v4553_v40  ;;  %v4710_v24 = vsel %vm4646_vm10, %v4614_v10, %v4678_v57  ;;  %vm4635_vm11 = vcmp.gt.f32.partialorder %v4603_v61, 0.0 }
 0xf0e   :  { %v4666_v22 = vmul.f32 0.2, %v4602_v62  ;;  %v4616_v14 = vadd.f32 %v8726_v3, %v4553_v40  ;;  %v4508_v42 = vcombine.high %v8735_v34, %v8735_v34  ;;  %v4428_v28 = vcombine.high %v4426_v46, %v4426_v46 }
 0xf0f   :  { %4807 = vrot.lane.b32.xlu1 %v4738_v18, %s6775_s3  ;;  %v4529_v26 = vrot.slane %v8763_v11, %v6943_v39  ;;  %vm4634_vm12 = vcmp.gt.f32.partialorder %v4602_v62, 0.0  ;;  %v4752_v15 = vmul.f32 %v8716_v38, %v4711_v9  ;;  %v4751_v17 = vmul.f32 %v8716_v38, %v4710_v24 }
 0xf10   :  { %4805 = vrot.lane.b32.xlu0 %v4737_v60, %s6775_s3  ;;  %v4699_v29 = vsel %vm4635_vm11, %v4603_v61, %v4667_v7  ;;  %v4681_v16 = vmul.f32 0.2, %v4617_v20  ;;  %v4698_v54 = vsel %vm4634_vm12, %v4602_v62, %v4666_v22  ;;  %vm4649_vm13 = vcmp.gt.f32.partialorder %v4617_v20, 0.0 }
 0xf11   :  { %v4605_v27 = vadd.f32 %v8723_v21, %v4529_v26  ;;  %v4680_v34 = vmul.f32 0.2, %v4616_v14  ;;  %v4604_v48 = vadd.f32 %v8726_v3, %v4529_v26  ;;  %v4475_v41 = vrot.slane %v4461_v63, %v9856_v37 }
 0xf12   :  { %v8785_v8 = vrot.slane %v4428_v28, %v9856_v37  ;;  %vm4648_vm9 = vcmp.gt.f32.partialorder %v4616_v14, 0.0  ;;  %v4557_v56 = vrot.slane %v4508_v42, %v6943_v39  ;;  %v4740_v35 = vmul.f32 %v8716_v38, %v4699_v29 }
 0xf13   :  { %4831 = vrot.lane.b32.xlu1 %v4750_v58, %s6775_s3  ;;  %v4739_v5 = vmul.f32 %v8716_v38, %v4698_v54  ;;  %v4713_v44 = vsel %vm4649_vm13, %v4617_v20, %v4681_v16  ;;  %v4669_v4 = vmul.f32 0.2, %v4605_v27  ;;  %v4712_v59 = vsel %vm4648_vm9, %v4616_v14, %v4680_v34 }
 0xf14   :  { %4829 = vrot.lane.b32.xlu0 %v4749_v25, %s6775_s3  ;;  %v4619_v30 = vadd.f32 %v8723_v21, %v4557_v56  ;;  %vm4637_vm10 = vcmp.gt.f32.partialorder %v4605_v27, 0.0  ;;  %v4668_v6 = vmul.f32 0.2, %v4604_v48  ;;  %v4618_v52 = vadd.f32 %v8726_v3, %v4557_v56 }
 0xf15   :  { %v8795_v33 = vrot.slane %v4475_v41, %v9856_v37  ;;  %vm4636_vm11 = vcmp.gt.f32.partialorder %v4604_v48, 0.0  ;;  %v4533_v0 = vrot.slane %v8785_v8, %v6943_v39  ;;  %v4754_v2 = vmul.f32 %v8716_v38, %v4713_v44 }
 0xf16   :  { %v4753_v12 = vmul.f32 %v8716_v38, %v4712_v59  ;;  %v4701_v50 = vsel %vm4637_vm10, %v4605_v27, %v4669_v4  ;;  %v4683_v10 = vmul.f32 0.2, %v4619_v30  ;;  %v4700_v46 = vsel %vm4636_vm11, %v4604_v48, %v4668_v6 }
 0xf17   :  { %4835 = vrot.lane.b32.xlu1 %v4752_v15, %s6775_s3  ;;  %v4607_v53 = vadd.f32 %v8723_v21, %v4533_v0  ;;  %vm4651_vm12 = vcmp.gt.f32.partialorder %v4619_v30, 0.0  ;;  %v4682_v19 = vmul.f32 0.2, %v4618_v52  ;;  %v4606_v18 = vadd.f32 %v8726_v3, %v4533_v0 }
 0xf18   :  { %4833 = vrot.lane.b32.xlu0 %v4751_v17, %s6775_s3  ;;  %v4477_v60 = vcombine.high %v4475_v41, %v4475_v41  ;;  %v4561_v32 = vrot.slane %v8795_v33, %v6943_v39  ;;  %v4458_v36 = vcombine.high %v8763_v11, %v8763_v11  ;;  %vm4650_vm13 = vcmp.gt.f32.partialorder %v4618_v52, 0.0 }
 0xf19   :  { %v4742_v61 = vmul.f32 %v8716_v38, %v4701_v50  ;;  %v4741_v23 = vmul.f32 %v8716_v38, %v4700_v46  ;;  %v4715_v57 = vsel %vm4651_vm12, %v4619_v30, %v4683_v10  ;;  %v4671_v62 = vmul.f32 0.2, %v4607_v53 }
 0xf1a   :  { %v4621_v40 = vadd.f32 %v8723_v21, %v4561_v32  ;;  %v4714_v63 = vsel %vm4650_vm13, %v4618_v52, %v4682_v19  ;;  %vm4639_vm9 = vcmp.gt.f32.partialorder %v4607_v53, 0.0  ;;  %v4670_v58 = vmul.f32 0.2, %v4606_v18 }
 0xf1b   :  { %4811 = vrot.lane.b32.xlu1 %v4740_v35, %s6775_s3  ;;  %v4620_v25 = vadd.f32 %v8726_v3, %v4561_v32  ;;  %v4505_v11 = vrot.slane %v4477_v60, %v9856_v37  ;;  %vm4638_vm10 = vcmp.gt.f32.partialorder %v4606_v18, 0.0  ;;  %v4537_v9 = vrot.slane %v4458_v36, %v6943_v39 }
 0xf1c   :  { %4809 = vrot.lane.b32.xlu0 %v4739_v5, %s6775_s3  ;;  %v4756_v7 = vmul.f32 %v8716_v38, %v4715_v57  ;;  %v4755_v20 = vmul.f32 %v8716_v38, %v4714_v63  ;;  %v4703_v24 = vsel %vm4639_vm9, %v4607_v53, %v4671_v62  ;;  %v4685_v22 = vmul.f32 0.2, %v4621_v40 }
 0xf1d   :  { %v4609_v14 = vadd.f32 %v8723_v21, %v4537_v9  ;;  %v4702_v42 = vsel %vm4638_vm10, %v4606_v18, %v4670_v58  ;;  %vm4653_vm11 = vcmp.gt.f32.partialorder %v4621_v40, 0.0  ;;  %v4684_v28 = vmul.f32 0.2, %v4620_v25 }
 0xf1e   :  { %v4608_v37 = vadd.f32 %v8726_v3, %v4537_v9  ;;  %v4460_v26 = vcombine.high %v8785_v8, %v8785_v8  ;;  %vm4652_vm12 = vcmp.gt.f32.partialorder %v4620_v25, 0.0  ;;  %v4565_v15 = vrot.slane %v4505_v11, %v6943_v39 }
 0xf1f   :  { %4839 = vrot.lane.b32.xlu1 %v4754_v2, %s6775_s3  ;;  %v4744_v17 = vmul.f32 %v8716_v38, %v4703_v24  ;;  %v4743_v29 = vmul.f32 %v8716_v38, %v4702_v42  ;;  %v4717_v16 = vsel %vm4653_vm11, %v4621_v40, %v4685_v22  ;;  %v4673_v27 = vmul.f32 0.2, %v4609_v14 }
 0xf20   :  { %4837 = vrot.lane.b32.xlu0 %v4753_v12, %s6775_s3  ;;  %v4623_v54 = vadd.f32 %v8723_v21, %v4565_v15  ;;  %v4716_v34 = vsel %vm4652_vm12, %v4620_v25, %v4684_v28  ;;  %vm4641_vm13 = vcmp.gt.f32.partialorder %v4609_v14, 0.0  ;;  %v4672_v48 = vmul.f32 0.2, %v4608_v37 }
 0xf21   :  { %v4622_v41 = vadd.f32 %v8726_v3, %v4565_v15  ;;  %v4507_v8 = vcombine.high %v8795_v33, %v8795_v33  ;;  %vm4640_vm9 = vcmp.gt.f32.partialorder %v4608_v37, 0.0  ;;  %v4541_v56 = vrot.slane %v4460_v26, %v6943_v39 }
 0xf22   :  { %v4758_v35 = vmul.f32 %v8716_v38, %v4717_v16  ;;  %v4757_v5 = vmul.f32 %v8716_v38, %v4716_v34  ;;  %v4705_v44 = vsel %vm4641_vm13, %v4609_v14, %v4673_v27  ;;  %v4687_v4 = vmul.f32 0.2, %v4623_v54 }
 0xf23   :  { %4815 = vrot.lane.b32.xlu1 %v4742_v61, %s6775_s3  ;;  %v4611_v30 = vadd.f32 %v8723_v21, %v4541_v56  ;;  %v4704_v59 = vsel %vm4640_vm9, %v4608_v37, %v4672_v48  ;;  %vm4655_vm10 = vcmp.gt.f32.partialorder %v4623_v54, 0.0  ;;  %v4686_v6 = vmul.f32 0.2, %v4622_v41 }
 0xf24   :  { %4813 = vrot.lane.b32.xlu0 %v4741_v23, %s6775_s3  ;;  %v4610_v52 = vadd.f32 %v8726_v3, %v4541_v56  ;;  %v4509_v33 = vcombine.high %v4505_v11, %v4505_v11  ;;  %vm4654_vm11 = vcmp.gt.f32.partialorder %v4622_v41, 0.0  ;;  %v4569_v0 = vrot.slane %v4507_v8, %v6943_v39 }
 0xf25   :  { %v4746_v2 = vmul.f32 %v8716_v38, %v4705_v44  ;;  %v4745_v12 = vmul.f32 %v8716_v38, %v4704_v59  ;;  %v4719_v50 = vsel %vm4655_vm10, %v4623_v54, %v4687_v4  ;;  %v4675_v10 = vmul.f32 0.2, %v4611_v30 }
 0xf26   :  { %v4625_v53 = vadd.f32 %v8723_v21, %v4569_v0  ;;  %v4718_v46 = vsel %vm4654_vm11, %v4622_v41, %v4686_v6  ;;  %vm4643_vm12 = vcmp.gt.f32.partialorder %v4611_v30, 0.0  ;;  %v4674_v19 = vmul.f32 0.2, %v4610_v52 }
 0xf27   :  { %4843 = vrot.lane.b32.xlu1 %v4756_v7, %s6775_s3  ;;  %v4624_v18 = vadd.f32 %v8726_v3, %v4569_v0  ;;  %vm4642_vm13 = vcmp.gt.f32.partialorder %v4610_v52, 0.0  ;;  %v4573_v60 = vrot.slane %v4509_v33, %v6943_v39  ;;  %v4760_v32 = vmul.f32 %v8716_v38, %v4719_v50 }
 0xf28   :  { %4841 = vrot.lane.b32.xlu0 %v4755_v20, %s6775_s3  ;;  %v4759_v36 = vmul.f32 %v8716_v38, %v4718_v46  ;;  %v4707_v61 = vsel %vm4643_vm12, %v4611_v30, %v4675_v10  ;;  %v4689_v23 = vmul.f32 0.2, %v4625_v53  ;;  %v4706_v62 = vsel %vm4642_vm13, %v4610_v52, %v4674_v19 }
 0xf29   :  { %v4627_v57 = vadd.f32 %v8723_v21, %v4573_v60  ;;  %vm4657_vm9 = vcmp.gt.f32.partialorder %v4625_v53, 0.0  ;;  %v4688_v40 = vmul.f32 0.2, %v4624_v18  ;;  %v4626_v63 = vadd.f32 %v8726_v3, %v4573_v60 }
 0xf2a   :  { %vm4656_vm10 = vcmp.gt.f32.partialorder %v4624_v18, 0.0  ;;  %v4748_v58 = vmul.f32 %v8716_v38, %v4707_v61  ;;  %v4747_v25 = vmul.f32 %v8716_v38, %v4706_v62  ;;  %v4721_v11 = vsel %vm4657_vm9, %v4625_v53, %v4689_v23 }
 0xf2b   :  { %4819 = vrot.lane.b32.xlu1 %v4744_v17, %s6775_s3  ;;  %v4691_v9 = vmul.f32 0.2, %v4627_v57  ;;  %v4720_v7 = vsel %vm4656_vm10, %v4624_v18, %v4688_v40  ;;  %vm4659_vm11 = vcmp.gt.f32.partialorder %v4627_v57, 0.0  ;;  %v4690_v21 = vmul.f32 0.2, %v4626_v63 }
 0xf2c   :  { %4817 = vrot.lane.b32.xlu0 %v4743_v29, %s6775_s3  ;;  %vm4658_vm12 = vcmp.gt.f32.partialorder %v4626_v63, 0.0  ;;  %v4762_v20 = vmul.f32 %v8716_v38, %v4721_v11  ;;  %v4761_v3 = vmul.f32 %v8716_v38, %v4720_v7 }
 0xf2d   :  { %v4723_v24 = vsel %vm4659_vm11, %v4627_v57, %v4691_v9  ;;  %v4722_v22 = vsel %vm4658_vm12, %v4626_v63, %v4690_v21 }
 0xf2e   :  { %v4764_v14 = vmul.f32 %v8716_v38, %v4723_v24  ;;  %v4763_v42 = vmul.f32 %v8716_v38, %v4722_v22 }
 0xf2f   :  { %4847 = vrot.lane.b32.xlu1 %v4758_v35, %s6775_s3 }
 0xf30   :  { %4845 = vrot.lane.b32.xlu0 %v4757_v5, %s6775_s3 }
 0xf33   :  { %4823 = vrot.lane.b32.xlu1 %v4746_v2, %s6775_s3 }
 0xf34   :  { %4821 = vrot.lane.b32.xlu0 %v4745_v12, %s6775_s3 }
 0xf37   :  { %4851 = vrot.lane.b32.xlu1 %v4760_v32, %s6775_s3 }
 0xf38   :  { %4849 = vrot.lane.b32.xlu0 %v4759_v36, %s6775_s3 }
 0xf3b   :  { %4827 = vrot.lane.b32.xlu1 %v4748_v58, %s6775_s3 }
 0xf3c   :  { %4825 = vrot.lane.b32.xlu0 %v4747_v25, %s6775_s3 }
 0xf3f   :  { %4855 = vrot.lane.b32.xlu1 %v4762_v20, %s6775_s3 }
 0xf40   :  { %4853 = vrot.lane.b32.xlu0 %v4761_v3, %s6775_s3 }
 0xf43   :  { %4859 = vrot.lane.b32.xlu1 %v4764_v14, %s6775_s3 }
 0xf44   :  { %4857 = vrot.lane.b32.xlu0 %v4763_v42, %s6775_s3 }
 0xf79   :  { %v4800_v28 = vpop.permute.xlu1 %4799 }
 0xf7a   :  { %v8868_v37 = vpop.permute.xlu0 %4797  ;;  %v4896_v26 = vsel %vm754_vm14, %v4800_v28, 0.0 }
 0xf7b   :  { %4897 = vadd.xlane.f32.xlu1 %v4896_v26 }
 0xf7d   :  { %v4804_v15 = vpop.permute.xlu1 %4803 }
 0xf7e   :  { %v8871_v17 = vpop.permute.xlu0 %4801  ;;  %v4902_v29 = vsel %vm754_vm14, %v4804_v15, 0.0 }
 0xf7f   :  { %4903 = vadd.xlane.f32.xlu0 %v4902_v29 }
 0xf81   :  { %v4808_v16 = vpop.permute.xlu1 %4807 }
 0xf82   :  { %v4806_v27 = vpop.permute.xlu0 %4805  ;;  %v4908_v38 = vsel %vm754_vm14, %v4808_v16, 0.0 }
 0xf83   :  { %4909 = vadd.xlane.f32.xlu0 %v4908_v38  ;;  %v4905_v54 = vsel %vm754_vm14, %v4806_v27, 0.0 }
 0xf84   :  { %4906 = vadd.xlane.f32.xlu1 %v4905_v54 }
 0xf85   :  { %v4832_v34 = vpop.permute.xlu1 %4831 }
 0xf86   :  { %v4830_v48 = vpop.permute.xlu0 %4829  ;;  %v4944_v41 = vsel %vm754_vm14, %v4832_v34, 0.0  ;;  %v4893_v34 = vsel %vm754_vm14, %v8868_v37, 0.0 }
 0xf87   :  { %4945 = vadd.xlane.f32.xlu0 %v4944_v41  ;;  %v4941_v8 = vsel %vm754_vm14, %v4830_v48, 0.0  ;;  %v4899_v48 = vsel %vm754_vm14, %v8871_v17, 0.0 }
 0xf88   :  { %4942 = vadd.xlane.f32.xlu1 %v4941_v8  ;;  %v9857_v8 = vld [vmem:[#allocation34_spill] sm:$0xff] }
 0xf89   :  { %v4836_v56 = vpop.permute.xlu1 %4835 }
 0xf8a   :  { %v4834_v35 = vpop.permute.xlu0 %4833  ;;  %v4950_v5 = vsel %vm754_vm14, %v4836_v56, 0.0 }
 0xf8b   :  { %4951 = vadd.xlane.f32.xlu0 %v4950_v5  ;;  %v4947_v44 = vsel %vm754_vm14, %v4834_v35, 0.0  ;;  %v9858_v5 = vld [vmem:[#allocation18_spill] sm:$0xff] }
 0xf8c   :  { %4948 = vadd.xlane.f32.xlu1 %v4947_v44 }
 0xf8d   :  { %v4812_v4 = vpop.permute.xlu1 %4811 }
 0xf8e   :  { %v4810_v30 = vpop.permute.xlu0 %4809  ;;  %v4914_v59 = vsel %vm754_vm14, %v4812_v4, 0.0 }
 0xf8f   :  { %4915 = vadd.xlane.f32.xlu0 %v4914_v59  ;;  %v4911_v6 = vsel %vm754_vm14, %v4810_v30, 0.0  ;;  %v9859_v30 = vld [vmem:[#allocation19_spill] sm:$0xff] }
 0xf90   :  { %4912 = vadd.xlane.f32.xlu1 %v4911_v6  ;;  %v9860_v6 = vld [vmem:[#allocation36_spill] sm:$0xff] }
 0xf91   :  { %v4840_v52 = vpop.permute.xlu1 %4839 }
 0xf92   :  { %v4838_v33 = vpop.permute.xlu0 %4837  ;;  %v4956_v0 = vsel %vm754_vm14, %v4840_v52, 0.0 }
 0xf93   :  { %4957 = vadd.xlane.f32.xlu0 %v4956_v0  ;;  %v4953_v2 = vsel %vm754_vm14, %v4838_v33, 0.0  ;;  %v9861_v33 = vld [vmem:[#allocation9_spill] sm:$0xff] }
 0xf94   :  { %4954 = vadd.xlane.f32.xlu1 %v4953_v2 }
 0xf95   :  { %v4816_v12 = vpop.permute.xlu1 %4815 }
 0xf96   :  { %v4814_v50 = vpop.permute.xlu0 %4813  ;;  %v4920_v10 = vsel %vm754_vm14, %v4816_v12, 0.0  ;;  %v9862_v12 = vld [vmem:[#allocation26_spill] sm:$0xff] }
 0xf97   :  { %4921 = vadd.xlane.f32.xlu0 %v4920_v10  ;;  %v4917_v53 = vsel %vm754_vm14, %v4814_v50, 0.0 }
 0xf98   :  { %4918 = vadd.xlane.f32.xlu1 %v4917_v53  ;;  %v9863_v53 = vld [vmem:[#allocation10_spill] sm:$0xff] }
 0xf99   :  { %v4844_v46 = vpop.permute.xlu1 %4843 }
 0xf9a   :  { %v4842_v19 = vpop.permute.xlu0 %4841  ;;  %v4962_v18 = vsel %vm754_vm14, %v4844_v46, 0.0 }
 0xf9b   :  { %4963 = vadd.xlane.f32.xlu0 %v4962_v18  ;;  %v4959_v60 = vsel %vm754_vm14, %v4842_v19, 0.0  ;;  %v9864_v18 = vld [vmem:[#allocation27_spill] sm:$0xff] }
 0xf9c   :  { %4960 = vadd.xlane.f32.xlu1 %v4959_v60 }
 0xf9d   :  { %v4820_v32 = vpop.permute.xlu1 %4819 }
 0xf9e   :  { %v4818_v36 = vpop.permute.xlu0 %4817  ;;  %v4926_v61 = vsel %vm754_vm14, %v4820_v32, 0.0 }
 0xf9f   :  { %4927 = vadd.xlane.f32.xlu0 %v4926_v61  ;;  %v4923_v23 = vsel %vm754_vm14, %v4818_v36, 0.0  ;;  %v9865_v36 = vld [vmem:[#allocation20_spill] sm:$0xff] }
 0xfa0   :  { %4924 = vadd.xlane.f32.xlu1 %v4923_v23 }
 0xfa1   :  { %v4848_v57 = vpop.permute.xlu1 %4847 }
 0xfa2   :  { %v4846_v62 = vpop.permute.xlu0 %4845  ;;  %v4968_v40 = vsel %vm754_vm14, %v4848_v57, 0.0  ;;  %v9866_v57 = vld [vmem:[#allocation37_spill] sm:$0xff] }
 0xfa3   :  { %4969 = vadd.xlane.f32.xlu0 %v4968_v40  ;;  %v4965_v63 = vsel %vm754_vm14, %v4846_v62, 0.0 }
 0xfa4   :  { %4966 = vadd.xlane.f32.xlu1 %v4965_v63  ;;  %v9867_v63 = vld [vmem:[#allocation11_spill] sm:$0xff] }
 0xfa5   :  { %v4824_v58 = vpop.permute.xlu1 %4823 }
 0xfa6   :  { %v4822_v25 = vpop.permute.xlu0 %4821  ;;  %v4932_v11 = vsel %vm754_vm14, %v4824_v58, 0.0 }
 0xfa7   :  { %4933 = vadd.xlane.f32.xlu0 %v4932_v11  ;;  %v4929_v9 = vsel %vm754_vm14, %v4822_v25, 0.0  ;;  %v9868_v11 = vld [vmem:[#allocation28_spill] sm:$0xff] }
 0xfa8   :  { %4930 = vadd.xlane.f32.xlu1 %v4929_v9 }
 0xfa9   :  { %v4852_v7 = vpop.permute.xlu1 %4851 }
 0xfaa   :  { %v4850_v21 = vpop.permute.xlu0 %4849  ;;  %v4974_v20 = vsel %vm754_vm14, %v4852_v7, 0.0 }
 0xfab   :  { %4975 = vadd.xlane.f32.xlu0 %v4974_v20  ;;  %v4971_v3 = vsel %vm754_vm14, %v4850_v21, 0.0  ;;  %v9869_v21 = vld [vmem:[#allocation22_spill] sm:$0xff] }
 0xfac   :  { %4972 = vadd.xlane.f32.xlu1 %v4971_v3 }
 0xfad   :  { %v4828_v24 = vpop.permute.xlu1 %4827 }
 0xfae   :  { %v4826_v22 = vpop.permute.xlu0 %4825  ;;  %v4938_v14 = vsel %vm754_vm14, %v4828_v24, 0.0  ;;  %v9870_v24 = vld [vmem:[#allocation38_spill] sm:$0xff] }
 0xfaf   :  { %4939 = vadd.xlane.f32.xlu0 %v4938_v14  ;;  %v4935_v42 = vsel %vm754_vm14, %v4826_v22, 0.0 }
 0xfb0   :  { %4936 = vadd.xlane.f32.xlu1 %v4935_v42  ;;  %v9871_v42 = vld [vmem:[#allocation12_spill] sm:$0xff] }
 0xfb1   :  { %v4856_v28 = vpop.permute.xlu1 %4855 }
 0xfb2   :  { %v4854_v26 = vpop.permute.xlu0 %4853  ;;  %v4980_v15 = vsel %vm754_vm14, %v4856_v28, 0.0 }
 0xfb3   :  { %4981 = vadd.xlane.f32.xlu0 %v4980_v15  ;;  %v4977_v29 = vsel %vm754_vm14, %v4854_v26, 0.0  ;;  %v9872_v15 = vld [vmem:[#allocation29_spill] sm:$0xff] }
 0xfb4   :  { %4978 = vadd.xlane.f32.xlu1 %v4977_v29 }
 0xfb5   :  { %v4860_v16 = vpop.permute.xlu1 %4859 }
 0xfb6   :  { %v4858_v27 = vpop.permute.xlu0 %4857  ;;  %v4986_v38 = vsel %vm754_vm14, %v4860_v16, 0.0 }
 0xfb7   :  { %4987 = vadd.xlane.f32.xlu0 %v4986_v38  ;;  %v4983_v54 = vsel %vm754_vm14, %v4858_v27, 0.0  ;;  %v9873_v27 = vld [vmem:[#allocation23_spill] sm:$0xff] }
 0xfb8   :  { %4984 = vadd.xlane.f32.xlu1 %v4983_v54 }
 0xfbb   :  { %4894 = vadd.xlane.f32.xlu0 %v4893_v34  ;;  %v9875_v34 = vld [vmem:[#allocation39_spill] sm:$0xff] }
 0xfbf   :  { %4900 = vadd.xlane.f32.xlu0 %v4899_v48 }
0x1008   :  { %v4898_v41 = vpop.xlane.xlu1 %4897 }
0x1009   :  { %v8907_v56 = vadd.f32 %v4898_v41, %v9857_v8  ;;  %v9876_v8 = vld [vmem:[#allocation13_spill] sm:$0xff] }
0x100b   :  { %5057 = vperm.xlu0 %6541, %v8907_v56  }
0x100c   :  { %v4904_v35 = vpop.xlane.xlu0 %4903 }
0x100d   :  { %v8911_v44 = vadd.f32 %v4904_v35, %v9858_v5 }
0x100f   :  { %5063 = vperm.xlu1 %6542, %v8911_v44  }
0x1010   :  { %v4910_v4 = vpop.xlane.xlu0 %4909 }
0x1011   :  { %v8915_v37 = vadd.f32 %v4910_v4, %v9859_v30  ;;  %v4907_v59 = vpop.xlane.xlu1 %4906  ;;  %v9878_v4 = vld [vmem:[#allocation30_spill] sm:$0xff] }
0x1012   :  { %v8918_v17 = vadd.f32 %v4907_v59, %v9860_v6  ;;  %v9880_v6 = vld [vmem:[#allocation24_spill] sm:$0xff] }
0x1013   :  { %5069 = vperm.xlu1 %6542, %v8915_v37  }
0x1014   :  { %5066 = vperm.xlu0 %6541, %v8918_v17   ;;  %v4946_v52 = vpop.xlane.xlu0 %4945 }
0x1015   :  { %v8923_v0 = vadd.f32 %v4946_v52, %v9861_v33  ;;  %v4943_v2 = vpop.xlane.xlu1 %4942 }
0x1016   :  { %v8926_v50 = vadd.f32 %v4943_v2, %v9862_v12  ;;  %v9882_v2 = vld [vmem:[#allocation40_spill] sm:$0xff] }
0x1017   :  { %5105 = vperm.xlu1 %6542, %v8923_v0  }
0x1018   :  { %5102 = vperm.xlu0 %6541, %v8926_v50   ;;  %v4952_v10 = vpop.xlane.xlu0 %4951 }
0x1019   :  { %v8931_v46 = vadd.f32 %v4952_v10, %v9863_v53  ;;  %v4949_v19 = vpop.xlane.xlu1 %4948  ;;  %v9884_v53 = vld [vmem:[#allocation14_spill] sm:$0xff] }
0x101a   :  { %v8934_v60 = vadd.f32 %v4949_v19, %v9864_v18 }
0x101b   :  { %5111 = vperm.xlu1 %6542, %v8931_v46  }
0x101c   :  { %5108 = vperm.xlu0 %6541, %v8934_v60   ;;  %v4916_v32 = vpop.xlane.xlu0 %4915 }
0x101d   :  { %v8939_v61 = vadd.f32 %v4916_v32, %v9865_v36  ;;  %v4913_v23 = vpop.xlane.xlu1 %4912  ;;  %v9886_v32 = vld [vmem:[#allocation31_spill] sm:$0xff] }
0x101e   :  { %v8942_v62 = vadd.f32 %v4913_v23, %v9866_v57  ;;  %v9888_v57 = vld [vmem:[#allocation25_spill] sm:$0xff] }
0x101f   :  { %5075 = vperm.xlu1 %6542, %v8939_v61  }
0x1020   :  { %5072 = vperm.xlu0 %6541, %v8942_v62   ;;  %v4958_v40 = vpop.xlane.xlu0 %4957 }
0x1021   :  { %v8947_v58 = vadd.f32 %v4958_v40, %v9867_v63  ;;  %v4955_v25 = vpop.xlane.xlu1 %4954 }
0x1022   :  { %v8950_v9 = vadd.f32 %v4955_v25, %v9868_v11  ;;  %v9890_v25 = vld [vmem:[#allocation41_spill] sm:$0xff] }
0x1023   :  { %5117 = vperm.xlu1 %6542, %v8947_v58  }
0x1024   :  { %5114 = vperm.xlu0 %6541, %v8950_v9   ;;  %v4922_v7 = vpop.xlane.xlu0 %4921 }
0x1025   :  { %v8955_v20 = vadd.f32 %v4922_v7, %v9869_v21  ;;  %v4919_v3 = vpop.xlane.xlu1 %4918 }
0x1026   :  { %v8958_v22 = vadd.f32 %v4919_v3, %v9870_v24  ;;  %v9892_v3 = vld [vmem:[#allocation32_spill] sm:$0xff] }
0x1027   :  { %5081 = vperm.xlu1 %6542, %v8955_v20  }
0x1028   :  { %5078 = vperm.xlu0 %6541, %v8958_v22   ;;  %v4964_v14 = vpop.xlane.xlu0 %4963 }
0x1029   :  { %v8963_v28 = vadd.f32 %v4964_v14, %v9871_v42  ;;  %v4961_v26 = vpop.xlane.xlu1 %4960 }
0x102a   :  { %v8966_v29 = vadd.f32 %v4961_v26, %v9872_v15  ;;  %v9894_v26 = vld [vmem:[#allocation33_spill] sm:$0xff] }
0x102b   :  { %5123 = vperm.xlu1 %6542, %v8963_v28  }
0x102c   :  { %5120 = vperm.xlu0 %6541, %v8966_v29   ;;  %v4928_v16 = vpop.xlane.xlu0 %4927 }
0x102d   :  { %v8971_v38 = vadd.f32 %v4928_v16, %v9873_v27  ;;  %v4925_v54 = vpop.xlane.xlu1 %4924  ;;  %v9896_v27 = vld [vmem:[#allocation17_spill] sm:$0xff] }
0x102e   :  { %v8974_v48 = vadd.f32 %v4925_v54, %v9875_v34 }
0x102f   :  { %9874 = vst [vmem:[#allocation54_spill] sm:$0xff] %v8971_v38  ;;  %5087 = vperm.xlu1 %6542, %v8971_v38  }
0x1030   :  { %5084 = vperm.xlu0 %6541, %v8974_v48   ;;  %v4970_v41 = vpop.xlane.xlu0 %4969 }
0x1031   :  { %v8979_v35 = vadd.f32 %v4970_v41, %v9876_v8  ;;  %v4967_v5 = vpop.xlane.xlu1 %4966  ;;  %v9897_v41 = vld [vmem:[#allocation35_spill] sm:$0xff] }
0x1032   :  { %v8982_v30 = vadd.f32 %v4967_v5, %v9878_v4  ;;  %v9898_v5 = vld [vmem:[#allocation15_spill] sm:$0xff] }
0x1033   :  { %9877 = vst [vmem:[#allocation52_spill] sm:$0xff] %v8979_v35  ;;  %5129 = vperm.xlu1 %6542, %v8979_v35  }
0x1034   :  { %9879 = vst [vmem:[#allocation55_spill] sm:$0xff] %v8982_v30  ;;  %5126 = vperm.xlu0 %6541, %v8982_v30   ;;  %v4934_v59 = vpop.xlane.xlu0 %4933 }
0x1035   :  { %v8987_v52 = vadd.f32 %v4934_v59, %v9880_v6  ;;  %v4931_v33 = vpop.xlane.xlu1 %4930  ;;  %v9900_v59 = vld [vmem:[#allocation16_spill] sm:$0xff] }
0x1036   :  { %v8990_v12 = vadd.f32 %v4931_v33, %v9882_v2 }
0x1037   :  { %9881 = vst [vmem:[#allocation44_spill] sm:$0xff] %v8987_v52  ;;  %5093 = vperm.xlu1 %6542, %v8987_v52  }
0x1038   :  { %9883 = vst [vmem:[#allocation42_spill] sm:$0xff] %v8990_v12  ;;  %5090 = vperm.xlu0 %6541, %v8990_v12   ;;  %v4976_v10 = vpop.xlane.xlu0 %4975 }
0x1039   :  { %v8995_v19 = vadd.f32 %v4976_v10, %v9884_v53  ;;  %v4973_v18 = vpop.xlane.xlu1 %4972 }
0x103a   :  { %v8998_v36 = vadd.f32 %v4973_v18, %v9886_v32 }
0x103b   :  { %9885 = vst [vmem:[#allocation53_spill] sm:$0xff] %v8995_v19  ;;  %5135 = vperm.xlu1 %6542, %v8995_v19  }
0x103c   :  { %9887 = vst [vmem:[#allocation43_spill] sm:$0xff] %v8998_v36  ;;  %5132 = vperm.xlu0 %6541, %v8998_v36   ;;  %v4940_v23 = vpop.xlane.xlu0 %4939 }
0x103d   :  { %v9003_v40 = vadd.f32 %v4940_v23, %v9888_v57  ;;  %v4937_v63 = vpop.xlane.xlu1 %4936 }
0x103e   :  { %v9006_v11 = vadd.f32 %v4937_v63, %v9890_v25 }
0x103f   :  { %9889 = vst [vmem:[#allocation46_spill] sm:$0xff] %v9003_v40  ;;  %5099 = vperm.xlu1 %6542, %v9003_v40  }
0x1040   :  { %9891 = vst [vmem:[#allocation45_spill] sm:$0xff] %v9006_v11  ;;  %5096 = vperm.xlu0 %6541, %v9006_v11   ;;  %v4982_v7 = vpop.xlane.xlu0 %4981 }
0x1041   :  { %v4979_v21 = vpop.xlane.xlu1 %4978  ;;  %v9027_v4 = vadd.f32 %v4982_v7, %v9898_v5 }
0x1042   :  { %v9011_v24 = vadd.f32 %v4979_v21, %v9892_v3 }
0x1043   :  { %9899 = vst [vmem:[#allocation49_spill] sm:$0xff] %v9027_v4 }
0x1044   :  { %9893 = vst [vmem:[#allocation48_spill] sm:$0xff] %v9011_v24  ;;  %5138 = vperm.xlu0 %6541, %v9011_v24   ;;  %v4988_v14 = vpop.xlane.xlu0 %4987 }
0x1045   :  { %v4985_v42 = vpop.xlane.xlu1 %4984  ;;  %v9031_v6 = vadd.f32 %v4988_v14, %v9900_v59 }
0x1046   :  { %v9015_v15 = vadd.f32 %v4985_v42, %v9894_v26 }
0x1047   :  { %9901 = vst [vmem:[#allocation51_spill] sm:$0xff] %v9031_v6 }
0x1048   :  { %9895 = vst [vmem:[#allocation47_spill] sm:$0xff] %v9015_v15  ;;  %5144 = vperm.xlu0 %6541, %v9015_v15   ;;  %v4895_v16 = vpop.xlane.xlu0 %4894 }
0x1049   :  { %v9019_v54 = vadd.f32 %v4895_v16, %v9896_v27 }
0x104b   :  { %5054 = vperm.xlu1 %6542, %v9019_v54  }
0x104c   :  { %v4901_v34 = vpop.xlane.xlu0 %4900 }
0x104d   :  { %v9023_v8 = vadd.f32 %v4901_v34, %v9897_v41 }
0x104f   :  { %5060 = vperm.xlu1 %6542, %v9023_v8  }
0x1053   :  { %5141 = vperm.xlu1 %6542, %v9027_v4  }
0x1057   :  { %5147 = vperm.xlu1 %6542, %v9031_v6  }
0x108a   :  { %v5058_v2 = vpop.permute.xlu0 %5057 }
0x108e   :  { %v9034_v33 = vpop.permute.xlu1 %5063 }
0x1092   :  { %v5070_v10 = vpop.permute.xlu1 %5069 }
0x1093   :  { %v5067_v53 = vpop.permute.xlu0 %5066  ;;  %v5174_v1 = vrot.slane %v5070_v10, %v7408_v31  ;;  %v5165_v10 = vrot.slane %v9034_v33, %v7408_v31 }
0x1094   :  { %v5170_v52 = vrot.slane %v5067_v53, %v7405_v13 }
0x1096   :  { %v5106_v18 = vpop.permute.xlu1 %5105  ;;  %v5175_v53 = vsel %vm1230_vm15, %v5174_v1, %v5170_v52 }
0x1097   :  { %v5103_v32 = vpop.permute.xlu0 %5102  ;;  %v5228_v19 = vrot.slane %v5106_v18, %v7408_v31 }
0x1098   :  { %v5224_v36 = vrot.slane %v5103_v32, %v7405_v13  ;;  %v5156_v32 = vrot.slane %v5058_v2, %v7408_v31 }
0x109a   :  { %v5112_v23 = vpop.permute.xlu1 %5111 }
0x109b   :  { %v5109_v57 = vpop.permute.xlu0 %5108  ;;  %v5237_v4 = vrot.slane %v5112_v23, %v7408_v31 }
0x109c   :  { %v5233_v24 = vrot.slane %v5109_v57, %v7405_v13 }
0x109e   :  { %v5076_v63 = vpop.permute.xlu1 %5075  ;;  %v5238_v12 = vsel %vm1230_vm15, %v5237_v4, %v5233_v24  ;;  %v5229_v24 = vsel %vm1230_vm15, %v5228_v19, %v5224_v36 }
0x109f   :  { %v5073_v25 = vpop.permute.xlu0 %5072  ;;  %v5183_v30 = vrot.slane %v5076_v63, %v7408_v31  ;;  %v5300_v63 = vsel %vm1367_vm1, %v5238_v12, %v5229_v24 }
0x10a0   :  { %v5179_v23 = vrot.slane %v5073_v25, %v7405_v13 }
0x10a2   :  { %v5118_v7 = vpop.permute.xlu1 %5117 }
0x10a3   :  { %v5115_v21 = vpop.permute.xlu0 %5114  ;;  %v5246_v57 = vrot.slane %v5118_v7, %v7408_v31 }
0x10a4   :  { %v5242_v43 = vrot.slane %v5115_v21, %v7405_v13 }
0x10a6   :  { %v5082_v3 = vpop.permute.xlu1 %5081  ;;  %v5247_v2 = vsel %vm1230_vm15, %v5246_v57, %v5242_v43 }
0x10a7   :  { %v5079_v42 = vpop.permute.xlu0 %5078  ;;  %v5192_v33 = vrot.slane %v5082_v3, %v7408_v31  ;;  %v5301_v57 = vsel %vm1369_vm2, %v5247_v2, %v5300_v63 }
0x10aa   :  { %v5124_v26 = vpop.permute.xlu1 %5123 }
0x10ab   :  { %v5121_v14 = vpop.permute.xlu0 %5120  ;;  %v5255_v38 = vrot.slane %v5124_v26, %v7408_v31 }
0x10ac   :  { %v5251_v18 = vrot.slane %v5121_v14, %v7405_v13  ;;  %v5184_v14 = vsel %vm1230_vm15, %v5183_v30, %v5179_v23 }
0x10ae   :  { %v9036_v16 = vpop.permute.xlu1 %5087  ;;  %v5256_v1 = vsel %vm1230_vm15, %v5255_v38, %v5251_v18 }
0x10af   :  { %v5085_v27 = vpop.permute.xlu0 %5084  ;;  %v5201_v52 = vrot.slane %v9036_v16, %v7408_v31 }
0x10b0   :  { %v5197_v12 = vrot.slane %v5085_v27, %v7405_v13 }
0x10b2   :  { %v5130_v34 = vpop.permute.xlu1 %5129  ;;  %v5202_v24 = vsel %vm1230_vm15, %v5201_v52, %v5197_v12 }
0x10b3   :  { %v5127_v41 = vpop.permute.xlu0 %5126  ;;  %v5264_v25 = vrot.slane %v5130_v34, %v7408_v31 }
0x10b4   :  { %v5260_v7 = vrot.slane %v5127_v41, %v7405_v13 }
0x10b6   :  { %v9038_v5 = vpop.permute.xlu1 %5093  ;;  %v5265_v3 = vsel %vm1230_vm15, %v5264_v25, %v5260_v7 }
0x10b7   :  { %v5091_v59 = vpop.permute.xlu0 %5090 }
0x10b8   :  { %v5206_v38 = vrot.slane %v5091_v59, %v7405_v13 }
0x10ba   :  { %v5136_v6 = vpop.permute.xlu1 %5135 }
0x10bb   :  { %v5133_v15 = vpop.permute.xlu0 %5132  ;;  %v5273_v36 = vrot.slane %v5136_v6, %v7408_v31 }
0x10bc   :  { %v5269_v34 = vrot.slane %v5133_v15, %v7405_v13 }
0x10be   :  { %v9042_v40 = vpop.permute.xlu1 %5099 }
0x10bf   :  { %v5097_v11 = vpop.permute.xlu0 %5096  ;;  %v5219_v27 = vrot.slane %v9042_v40, %v7408_v31  ;;  %v5274_v40 = vsel %vm1230_vm15, %v5273_v36, %v5269_v34 }
0x10c0   :  { %v5215_v6 = vrot.slane %v5097_v11, %v7405_v13 }
0x10c3   :  { %v5139_v21 = vpop.permute.xlu0 %5138 }
0x10ca   :  { %v5055_v35 = vpop.permute.xlu1 %5054 }
0x10cb   :  { %v5152_v4 = vrot.slane %v5055_v35, %v7405_v13  ;;  %v5188_v35 = vrot.slane %v5079_v42, %v7405_v13  ;;  %v5210_v42 = vrot.slane %v9038_v5, %v7408_v31  ;;  %v5278_v5 = vrot.slane %v5139_v21, %v7405_v13 }
0x10cd   :  { %v5157_v30 = vsel %vm1230_vm15, %v5156_v32, %v5152_v4  ;;  %v5193_v18 = vsel %vm1230_vm15, %v5192_v33, %v5188_v35  ;;  %v5145_v32 = vpop.permute.xlu0 %5144 }
0x10ce   :  { %v5061_v26 = vpop.permute.xlu1 %5060  ;;  %v5287_v21 = vrot.slane %v5145_v32, %v7405_v13 }
0x10cf   :  { %v5161_v19 = vrot.slane %v5061_v26, %v7405_v13 }
0x10d1   :  { %v5166_v43 = vsel %vm1230_vm15, %v5165_v10, %v5161_v19  ;;  %v5302_v10 = vsel %vm1371_vm3, %v5256_v1, %v5301_v57 }
0x10d2   :  { %v5293_v41 = vsel %vm1367_vm1, %v5166_v43, %v5157_v30  ;;  %v5142_v16 = vpop.permute.xlu1 %5141  ;;  %v5303_v4 = vsel %vm1373_vm4, %v5265_v3, %v5302_v10 }
0x10d3   :  { %v5294_v15 = vsel %vm1369_vm2, %v5175_v53, %v5293_v41  ;;  %v5282_v23 = vrot.slane %v5142_v16, %v7408_v31  ;;  %v5211_v53 = vsel %vm1230_vm15, %v5210_v42, %v5206_v38  ;;  %v5304_v19 = vsel %vm1375_vm6, %v5274_v40, %v5303_v4 }
0x10d4   :  { %v5295_v59 = vsel %vm1371_vm3, %v5184_v14, %v5294_v15  ;;  %v5220_v14 = vsel %vm1230_vm15, %v5219_v27, %v5215_v6 }
0x10d5   :  { %v5296_v11 = vsel %vm1373_vm4, %v5193_v18, %v5295_v59  ;;  %v5283_v63 = vsel %vm1230_vm15, %v5282_v23, %v5278_v5 }
0x10d6   :  { %v5148_v25 = vpop.permute.xlu1 %5147  ;;  %v5297_v7 = vsel %vm1375_vm6, %v5202_v24, %v5296_v11  ;;  %v5305_v52 = vsel %vm1377_vm5, %v5283_v63, %v5304_v19 }
0x10d7   :  { %v5291_v26 = vrot.slane %v5148_v25, %v7408_v31  ;;  %v5298_v2 = vsel %vm1377_vm5, %v5211_v53, %v5297_v7 }
0x10d8   :  { %v5299_v33 = vsel %vm1379_vm7, %v5220_v14, %v5298_v2 }
0x10d9   :  { %v5309_v35 = vsel %vm1390_vm8, %v5299_v33, -inf  ;;  %v5292_v1 = vsel %vm1230_vm15, %v5291_v26, %v5287_v21 }
0x10da   :  { %5310 = vmax.xlane.f32.xlu0 %v5309_v35  ;;  %v5306_v12 = vsel %vm1379_vm7, %v5292_v1, %v5305_v52 }
0x10db   :  { %v5312_v36 = vsel %vm1390_vm8, %v5306_v12, -inf }
0x10dc   :  { %5313 = vmax.xlane.f32.xlu1 %v5312_v36 }
0x1167   :  { %v9110_v34 = vpop.xlane.xlu0 %5310 }
0x1168   :  { %v5320_v30 = vrot.slane %v9110_v34, %v6943_v39  ;;  %v5324_v43 = vrot.slane %v9110_v34, %v6947_v45  ;;  %v5328_v38 = vrot.slane %v9110_v34, %v6951_v47  ;;  %v5332_v10 = vrot.slane %v9110_v34, %v6955_v49 }
0x116a   :  { %v5397_v3 = vsub.f32 %v9019_v54, %v5320_v30  ;;  %v5398_v42 = vsub.f32 %v8907_v56, %v5320_v30  ;;  %v5399_v41 = vsub.f32 %v9023_v8, %v5324_v43  ;;  %v5400_v16 = vsub.f32 %v8911_v44, %v5324_v43  ;;  %v9124_v54 = vpop.xlane.xlu1 %5313 }
0x116b   :  { %v5401_v15 = vsub.f32 %v8918_v17, %v5328_v38  ;;  %v5402_v57 = vsub.f32 %v8915_v37, %v5328_v38  ;;  %v5352_v5 = vrot.slane %v9124_v54, %v6943_v39  ;;  %v5356_v44 = vrot.slane %v9124_v54, %v6947_v45 }
0x116c   :  { %v5429_v27 = vmul.f32 1.442695, %v5397_v3  ;;  %v5431_v6 = vmul.f32 1.442695, %v5398_v42  ;;  %v5433_v23 = vmul.f32 1.442695, %v5399_v41  ;;  %v5403_v53 = vsub.f32 %v8942_v62, %v5332_v10 }
0x116d   :  { %v5435_v18 = vmul.f32 1.442695, %v5400_v16  ;;  %v5437_v56 = vmul.f32 1.442695, %v5401_v15  ;;  %v5439_v8 = vmul.f32 1.442695, %v5402_v57  ;;  %v5413_v17 = vsub.f32 %v8926_v50, %v5352_v5 }
0x116e   :  { %6679 = vpow2.f32 %v5429_v27  ;;  %v5414_v37 = vsub.f32 %v8923_v0, %v5352_v5  ;;  %v5415_v24 = vsub.f32 %v8934_v60, %v5356_v44  ;;  %v5416_v11 = vsub.f32 %v8931_v46, %v5356_v44  ;;  %v9902_v41 = vld [vmem:[#allocation54_spill] sm:$0xff]  ;;  %v9903_v15 = vld [vmem:[#allocation7_spill] sm:$0xff]  ;;  %v9905_v5 = vld [vmem:[#allocation52_spill] sm:$0xff] }
0x116f   :  { %6681 = vpow2.f32 %v5431_v6  ;;  %v5461_v40 = vmul.f32 1.442695, %v5413_v17  ;;  %v5360_v63 = vrot.slane %v9124_v54, %v6951_v47  ;;  %v5404_v60 = vsub.f32 %v8939_v61, %v5332_v10  ;;  %v9904_v57 = vld [vmem:[#allocation55_spill] sm:$0xff] }
0x1170   :  { %6683 = vpow2.f32 %v5433_v23  ;;  %v5463_v50 = vmul.f32 1.442695, %v5414_v37  ;;  %v5465_v25 = vmul.f32 1.442695, %v5415_v24  ;;  %v5467_v46 = vmul.f32 1.442695, %v5416_v11 }
0x1171   :  { %6685 = vpow2.f32 %v5435_v18  ;;  %v5336_v62 = vrot.slane %v9110_v34, %v6959_v51  ;;  %v5441_v26 = vmul.f32 1.442695, %v5403_v53  ;;  %v5417_v14 = vsub.f32 %v8950_v9, %v5360_v63  ;;  %v9906_v37 = vld [vmem:[#allocation42_spill] sm:$0xff]  ;;  %v9907_v11 = vld [vmem:[#allocation44_spill] sm:$0xff] }
0x1172   :  { %6687 = vpow2.f32 %v5437_v56  ;;  %v5443_v2 = vmul.f32 1.442695, %v5404_v60  ;;  %v5418_v61 = vsub.f32 %v8947_v58, %v5360_v63  ;;  %v5364_v19 = vrot.slane %v9124_v54, %v6955_v49  ;;  %v9908_v60 = vld [vmem:[#allocation8_spill] sm:$0xff] }
0x1173   :  { %6689 = vpow2.f32 %v5439_v8  ;;  %v5405_v33 = vsub.f32 %v8958_v22, %v5336_v62  ;;  %v5469_v35 = vmul.f32 1.442695, %v5417_v14  ;;  %v5406_v1 = vsub.f32 %v8955_v20, %v5336_v62 }
0x1174   :  { %6691 = vpow2.f32 %v5461_v40  ;;  %v5471_v52 = vmul.f32 1.442695, %v5418_v61  ;;  %v5340_v58 = vrot.slane %v9110_v34, %v6966_v55  ;;  %v5419_v22 = vsub.f32 %v8966_v29, %v5364_v19  ;;  %v9910_v61 = vld [vmem:[#allocation53_spill] sm:$0xff] }
0x1175   :  { %6693 = vpow2.f32 %v5463_v50  ;;  %v5445_v36 = vmul.f32 1.442695, %v5405_v33  ;;  %v5447_v30 = vmul.f32 1.442695, %v5406_v1  ;;  %v5420_v20 = vsub.f32 %v8963_v28, %v5364_v19  ;;  %v9911_v1 = vld [vmem:[#allocation45_spill] sm:$0xff] }
0x1176   :  { %6695 = vpow2.f32 %v5465_v25  ;;  %v5407_v42 = vsub.f32 %v8974_v48, %v5340_v58  ;;  %v5368_v38 = vrot.slane %v9124_v54, %v6959_v51  ;;  %v5473_v29 = vmul.f32 1.442695, %v5419_v22 }
0x1177   :  { %6697 = vpow2.f32 %v5467_v46  ;;  %v5408_v16 = vsub.f32 %v9902_v41, %v5340_v58  ;;  %v5475_v28 = vmul.f32 1.442695, %v5420_v20  ;;  %v5344_v48 = vrot.slane %v9110_v34, %v9903_v15  ;;  %v9913_v41 = vld [vmem:[#allocation48_spill] sm:$0xff] }
0x1178   :  { %v9132_v32 = vpop.eup %6679  ;;  %6699 = vpow2.f32 %v5441_v26  ;;  %v5449_v23 = vmul.f32 1.442695, %v5407_v42  ;;  %v5421_v18 = vsub.f32 %v9904_v57, %v5368_v38  ;;  %v5422_v8 = vsub.f32 %v9905_v5, %v5368_v38  ;;  %v9909_v26 = vld [vmem:[#allocation43_spill] sm:$0xff] }
0x1179   :  { %v9134_v59 = vpop.eup %6681  ;;  %5526 = vperm.xlu0 %6541, %v9132_v32   ;;  %6701 = vpow2.f32 %v5443_v2  ;;  %v5451_v56 = vmul.f32 1.442695, %v5408_v16  ;;  %v5409_v10 = vsub.f32 %v9906_v37, %v5344_v48  ;;  %v5372_v24 = vrot.slane %v9124_v54, %v6966_v55 }
0x117a   :  { %5529 = vperm.xlu1 %6542, %v9134_v59   ;;  %v9142_v4 = vpop.eup %6683  ;;  %6703 = vpow2.f32 %v5469_v35  ;;  %v5477_v40 = vmul.f32 1.442695, %v5421_v18  ;;  %v5410_v50 = vsub.f32 %v9907_v11, %v5344_v48  ;;  %v5479_v53 = vmul.f32 1.442695, %v5422_v8  ;;  %v9914_v48 = vld [vmem:[#allocation49_spill] sm:$0xff] }
0x117b   :  { %v9144_v0 = vpop.eup %6685  ;;  %6705 = vpow2.f32 %v5471_v52  ;;  %v5348_v46 = vrot.slane %v9110_v34, %v9908_v60  ;;  %v5453_v62 = vmul.f32 1.442695, %v5409_v10  ;;  %v5423_v14 = vsub.f32 %v9909_v26, %v5372_v24 }
0x117c   :  { %v9152_v7 = vpop.eup %6687  ;;  %6707 = vpow2.f32 %v5445_v36  ;;  %v5455_v2 = vmul.f32 1.442695, %v5410_v50  ;;  %v5424_v33 = vsub.f32 %v9910_v61, %v5372_v24  ;;  %v5376_v34 = vrot.slane %v9124_v54, %v9903_v15  ;;  %v9912_v36 = vld [vmem:[#allocation46_spill] sm:$0xff] }
0x117d   :  { %5532 = vperm.xlu0 %6541, %v9142_v4   ;;  %v9154_v21 = vpop.eup %6689  ;;  %6709 = vpow2.f32 %v5447_v30  ;;  %v5411_v52 = vsub.f32 %v9911_v1, %v5348_v46  ;;  %v5481_v58 = vmul.f32 1.442695, %v5423_v14  ;;  %v5412_v22 = vsub.f32 %v9912_v36, %v5348_v46 }
0x117e   :  { %5535 = vperm.xlu1 %6542, %v9144_v0   ;;  %v9166_v12 = vpop.eup %6691  ;;  %6711 = vpow2.f32 %v5473_v29  ;;  %v5483_v30 = vmul.f32 1.442695, %v5424_v33  ;;  %v5380_v29 = vrot.slane %v9124_v54, %v9908_v60  ;;  %v5425_v16 = vsub.f32 %v9913_v41, %v5376_v34  ;;  %v9917_v54 = vld [vmem:[#allocation51_spill] sm:$0xff] }
0x117f   :  { %v9168_v9 = vpop.eup %6693  ;;  %6713 = vpow2.f32 %v5475_v28  ;;  %v5457_v38 = vmul.f32 1.442695, %v5411_v52  ;;  %v5459_v28 = vmul.f32 1.442695, %v5412_v22 }
0x1180   :  { %v9176_v43 = vpop.eup %6695  ;;  %6715 = vpow2.f32 %v5449_v23  ;;  %v5426_v23 = vsub.f32 %v9914_v48, %v5376_v34  ;;  %v5485_v8 = vmul.f32 1.442695, %v5425_v16  ;;  %v5428_v37 = vsub.f32 %v9917_v54, %v5380_v29 }
0x1181   :  { %5538 = vperm.xlu0 %6541, %v9152_v7   ;;  %v9178_v3 = vpop.eup %6697  ;;  %6717 = vpow2.f32 %v5451_v56  ;;  %v9916_v56 = vld [vmem:[#allocation47_spill] sm:$0xff] }
0x1182   :  { %5541 = vperm.xlu1 %6542, %v9154_v21   ;;  %v9186_v27 = vpop.eup %6699  ;;  %6719 = vpow2.f32 %v5477_v40  ;;  %v5427_v5 = vsub.f32 %v9916_v56, %v5380_v29  ;;  %v5487_v10 = vmul.f32 1.442695, %v5426_v23  ;;  %v5491_v50 = vmul.f32 1.442695, %v5428_v37 }
0x1183   :  { %v9188_v6 = vpop.eup %6701  ;;  %6721 = vpow2.f32 %v5479_v53 }
0x1184   :  { %v9196_v44 = vpop.eup %6703  ;;  %6723 = vpow2.f32 %v5453_v62  ;;  %v5489_v11 = vmul.f32 1.442695, %v5427_v5 }
0x1185   :  { %5574 = vperm.xlu0 %6541, %v9166_v12   ;;  %v9198_v17 = vpop.eup %6705  ;;  %6725 = vpow2.f32 %v5455_v2 }
0x1186   :  { %5577 = vperm.xlu1 %6542, %v9168_v9   ;;  %v9206_v63 = vpop.eup %6707  ;;  %6727 = vpow2.f32 %v5481_v58 }
0x1187   :  { %v9208_v25 = vpop.eup %6709  ;;  %6729 = vpow2.f32 %v5483_v30 }
0x1188   :  { %v9216_v19 = vpop.eup %6711  ;;  %6731 = vpow2.f32 %v5457_v38 }
0x1189   :  { %5580 = vperm.xlu0 %6541, %v9176_v43   ;;  %v9218_v35 = vpop.eup %6713  ;;  %6733 = vpow2.f32 %v5459_v28 }
0x118a   :  { %5583 = vperm.xlu1 %6542, %v9178_v3   ;;  %v9226_v20 = vpop.eup %6715  ;;  %6735 = vpow2.f32 %v5485_v8 }
0x118b   :  { %v9228_v42 = vpop.eup %6717  ;;  %6737 = vpow2.f32 %v5487_v10 }
0x118c   :  { %v9236_v57 = vpop.eup %6719  ;;  %6739 = vpow2.f32 %v5489_v11 }
0x118d   :  { %5544 = vperm.xlu0 %6541, %v9186_v27   ;;  %9915 = vst [vmem:[#allocation50_spill] sm:$0xff] %v9236_v57  ;;  %v9238_v18 = vpop.eup %6721  ;;  %6741 = vpow2.f32 %v5491_v50 }
0x118e   :  { %5547 = vperm.xlu1 %6542, %v9188_v6   ;;  %v9244_v24 = vpop.eup %6723 }
0x118f   :  { %9918 = vst [vmem:[#allocation21_spill] sm:$0xff] %v9244_v24  ;;  %v9246_v40 = vpop.eup %6725 }
0x1190   :  { %9919 = vst [vmem:[#allocation34_spill] sm:$0xff] %v9246_v40  ;;  %v9250_v53 = vpop.eup %6727 }
0x1191   :  { %5586 = vperm.xlu0 %6541, %v9196_v44   ;;  %9920 = vst [vmem:[#allocation18_spill] sm:$0xff] %v9250_v53  ;;  %v9252_v46 = vpop.eup %6729 }
0x1192   :  { %5589 = vperm.xlu1 %6542, %v9198_v17   ;;  %9921 = vst [vmem:[#allocation19_spill] sm:$0xff] %v9252_v46  ;;  %v9256_v62 = vpop.eup %6731 }
0x1193   :  { %9922 = vst [vmem:[#allocation36_spill] sm:$0xff] %v9256_v62  ;;  %v9258_v26 = vpop.eup %6733 }
0x1194   :  { %9923 = vst [vmem:[#allocation9_spill] sm:$0xff] %v9258_v26  ;;  %v9262_v14 = vpop.eup %6735 }
0x1195   :  { %5550 = vperm.xlu0 %6541, %v9206_v63   ;;  %9924 = vst [vmem:[#allocation26_spill] sm:$0xff] %v9262_v14  ;;  %v9264_v2 = vpop.eup %6737 }
0x1196   :  { %5553 = vperm.xlu1 %6542, %v9208_v25   ;;  %9925 = vst [vmem:[#allocation10_spill] sm:$0xff] %v9264_v2  ;;  %v9268_v61 = vpop.eup %6739 }
0x1197   :  { %9926 = vst [vmem:[#allocation27_spill] sm:$0xff] %v9268_v61  ;;  %v9270_v33 = vpop.eup %6741 }
0x1198   :  { %9927 = vst [vmem:[#allocation20_spill] sm:$0xff] %v9270_v33 }
0x1199   :  { %5592 = vperm.xlu0 %6541, %v9216_v19  }
0x119a   :  { %5595 = vperm.xlu1 %6542, %v9218_v35  }
0x119d   :  { %5556 = vperm.xlu0 %6541, %v9226_v20  }
0x119e   :  { %5559 = vperm.xlu1 %6542, %v9228_v42  }
0x11a1   :  { %5598 = vperm.xlu0 %6541, %v9236_v57  }
0x11a2   :  { %5601 = vperm.xlu1 %6542, %v9238_v18  }
0x11a5   :  { %5562 = vperm.xlu0 %6541, %v9244_v24  }
0x11a6   :  { %5565 = vperm.xlu1 %6542, %v9246_v40  }
0x11a9   :  { %5604 = vperm.xlu0 %6541, %v9250_v53  }
0x11aa   :  { %5607 = vperm.xlu1 %6542, %v9252_v46  }
0x11ad   :  { %5568 = vperm.xlu0 %6541, %v9256_v62  }
0x11ae   :  { %5571 = vperm.xlu1 %6542, %v9258_v26  }
0x11b1   :  { %5610 = vperm.xlu0 %6541, %v9262_v14  }
0x11b2   :  { %5613 = vperm.xlu1 %6542, %v9264_v2  }
0x11b5   :  { %5616 = vperm.xlu0 %6541, %v9268_v61  }
0x11b6   :  { %5619 = vperm.xlu1 %6542, %v9270_v33  }
0x11f8   :  { %v5527_v1 = vpop.permute.xlu0 %5526 }
0x11f9   :  { %v5530_v52 = vpop.permute.xlu1 %5529  ;;  %v5624_v60 = vrot.slane %v5527_v1, %v7405_v13 }
0x11fa   :  { %v5628_v26 = vrot.slane %v5530_v52, %v7408_v31 }
0x11fc   :  { %v5533_v34 = vpop.permute.xlu0 %5532  ;;  %v5629_v1 = vsel %vm1230_vm15, %v5628_v26, %v5624_v60 }
0x11fd   :  { %v5536_v58 = vpop.permute.xlu1 %5535  ;;  %v5633_v33 = vrot.slane %v5533_v34, %v7405_v13 }
0x11fe   :  { %v5637_v61 = vrot.slane %v5536_v58, %v7408_v31 }
0x1200   :  { %v5539_v36 = vpop.permute.xlu0 %5538  ;;  %v5638_v40 = vsel %vm1230_vm15, %v5637_v61, %v5633_v33 }
0x1201   :  { %v5542_v22 = vpop.permute.xlu1 %5541  ;;  %v5642_v2 = vrot.slane %v5539_v36, %v7405_v13  ;;  %v5765_v33 = vsel %vm1367_vm1, %v5638_v40, %v5629_v1 }
0x1202   :  { %v5646_v14 = vrot.slane %v5542_v22, %v7408_v31 }
0x1204   :  { %v9274_v30 = vpop.permute.xlu0 %5574  ;;  %v5647_v22 = vsel %vm1230_vm15, %v5646_v14, %v5642_v2 }
0x1205   :  { %v9276_v38 = vpop.permute.xlu1 %5577 }
0x1206   :  { %v5700_v60 = vrot.slane %v9276_v38, %v7408_v31 }
0x1208   :  { %v5581_v29 = vpop.permute.xlu0 %5580 }
0x1209   :  { %v5584_v41 = vpop.permute.xlu1 %5583  ;;  %v5705_v2 = vrot.slane %v5581_v29, %v7405_v13 }
0x120a   :  { %v5709_v14 = vrot.slane %v5584_v41, %v7408_v31 }
0x120c   :  { %v5545_v16 = vpop.permute.xlu0 %5544 }
0x120d   :  { %v5548_v28 = vpop.permute.xlu1 %5547  ;;  %v5651_v46 = vrot.slane %v5545_v16, %v7405_v13 }
0x120e   :  { %v5655_v53 = vrot.slane %v5548_v28, %v7408_v31 }
0x1210   :  { %v5587_v48 = vpop.permute.xlu0 %5586  ;;  %v5656_v28 = vsel %vm1230_vm15, %v5655_v53, %v5651_v46  ;;  %v5696_v53 = vrot.slane %v9274_v30, %v7405_v13 }
0x1211   :  { %v5590_v23 = vpop.permute.xlu1 %5589  ;;  %v5714_v26 = vrot.slane %v5587_v48, %v7405_v13 }
0x1212   :  { %v5718_v40 = vrot.slane %v5590_v23, %v7408_v31 }
0x1214   :  { %v5551_v56 = vpop.permute.xlu0 %5550  ;;  %v5719_v1 = vsel %vm1230_vm15, %v5718_v40, %v5714_v26 }
0x1215   :  { %v5554_v5 = vpop.permute.xlu1 %5553  ;;  %v5660_v34 = vrot.slane %v5551_v56, %v7405_v13  ;;  %v5766_v56 = vsel %vm1369_vm2, %v5647_v22, %v5765_v33 }
0x1216   :  { %v5664_v58 = vrot.slane %v5554_v5, %v7408_v31 }
0x1218   :  { %v9278_v8 = vpop.permute.xlu0 %5592  ;;  %v5665_v5 = vsel %vm1230_vm15, %v5664_v58, %v5660_v34 }
0x1219   :  { %v5596_v54 = vpop.permute.xlu1 %5595  ;;  %v5723_v30 = vrot.slane %v9278_v8, %v7405_v13 }
0x121a   :  { %v5727_v38 = vrot.slane %v5596_v54, %v7408_v31 }
0x121c   :  { %v5557_v37 = vpop.permute.xlu0 %5556  ;;  %v5728_v33 = vsel %vm1230_vm15, %v5727_v38, %v5723_v30 }
0x121d   :  { %v5560_v10 = vpop.permute.xlu1 %5559  ;;  %v5669_v15 = vrot.slane %v5557_v37, %v7405_v13 }
0x121e   :  { %v5673_v36 = vrot.slane %v5560_v10, %v7408_v31 }
0x1220   :  { %v9280_v11 = vpop.permute.xlu0 %5598  ;;  %v5674_v46 = vsel %vm1230_vm15, %v5673_v36, %v5669_v15  ;;  %v5710_v15 = vsel %vm1230_vm15, %v5709_v14, %v5705_v2 }
0x1221   :  { %v5602_v50 = vpop.permute.xlu1 %5601  ;;  %v5732_v48 = vrot.slane %v9280_v11, %v7405_v13  ;;  %v5701_v11 = vsel %vm1230_vm15, %v5700_v60, %v5696_v53 }
0x1222   :  { %v5736_v23 = vrot.slane %v5602_v50, %v7408_v31 }
0x1224   :  { %v5563_v62 = vpop.permute.xlu0 %5562  ;;  %v5737_v14 = vsel %vm1230_vm15, %v5736_v23, %v5732_v48 }
0x1225   :  { %v5566_v24 = vpop.permute.xlu1 %5565  ;;  %v5678_v57 = vrot.slane %v5563_v62, %v7405_v13 }
0x1226   :  { %v5682_v16 = vrot.slane %v5566_v24, %v7408_v31  ;;  %v5767_v24 = vsel %vm1371_vm3, %v5656_v28, %v5766_v56  ;;  %v5772_v56 = vsel %vm1367_vm1, %v5710_v15, %v5701_v11 }
0x1227   :  { %v5768_v10 = vsel %vm1373_vm4, %v5665_v5, %v5767_v24  ;;  %v5773_v2 = vsel %vm1369_vm2, %v5719_v1, %v5772_v56 }
0x1228   :  { %v5605_v52 = vpop.permute.xlu0 %5604  ;;  %v5683_v41 = vsel %vm1230_vm15, %v5682_v16, %v5678_v57  ;;  %v5769_v57 = vsel %vm1375_vm6, %v5674_v46, %v5768_v10  ;;  %v5774_v46 = vsel %vm1371_vm3, %v5728_v33, %v5773_v2  ;;  %v9928_v33 = vld [vmem:[#allocation50_spill] sm:$0xff] }
0x1229   :  { %v5608_v61 = vpop.permute.xlu1 %5607  ;;  %v5741_v22 = vrot.slane %v5605_v52, %v7405_v13  ;;  %v5770_v8 = vsel %vm1377_vm5, %v5683_v41, %v5769_v57  ;;  %v5775_v40 = vsel %vm1373_vm4, %v5737_v14, %v5774_v46  ;;  %v9931_v14 = vld [vmem:[#allocation21_spill] sm:$0xff] }
0x122a   :  { %v5745_v34 = vrot.slane %v5608_v61, %v7408_v31 }
0x122c   :  { %v5569_v62 = vpop.permute.xlu0 %5568  ;;  %v5746_v5 = vsel %vm1230_vm15, %v5745_v34, %v5741_v22 }
0x122d   :  { %v5572_v29 = vpop.permute.xlu1 %5571  ;;  %v5687_v37 = vrot.slane %v5569_v62, %v7405_v13  ;;  %v5776_v41 = vsel %vm1375_vm6, %v5746_v5, %v5775_v40  ;;  %v9933_v5 = vld [vmem:[#allocation18_spill] sm:$0xff] }
0x122e   :  { %v5691_v58 = vrot.slane %v5572_v29, %v7408_v31 }
0x1230   :  { %v5611_v36 = vpop.permute.xlu0 %5610  ;;  %v5692_v54 = vsel %vm1230_vm15, %v5691_v58, %v5687_v37 }
0x1231   :  { %v5614_v28 = vpop.permute.xlu1 %5613  ;;  %v5750_v16 = vrot.slane %v5611_v36, %v7405_v13  ;;  %v5771_v50 = vsel %vm1379_vm7, %v5692_v54, %v5770_v8 }
0x1232   :  { %v5754_v61 = vrot.slane %v5614_v28, %v7408_v31  ;;  %v5781_v52 = vsel %vm1390_vm8, %v5771_v50, 0.0 }
0x1233   :  { %5782 = vadd.xlane.f32.xlu0 %v5781_v52  ;;  %v9930_v52 = vld [vmem:[#allocation34_spill] sm:$0xff] }
0x1234   :  { %v5617_v24 = vpop.permute.xlu0 %5616  ;;  %v5755_v60 = vsel %vm1230_vm15, %v5754_v61, %v5750_v16  ;;  %v9929_v61 = vld [vmem:[#allocation7_spill] sm:$0xff] }
0x1235   :  { %v5620_v53 = vpop.permute.xlu1 %5619  ;;  %v5759_v62 = vrot.slane %v5617_v24, %v7405_v13  ;;  %v5777_v37 = vsel %vm1377_vm5, %v5755_v60, %v5776_v41  ;;  %v9934_v24 = vld [vmem:[#allocation8_spill] sm:$0xff]  ;;  %v9935_v60 = vld [vmem:[#allocation9_spill] sm:$0xff] }
0x1236   :  { %v5763_v26 = vrot.slane %v5620_v53, %v7408_v31 }
0x1238   :  { %v5764_v29 = vsel %vm1230_vm15, %v5763_v26, %v5759_v62  ;;  %v9936_v62 = vld [vmem:[#allocation36_spill] sm:$0xff] }
0x1239   :  { %v5778_v10 = vsel %vm1379_vm7, %v5764_v29, %v5777_v37  ;;  %v9938_v29 = vld [vmem:[#allocation26_spill] sm:$0xff] }
0x123a   :  { %v5784_v38 = vsel %vm1390_vm8, %v5778_v10, 0.0 }
0x123b   :  { %5785 = vadd.xlane.f32.xlu1 %v5784_v38  ;;  %v9939_v38 = vld [vmem:[#allocation20_spill] sm:$0xff] }
0x12c0   :  { %v5783_v30 = vpop.xlane.xlu0 %5782 }
0x12c1   :  { %6743 = vrcp.f32 %v5783_v30 }
0x12c8   :  { %v5786_v58 = vpop.xlane.xlu1 %5785 }
0x12c9   :  { %6745 = vrcp.f32 %v5786_v58  ;;  %v9940_v58 = vld [vmem:[#allocation27_spill] sm:$0xff] }
0x12cb   :  { %v9350_v15 = vpop.eup %6743 }
0x12cc   :  { %v5794_v23 = vrot.slane %v9350_v15, %v6943_v39  ;;  %v5798_v34 = vrot.slane %v9350_v15, %v6947_v45  ;;  %v5802_v54 = vrot.slane %v9350_v15, %v6951_v47  ;;  %v5822_v46 = vrot.slane %v9350_v15, %v9934_v24 }
0x12ce   :  { %v5872_v48 = vmul.f32 %v9134_v59, %v5794_v23  ;;  %v5871_v57 = vmul.f32 %v9132_v32, %v5794_v23  ;;  %v5874_v22 = vmul.f32 %v9144_v0, %v5798_v34  ;;  %v5873_v36 = vmul.f32 %v9142_v4, %v5798_v34 }
0x12cf   :  { %v5876_v59 = vmul.f32 %v9154_v21, %v5802_v54  ;;  %v5875_v32 = vmul.f32 %v9152_v7, %v5802_v54  ;;  %v5806_v7 = vrot.slane %v9350_v15, %v6955_v49  ;;  %v5886_v53 = vmul.f32 %v9935_v60, %v5822_v46 }
0x12d0   :  { %5946 = vperm.xlu1 %6542, %v5872_v48   ;;  %5943 = vperm.xlu0 %6541, %v5871_v57   ;;  %v5885_v40 = vmul.f32 %v9936_v62, %v5822_v46 }
0x12d3   :  { %v9362_v8 = vpop.eup %6745 }
0x12d4   :  { %5952 = vperm.xlu1 %6542, %v5874_v22   ;;  %5949 = vperm.xlu0 %6541, %v5873_v36   ;;  %v5826_v1 = vrot.slane %v9362_v8, %v6943_v39  ;;  %v5830_v28 = vrot.slane %v9362_v8, %v6947_v45  ;;  %v5878_v39 = vmul.f32 %v9188_v6, %v5806_v7 }
0x12d5   :  { %v5850_v26 = vrot.slane %v9362_v8, %v9929_v61  ;;  %v5854_v10 = vrot.slane %v9362_v8, %v9934_v24 }
0x12d6   :  { %v5888_v0 = vmul.f32 %v9168_v9, %v5826_v1  ;;  %v5887_v4 = vmul.f32 %v9166_v12, %v5826_v1  ;;  %v5890_v16 = vmul.f32 %v9178_v3, %v5830_v28  ;;  %v5889_v21 = vmul.f32 %v9176_v43, %v5830_v28 }
0x12d7   :  { %v5877_v9 = vmul.f32 %v9186_v27, %v5806_v7  ;;  %v5834_v12 = vrot.slane %v9362_v8, %v6951_v47  ;;  %v5810_v43 = vrot.slane %v9350_v15, %v6959_v51  ;;  %v5838_v27 = vrot.slane %v9362_v8, %v6955_v49 }
0x12d8   :  { %5958 = vperm.xlu1 %6542, %v5876_v59   ;;  %5955 = vperm.xlu0 %6541, %v5875_v32   ;;  %v5899_v37 = vmul.f32 %v9938_v29, %v5850_v26  ;;  %v5902_v30 = vmul.f32 %v9939_v38, %v5854_v10 }
0x12d9   :  { %v5892_v45 = vmul.f32 %v9198_v17, %v5834_v12  ;;  %v5891_v3 = vmul.f32 %v9196_v44, %v5834_v12  ;;  %v5880_v50 = vmul.f32 %v9208_v25, %v5810_v43  ;;  %v5879_v6 = vmul.f32 %v9206_v63, %v5810_v43 }
0x12da   :  { %v5894_v47 = vmul.f32 %v9218_v35, %v5838_v27  ;;  %v5893_v17 = vmul.f32 %v9216_v19, %v5838_v27  ;;  %v5814_v44 = vrot.slane %v9350_v15, %v6966_v55  ;;  %v5842_v63 = vrot.slane %v9362_v8, %v6959_v51  ;;  %v9932_v51 = vld [vmem:[#allocation19_spill] sm:$0xff] }
0x12db   :  { %v5818_v19 = vrot.slane %v9350_v15, %v9929_v61  ;;  %v5901_v15 = vmul.f32 %v9940_v58, %v5854_v10 }
0x12dc   :  { %5994 = vperm.xlu1 %6542, %v5888_v0   ;;  %5991 = vperm.xlu0 %6541, %v5887_v4   ;;  %v5882_v11 = vmul.f32 %v9228_v42, %v5814_v44  ;;  %v5881_v25 = vmul.f32 %v9226_v20, %v5814_v44  ;;  %v5896_v49 = vmul.f32 %v9238_v18, %v5842_v63 }
0x12dd   :  { %v5895_v35 = vmul.f32 %v9928_v33, %v5842_v63  ;;  %v5884_v56 = vmul.f32 %v9930_v52, %v5818_v19  ;;  %v5883_v42 = vmul.f32 %v9931_v14, %v5818_v19  ;;  %v5846_v20 = vrot.slane %v9362_v8, %v6966_v55  ;;  %v9937_v55 = vld [vmem:[#allocation10_spill] sm:$0xff] }
0x12de   :  { %v5900_v41 = vmul.f32 %v9937_v55, %v5850_v26 }
0x12df   :  { %v5898_v2 = vmul.f32 %v9932_v51, %v5846_v20  ;;  %v5897_v18 = vmul.f32 %v9933_v5, %v5846_v20 }
0x12e0   :  { %6000 = vperm.xlu1 %6542, %v5890_v16   ;;  %5997 = vperm.xlu0 %6541, %v5889_v21  }
0x12e4   :  { %5964 = vperm.xlu1 %6542, %v5878_v39   ;;  %5961 = vperm.xlu0 %6541, %v5877_v9  }
0x12e8   :  { %6006 = vperm.xlu1 %6542, %v5892_v45   ;;  %6003 = vperm.xlu0 %6541, %v5891_v3  }
0x12ec   :  { %5970 = vperm.xlu1 %6542, %v5880_v50   ;;  %5967 = vperm.xlu0 %6541, %v5879_v6  }
0x12f0   :  { %6012 = vperm.xlu1 %6542, %v5894_v47   ;;  %6009 = vperm.xlu0 %6541, %v5893_v17  }
0x12f4   :  { %5976 = vperm.xlu1 %6542, %v5882_v11   ;;  %5973 = vperm.xlu0 %6541, %v5881_v25  }
0x12f8   :  { %6018 = vperm.xlu1 %6542, %v5896_v49   ;;  %6015 = vperm.xlu0 %6541, %v5895_v35  }
0x12fc   :  { %5982 = vperm.xlu1 %6542, %v5884_v56   ;;  %5979 = vperm.xlu0 %6541, %v5883_v42  }
0x1300   :  { %6024 = vperm.xlu1 %6542, %v5898_v2   ;;  %6021 = vperm.xlu0 %6541, %v5897_v18  }
0x1304   :  { %5988 = vperm.xlu1 %6542, %v5886_v53   ;;  %5985 = vperm.xlu0 %6541, %v5885_v40  }
0x1308   :  { %6030 = vperm.xlu1 %6542, %v5900_v41   ;;  %6027 = vperm.xlu0 %6541, %v5899_v37  }
0x130c   :  { %6036 = vperm.xlu1 %6542, %v5902_v30   ;;  %6033 = vperm.xlu0 %6541, %v5901_v15  }
0x134f   :  { %v5947_v23 = vpop.permute.xlu1 %5946  ;;  %v5944_v48 = vpop.permute.xlu0 %5943 }
0x1350   :  { %v6045_v47 = vrot.slane %v5947_v23, %v7408_v31  ;;  %v6041_v17 = vrot.slane %v5944_v48, %v7405_v13 }
0x1352   :  { %v6046_v56 = vsel %vm1230_vm15, %v6045_v47, %v6041_v17 }
0x1353   :  { %v5953_v57 = vpop.permute.xlu1 %5952  ;;  %v5950_v34 = vpop.permute.xlu0 %5949 }
0x1354   :  { %v6054_v43 = vrot.slane %v5953_v57, %v7408_v31  ;;  %v6050_v50 = vrot.slane %v5950_v34, %v7405_v13 }
0x1356   :  { %v6055_v35 = vsel %vm1230_vm15, %v6054_v43, %v6050_v50 }
0x1357   :  { %v5959_v22 = vpop.permute.xlu1 %5958  ;;  %v5956_v36 = vpop.permute.xlu0 %5955  ;;  %v6182_v5 = vsel %vm1367_vm1, %v6055_v35, %v6046_v56  ;;  %v9941_v56 = vld [vmem:[#allocation6_spill] sm:$0xff] }
0x1358   :  { %v6063_v6 = vrot.slane %v5959_v22, %v7408_v31  ;;  %v6059_v27 = vrot.slane %v5956_v36, %v7405_v13 }
0x135a   :  { %v6064_v61 = vsel %vm1230_vm15, %v6063_v6, %v6059_v27 }
0x135b   :  { %v9418_v54 = vpop.permute.xlu1 %5994  ;;  %v9420_v59 = vpop.permute.xlu0 %5991  ;;  %v6183_v24 = vsel %vm1369_vm2, %v6064_v61, %v6182_v5 }
0x135c   :  { %v6117_v53 = vrot.slane %v9418_v54, %v7408_v31  ;;  %v6113_v62 = vrot.slane %v9420_v59, %v7405_v13 }
0x135f   :  { %v6001_v32 = vpop.permute.xlu1 %6000  ;;  %v5998_v8 = vpop.permute.xlu0 %5997 }
0x1360   :  { %v6126_v46 = vrot.slane %v6001_v32, %v7408_v31  ;;  %v6122_v60 = vrot.slane %v5998_v8, %v7405_v13 }
0x1362   :  { %v6127_v48 = vsel %vm1230_vm15, %v6126_v46, %v6122_v60 }
0x1363   :  { %v5965_v1 = vpop.permute.xlu1 %5964  ;;  %v5962_v0 = vpop.permute.xlu0 %5961 }
0x1364   :  { %v6072_v44 = vrot.slane %v5965_v1, %v7408_v31  ;;  %v6068_v11 = vrot.slane %v5962_v0, %v7405_v13 }
0x1366   :  { %v6073_v14 = vsel %vm1230_vm15, %v6072_v44, %v6068_v11 }
0x1367   :  { %v6007_v4 = vpop.permute.xlu1 %6006  ;;  %v6004_v28 = vpop.permute.xlu0 %6003  ;;  %v6184_v40 = vsel %vm1371_vm3, %v6073_v14, %v6183_v24 }
0x1368   :  { %v6135_v55 = vrot.slane %v6007_v4, %v7408_v31  ;;  %v6131_v41 = vrot.slane %v6004_v28, %v7405_v13  ;;  %v6118_v28 = vsel %vm1230_vm15, %v6117_v53, %v6113_v62 }
0x136a   :  { %v6136_v8 = vsel %vm1230_vm15, %v6135_v55, %v6131_v41 }
0x136b   :  { %v5971_v16 = vpop.permute.xlu1 %5970  ;;  %v5968_v21 = vpop.permute.xlu0 %5967 }
0x136c   :  { %v6081_v49 = vrot.slane %v5971_v16, %v7408_v31  ;;  %v6077_v33 = vrot.slane %v5968_v21, %v7405_v13 }
0x136e   :  { %v6082_v18 = vsel %vm1230_vm15, %v6081_v49, %v6077_v33  ;;  %v6334_v49 = vld [vmem:[%s9525_s13] ss:$0 sm:$0xff]  ;;  %s6300_s13 = sshll.u32 %s6777_s12, 4  ;;  %s6301_s13 = int_to_ptr.vmem [resolvable:$true] %s6300_s13 }
0x136f   :  { %v6013_v7 = vpop.permute.xlu1 %6012  ;;  %v6010_v39 = vpop.permute.xlu0 %6009  ;;  %v6185_v29 = vsel %vm1373_vm4, %v6082_v18, %v6184_v40  ;;  %s6747_s21 = scalar_lea.vmem %s6301_s13, 16  ;;  %s6751_s3 = scalar_lea.vmem %s6301_s13, 32 }
0x1370   :  { %v6144_v30 = vrot.slane %v6013_v7, %v7408_v31  ;;  %v6140_v58 = vrot.slane %v6010_v39, %v7405_v13  ;;  %v6189_v39 = vsel %vm1367_vm1, %v6127_v48, %v6118_v28  ;;  %p6748_p0 = scmp.ne.s32.totalorder %s6301_s13, %s6747_s21  ;;  %p6752_p1 = scmp.lt.s32.totalorder %s6301_s13, %s6301_s13 }
0x1371   :  { %p6753_p2 = scmp.lt.s32.totalorder %s6751_s3, %s6747_s21 }
0x1372   :  { %v6145_v16 = vsel %vm1230_vm15, %v6144_v30, %v6140_v58 }
0x1373   :  { %v5977_v9 = vpop.permute.xlu1 %5976  ;;  %v5974_v12 = vpop.permute.xlu0 %5973  ;;  %p6754_p3 = por %p6753_p2, %p6752_p1 }
0x1374   :  { %v6090_v19 = vrot.slane %v5977_v9, %v7408_v31  ;;  %v6086_v52 = vrot.slane %v5974_v12, %v7405_v13  ;;  %v6190_v12 = vsel %vm1369_vm2, %v6136_v8, %v6189_v39 }
0x1375   :  { %p6755_p4 = pnand %p6754_p3, %p6748_p0 }
0x1376   :  { %v6091_v26 = vsel %vm1230_vm15, %v6090_v19, %v6086_v52 }
0x1377   :  { %v9422_v45 = vpop.permute.xlu1 %6018  ;;  %v6016_v3 = vpop.permute.xlu0 %6015  ;;  %v6186_v57 = vsel %vm1375_vm6, %v6091_v26, %v6185_v29 }
0x1378   :  { %v6153_v34 = vrot.slane %v9422_v45, %v7408_v31  ;;  %v6149_v22 = vrot.slane %v6016_v3, %v7405_v13  ;;  %v6191_v3 = vsel %vm1371_vm3, %v6145_v16, %v6190_v12 }
0x137a   :  { %v6154_v9 = vsel %vm1230_vm15, %v6153_v34, %v6149_v22 }
0x137b   :  { %v5983_v25 = vpop.permute.xlu1 %5982  ;;  %v5980_v63 = vpop.permute.xlu0 %5979  ;;  %v6192_v27 = vsel %vm1373_vm4, %v6154_v9, %v6191_v3 }
0x137c   :  { %v6099_v42 = vrot.slane %v5983_v25, %v7408_v31  ;;  %v6095_v20 = vrot.slane %v5980_v63, %v7405_v13 }
0x137e   :  { %v6100_v37 = vsel %vm1230_vm15, %v6099_v42, %v6095_v20  ;;  %v9942_v20 = vld [vmem:[#allocation5_spill] sm:$0xff] }
0x137f   :  { %v6025_v51 = vpop.permute.xlu1 %6024  ;;  %v6022_v2 = vpop.permute.xlu0 %6021  ;;  %v6187_v32 = vsel %vm1377_vm5, %v6100_v37, %v6186_v57 }
0x1380   :  { %v6162_v36 = vrot.slane %v6025_v51, %v7408_v31  ;;  %v6158_v54 = vrot.slane %v6022_v2, %v7405_v13 }
0x1382   :  { %v6163_v45 = vsel %vm1230_vm15, %v6162_v36, %v6158_v54 }
0x1383   :  { %v5989_v10 = vpop.permute.xlu1 %5988  ;;  %v5986_v38 = vpop.permute.xlu0 %5985  ;;  %v6193_v44 = vsel %vm1375_vm6, %v6163_v45, %v6192_v27 }
0x1384   :  { %v6108_v15 = vrot.slane %v5989_v10, %v7408_v31  ;;  %v6104_v23 = vrot.slane %v5986_v38, %v7405_v13 }
0x1386   :  { %v6109_v59 = vsel %vm1230_vm15, %v6108_v15, %v6104_v23 }
0x1387   :  { %v6031_v1 = vpop.permute.xlu1 %6030  ;;  %v6028_v0 = vpop.permute.xlu0 %6027  ;;  %v6188_v4 = vsel %vm1379_vm7, %v6109_v59, %v6187_v32 }
0x1388   :  { %v6171_v21 = vrot.slane %v6031_v1, %v7408_v31  ;;  %v6167_v7 = vrot.slane %v6028_v0, %v7405_v13  ;;  %6465 = vmatprep.mubr.msk.f32.mxu0 %vm1390_vm8, %v6188_v4 }
0x138a   :  { %v6172_v43 = vsel %vm1230_vm15, %v6171_v21, %v6167_v7 }
0x138b   :  { %v6037_v50 = vpop.permute.xlu1 %6036  ;;  %v6034_v6 = vpop.permute.xlu0 %6033  ;;  %v6194_v11 = vsel %vm1377_vm5, %v6172_v43, %v6193_v44 }
0x138c   :  { %v6180_v47 = vrot.slane %v6037_v50, %v7408_v31  ;;  %v6176_v17 = vrot.slane %v6034_v6, %v7405_v13 }
0x138e   :  { %v6181_v25 = vsel %vm1230_vm15, %v6180_v47, %v6176_v17 }
0x138f   :  { %v6195_v63 = vsel %vm1379_vm7, %v6181_v25, %v6194_v11 }
0x1390   :  { %6466 = vmatmul.mubr.msk.f32.vlgmr.msra.gmra.mrb[10].mxu0 %vm1390_vm8, %v6195_v63 }
0x1463   :  { %v6467_v33 = vpop.f32.mrb[10].mxu0 }
0x1464   :  { %v6272_v35 = vadd.f32 %v6467_v33, %v6334_v49  ;;  %v6266_v61 = vpop.f32.mrb[11].mxu0 }
0x1465   :  { %v6267_v31 = vadd.f32 %v6334_v49, %v6266_v61 }
0x1466   :  { %v6278_v13 = vsel %vm754_vm14, %v6272_v35, 0.0 }
0x1467   :  { %6279 = vadd.xlane.f32.xlu1 %v6278_v13  ;;  %v6275_v19 = vsel %vm754_vm14, %v6267_v31, 0.0  ;;  %vm6292_vm14 = vcmask 188416  }
0x1468   :  { %6276 = vadd.xlane.f32.xlu0 %v6275_v19 }
0x14f4   :  { %v6280_v52 = vpop.xlane.xlu1 %6279 }
0x14f5   :  { %v6282_v14 = vmul.f32 %v9941_v56, %v6280_v52  ;;  %v6277_v42 = vpop.xlane.xlu0 %6276 }
0x14f6   :  { %v6281_v51 = vmul.f32 %v9942_v20, %v6277_v42 }
0x14f7   :  { %v6284_v2 = vsel %vm73_vm0, %v6282_v14, 0.0 }
0x14f8   :  { %v6283_v5 = vsel %vm73_vm0, %v6281_v51, 0.0 }
0x14f9   :  { %v6285_v18 = vadd.f32 %v6284_v2, %v6283_v5 }
0x14fb   :  { %v6286_v24 = vrot.slane %v6285_v18, 4 }
0x14fd   :  { %v6287_v46 = vadd.f32 %v6286_v24, %v6285_v18 }
0x14ff   :  { %v6288_v60 = vrot.slane %v6287_v46, 2 }
0x1501   :  { %v6289_v53 = vadd.f32 %v6288_v60, %v6287_v46 }
0x1503   :  { %v6290_v62 = vrot.slane %v6289_v53, 1 }
0x1505   :  { %v6291_v40 = vadd.f32 %v6290_v62, %v6289_v53 }
0x1507   :  { %6293 = vst.msk [vmem:[#allocation2] sm:$0x1] %vm6292_vm14, %v6291_v40 }
0x1508   :  { %6758 = shalt.err (!%p6755_p4)
}
0x1509   :  { %s6759_s26 = scalar_lea.hbm %s9526_s14, 16 }
0x150a   :  { %p6760_p5 = scmp.ne.s32.totalorder %s9526_s14, %s6759_s26  ;;  %p6763_p6 = scmp.lt.u32.totalorder %s6759_s26, %s9526_s14 }
0x150c   :  { %p6765_p7 = pnand %p6763_p6, %p6760_p5 }
0x150e   :  { %6768 = shalt.err (!%p6765_p7)
}
0x150f   :  { %6303 = dma.vmem_to_hbm [thread:$0]  %s6301_s13, 16, %s9526_s14, [#allocation3]  }
0x1510   :  { %6769 = dma.done.wait [#allocation3], 16  }
0x1511   :  { %6770 = vsyncadd [#allocation3], 4294967280 }
0x1512   :  { %6307 = vsyncpa [#allocation3], 1 }

</bundles_post_ra>
